<compile_context>
chip_gen: v7x
topology: tpu7x:2x2x1
jax: 0.10.0
libtpu: 0.0.40
codegen_flags: <defaults>
</compile_context>

<pallas_src>
import functools

import jax
import jax.numpy as jnp
from jax import lax
from jax.experimental import pallas as pl
from jax.experimental.pallas import tpu as pltpu


# ---------------------------------------------------------------------------
# fused RRDB kernel: one grid step = one ResidualDenseBlock_5C of one image
# ---------------------------------------------------------------------------
def _rrdb_kernel(alpha_ref, x_ref, w1, w2, w3, w4, w5, b_ref, mask_ref,
                 o_ref, feat, *, nc, gc, H, W):
    Hp, Wp = H + 2, W + 2
    Pp = Hp * Wp                 # padded plane, flattened on lanes
    L = Pp - 2 * Wp - 2          # compute window covering all interior pixels
    base = Wp + 1                # lane offset of output pixel (0,0) in the slab
    r = pl.program_id(1)

    mask = mask_ref[...]         # (1, L): 1 on interior columns, 0 on W-borders

    # --- start of a new image: load padded input x0, clear the dense scratch
    @pl.when(r == 0)
    def _():
        feat[0:nc, :] = x_ref[0]                                   # (nc, Pp)
        feat[nc:nc + 4 * gc, :] = jnp.zeros((4 * gc, Pp), jnp.float32)

    w_refs = (w1, w2, w3, w4, w5)
    couts = (gc, gc, gc, gc, nc)

    def conv(k):
        """3x3 conv k: (Cout, L) = sum over 9 taps of W_t @ lane-shifted slab."""
        cin = nc + k * gc
        cout = couts[k]
        wr = w_refs[k]
        acc = jnp.zeros((cout, L), jnp.float32)
        for t in range(9):
            dy, dx = divmod(t, 3)
            off = dy * Wp + dx                      # static lane shift (0..38)
            xs = feat[0:cin, off:off + L]           # (cin, L)
            acc = acc + jnp.dot(wr[0, t], xs,
                                preferred_element_type=jnp.float32)
        bias = b_ref[0, k * 16:k * 16 + cout, :]    # (cout, 1) column
        return acc + bias

    # dense convs 1..4: LeakyReLU(0.2), results appended to the scratch slab
    for k in range(4):
        y = conv(k)
        y = jnp.where(y >= 0, y, 0.2 * y) * mask
        feat[nc + k * gc:nc + (k + 1) * gc, base:base + L] = y

    # conv5 (no activation) + fused local residual  x5*0.2 + x  -> new block input
    y5 = conv(4)
    feat[0:nc, base:base + L] = (y5 * 0.2 + feat[0:nc, base:base + L]) * mask

    # --- after the last RDB: global gated residual  out*(x1*lda) + x0
    @pl.when(r == pl.num_programs(1) - 1)
    def _():
        alpha = alpha_ref[0]
        o_ref[0] = (feat[0:nc, :] * alpha + x_ref[0]).astype(o_ref.dtype)


# ---------------------------------------------------------------------------
# wrapper: layout plumbing (pad/flatten, weight & bias packing) + pallas_call
# ---------------------------------------------------------------------------
def rrdb_ada_pallas(x0_nchw, x1, lda, params_oihw, *, nc, gc):
    N, C, H, W = x0_nchw.shape
    assert C == nc
    Hp, Wp = H + 2, W + 2
    Pp = Hp * Wp
    L = Pp - 2 * Wp - 2
    base = Wp + 1

    # lane-dense padded slabs: (N, C, Hp*Wp); C on sublanes, spatial on lanes
    xpad = jnp.pad(x0_nchw.astype(jnp.float32),
                   ((0, 0), (0, 0), (1, 1), (1, 1))).reshape(N, C, Pp)

    alpha = jnp.reshape(x1 * lda, (1,)).astype(jnp.float32)   # SMEM prefetch

    # weights packed per conv over the 3 RDBs: (3, 9, Cout, Cin), tap-major
    def pack_w(idx):
        ws = []
        for p in params_oihw:
            w = jnp.transpose(p[f"w{idx}"], (2, 3, 0, 1))     # (3,3,Cout,Cin)
            ws.append(w.reshape(9, w.shape[2], w.shape[3]))
        return jnp.stack(ws)
    w_packed = [pack_w(i) for i in range(1, 6)]

    # biases packed as lane-1 columns: (3, 5*16, 1); conv k uses rows [16k, ...)
    brows = []
    for p in params_oihw:
        row = jnp.zeros((5 * 16,), jnp.float32)
        for i in range(5):
            b = p[f"b{i + 1}"]
            row = row.at[i * 16:i * 16 + b.shape[0]].set(b)
        brows.append(row)
    b_packed = jnp.stack(brows)[..., None]

    # interior-column mask over the compute window (zeros on W-pad columns)
    valid = jnp.zeros((Hp, Wp), jnp.float32).at[1:H + 1, 1:W + 1].set(1.0)
    mask = valid.reshape(Pp)[base:base + L].reshape(1, L)

    cins = [nc + k * gc for k in range(5)]
    couts = [gc, gc, gc, gc, nc]

    kernel = functools.partial(_rrdb_kernel, nc=nc, gc=gc, H=H, W=W)
    out_pad = pl.pallas_call(
        kernel,
        out_shape=jax.ShapeDtypeStruct((N, nc, Pp), jnp.float32),
        grid_spec=pltpu.PrefetchScalarGridSpec(
            num_scalar_prefetch=1,          # alpha = x1 * lda
            grid=(N, 3),                    # batch (parallel) x RDB (arbitrary)
            in_specs=[
                pl.BlockSpec((1, nc, Pp), lambda n, r, a: (n, 0, 0)),
                *[pl.BlockSpec((1, 9, co, ci), lambda n, r, a: (r, 0, 0, 0))
                  for co, ci in zip(couts, cins)],
                pl.BlockSpec((1, 5 * 16, 1), lambda n, r, a: (r, 0, 0)),
                pl.BlockSpec((1, L), lambda n, r, a: (0, 0)),
            ],
            out_specs=pl.BlockSpec((1, nc, Pp), lambda n, r, a: (n, 0, 0)),
            scratch_shapes=[pltpu.VMEM((nc + 4 * gc, Pp), jnp.float32)],
        ),
        compiler_params=pltpu.CompilerParams(
            dimension_semantics=("parallel", "arbitrary")),
    )(alpha, xpad, *w_packed, b_packed, mask)

    out = out_pad.reshape(N, nc, Hp, Wp)[:, :, 1:H + 1, 1:W + 1]
    return out.astype(x0_nchw.dtype), x1


# ---------------------------------------------------------------------------
# pure-JAX reference mirroring the PyTorch forward (f32, HIGHEST precision)
# ---------------------------------------------------------------------------
def _conv2d_ref(x, w, b):
    y = lax.conv_general_dilated(
        x, w, window_strides=(1, 1), padding=((1, 1), (1, 1)),
        dimension_numbers=("NCHW", "OIHW", "NCHW"),
        precision=lax.Precision.HIGHEST)
    return y + b[None, :, None, None]


def _lrelu(x):
    return jnp.where(x >= 0, x, 0.2 * x)


def rdb5c_ref(x, p):
    x1 = _lrelu(_conv2d_ref(x, p["w1"], p["b1"]))
    x2 = _lrelu(_conv2d_ref(jnp.concatenate([x, x1], 1), p["w2"], p["b2"]))
    x3 = _lrelu(_conv2d_ref(jnp.concatenate([x, x1, x2], 1), p["w3"], p["b3"]))
    x4 = _lrelu(_conv2d_ref(jnp.concatenate([x, x1, x2, x3], 1), p["w4"],
                            p["b4"]))
    x5 = _conv2d_ref(jnp.concatenate([x, x1, x2, x3, x4], 1), p["w5"], p["b5"])
    return x5 * 0.2 + x


def rrdb_ada_ref(x0, x1, lda, params_oihw):
    out = x0
    for p in params_oihw:
        out = rdb5c_ref(out, p)
    return out * (x1 * lda) + x0, x1


# ---------------------------------------------------------------------------
# parameters
# ---------------------------------------------------------------------------
def make_rdb_params(key, nc, gc):
    ks = jax.random.split(key, 10)
    shapes = [(gc, nc), (gc, nc + gc), (gc, nc + 2 * gc),
              (gc, nc + 3 * gc), (nc, nc + 4 * gc)]
    p = {}
    for i, (co, ci) in enumerate(shapes, start=1):
        fan_in = float(ci * 9)
        p[f"w{i}"] = jax.random.normal(ks[2 * (i - 1)], (co, ci, 3, 3),
                                       jnp.float32) / jnp.sqrt(fan_in)
        p[f"b{i}"] = jax.random.normal(ks[2 * (i - 1) + 1], (co,),
                                       jnp.float32) * 0.05
    return p


if __name__ == "__main__":
    # Small shapes consistent with the module: nc=16, gc=8, 16x16 images.
    N, nc, gc, H, W = 2, 16, 8, 16, 16

    key = jax.random.PRNGKey(0)
    kx, k1, k2, k3 = jax.random.split(key, 4)

    x0 = jax.random.normal(kx, (N, nc, H, W), jnp.float32)   # x[0]
    x1 = jnp.array(0.75, jnp.float32)                        # x[1] (scalar gate)
    lda = jnp.array(0.4, jnp.float32)                        # nn.Parameter([0.4])

    params_oihw = [make_rdb_params(k, nc, gc) for k in (k1, k2, k3)]

    fwd = jax.jit(functools.partial(rrdb_ada_pallas, nc=nc, gc=gc))
    out, coef = fwd(x0, x1, lda, params_oihw)
    out = jax.block_until_ready(out)

    ref_out, ref_coef = rrdb_ada_ref(x0, x1, lda, params_oihw)

    assert out.shape == (N, nc, H, W)
    # DEFAULT matmul precision (single bf16 MXU pass) vs f32 HIGHEST reference:
    # measured error is O(1e-3); 1e-2 tolerance still catches structural bugs.
    assert jnp.allclose(out, ref_out, atol=1e-2, rtol=1e-2), "mismatch vs reference"
    assert jnp.allclose(coef, ref_coef)

    print("KERNEL_OK")
</pallas_src>

<mosaic_0001>
module attributes {stable_mosaic.version = 11 : i64} {
  func.func @_rrdb_kernel(%arg0: i32, %arg1: i32, %arg2: memref<1xf32, #tpu.memory_space<smem>>, %arg3: memref<1x16x324xf32, #tpu.memory_space<vmem>>, %arg4: memref<1x9x8x16xf32, #tpu.memory_space<vmem>>, %arg5: memref<1x9x8x24xf32, #tpu.memory_space<vmem>>, %arg6: memref<1x9x8x32xf32, #tpu.memory_space<vmem>>, %arg7: memref<1x9x8x40xf32, #tpu.memory_space<vmem>>, %arg8: memref<1x9x16x48xf32, #tpu.memory_space<vmem>>, %arg9: memref<1x80x1xf32, #tpu.memory_space<vmem>>, %arg10: memref<1x286xf32, #tpu.memory_space<vmem>>, %arg11: memref<1x16x324xf32, #tpu.memory_space<vmem>>, %arg12: memref<48x324xf32, #tpu.memory_space<vmem>>) attributes {dimension_semantics = [#tpu.dimension_semantics<parallel>, #tpu.dimension_semantics<arbitrary>], iteration_bounds = array<i64: 2, 3>, scalar_prefetch = 1 : i64, scratch_operands = 1 : i64, tpu.core_type = #tpu.core_type<tc>, window_params = [{transform_indices = @transform_0, window_bounds = array<i64: 1, 16, 324>}, {transform_indices = @transform_1, window_bounds = array<i64: 1, 9, 8, 16>}, {transform_indices = @transform_2, window_bounds = array<i64: 1, 9, 8, 24>}, {transform_indices = @transform_3, window_bounds = array<i64: 1, 9, 8, 32>}, {transform_indices = @transform_4, window_bounds = array<i64: 1, 9, 8, 40>}, {transform_indices = @transform_5, window_bounds = array<i64: 1, 9, 16, 48>}, {transform_indices = @transform_6, window_bounds = array<i64: 1, 80, 1>}, {pipeline_mode = #tpu.pipeline_mode<synchronous>, transform_indices = @transform_7, window_bounds = array<i64: 1, 286>}, {transform_indices = @transform_8, window_bounds = array<i64: 1, 16, 324>}]} {
    %c0 = arith.constant 0 : index
    %c0_0 = arith.constant 0 : index
    %0 = vector.load %arg10[%c0, %c0_0] : memref<1x286xf32, #tpu.memory_space<vmem>>, vector<1x286xf32>
    %c0_i32 = arith.constant 0 : i32
    %1 = arith.cmpi eq, %arg1, %c0_i32 : i32
    %2 = arith.extui %1 : i1 to i32
    %c0_i32_1 = arith.constant 0 : i32
    %3 = arith.cmpi ne, %2, %c0_i32_1 : i32
    scf.if %3 {
      %c0_338 = arith.constant 0 : index
      %c0_339 = arith.constant 0 : index
      %c0_340 = arith.constant 0 : index
      %296 = vector.load %arg3[%c0_338, %c0_339, %c0_340] : memref<1x16x324xf32, #tpu.memory_space<vmem>>, vector<1x16x324xf32>
      %297 = vector.shape_cast %296 : vector<1x16x324xf32> to vector<16x324xf32>
      %c0_341 = arith.constant 0 : index
      %c0_342 = arith.constant 0 : index
      %298 = vector.load %arg12[%c0_341, %c0_342] : memref<48x324xf32, #tpu.memory_space<vmem>>, vector<16x324xf32>
      tpu.vector_store %arg12[%c0_341, %c0_342], %297 {strides = array<i32>} : memref<48x324xf32, #tpu.memory_space<vmem>>, vector<16x324xf32>,
      %cst_343 = arith.constant 0.000000e+00 : f32
      %299 = vector.broadcast %cst_343 : f32 to vector<32x324xf32>
      %c16_344 = arith.constant 16 : index
      %c0_345 = arith.constant 0 : index
      %300 = vector.load %arg12[%c16_344, %c0_345] : memref<48x324xf32, #tpu.memory_space<vmem>>, vector<32x324xf32>
      tpu.vector_store %arg12[%c16_344, %c0_345], %299 {strides = array<i32>} : memref<48x324xf32, #tpu.memory_space<vmem>>, vector<32x324xf32>,
    } else {
    }
    %cst = arith.constant 0.000000e+00 : f32
    %4 = vector.broadcast %cst : f32 to vector<8x286xf32>
    %c0_2 = arith.constant 0 : index
    %c0_3 = arith.constant 0 : index
    %5 = vector.load %arg12[%c0_2, %c0_3] : memref<48x324xf32, #tpu.memory_space<vmem>>, vector<16x286xf32>
    %c0_4 = arith.constant 0 : index
    %c0_5 = arith.constant 0 : index
    %c0_6 = arith.constant 0 : index
    %c0_7 = arith.constant 0 : index
    %6 = vector.load %arg4[%c0_4, %c0_5, %c0_6, %c0_7] : memref<1x9x8x16xf32, #tpu.memory_space<vmem>>, vector<1x1x8x16xf32>
    %7 = vector.shape_cast %6 : vector<1x1x8x16xf32> to vector<8x16xf32>
    %cst_8 = arith.constant dense<0.000000e+00> : vector<8x286xf32>
    %8 = tpu.matmul %7, %5, %cst_8 {dimension_numbers = #tpu.dot_dimension_numbers<[1], [0], [0], [1], [0, 0, 1, 1], [], []>} : vector<8x16xf32>, vector<16x286xf32>, vector<8x286xf32> -> vector<8x286xf32>
    %9 = arith.addf %4, %8 : vector<8x286xf32>
    %c0_9 = arith.constant 0 : index
    %c1 = arith.constant 1 : index
    %10 = vector.load %arg12[%c0_9, %c1] : memref<48x324xf32, #tpu.memory_space<vmem>>, vector<16x286xf32>
    %c0_10 = arith.constant 0 : index
    %c1_11 = arith.constant 1 : index
    %c0_12 = arith.constant 0 : index
    %c0_13 = arith.constant 0 : index
    %11 = vector.load %arg4[%c0_10, %c1_11, %c0_12, %c0_13] : memref<1x9x8x16xf32, #tpu.memory_space<vmem>>, vector<1x1x8x16xf32>
    %12 = vector.shape_cast %11 : vector<1x1x8x16xf32> to vector<8x16xf32>
    %cst_14 = arith.constant dense<0.000000e+00> : vector<8x286xf32>
    %13 = tpu.matmul %12, %10, %cst_14 {dimension_numbers = #tpu.dot_dimension_numbers<[1], [0], [0], [1], [0, 0, 1, 1], [], []>} : vector<8x16xf32>, vector<16x286xf32>, vector<8x286xf32> -> vector<8x286xf32>
    %14 = arith.addf %9, %13 : vector<8x286xf32>
    %c0_15 = arith.constant 0 : index
    %c2 = arith.constant 2 : index
    %15 = vector.load %arg12[%c0_15, %c2] : memref<48x324xf32, #tpu.memory_space<vmem>>, vector<16x286xf32>
    %c0_16 = arith.constant 0 : index
    %c2_17 = arith.constant 2 : index
    %c0_18 = arith.constant 0 : index
    %c0_19 = arith.constant 0 : index
    %16 = vector.load %arg4[%c0_16, %c2_17, %c0_18, %c0_19] : memref<1x9x8x16xf32, #tpu.memory_space<vmem>>, vector<1x1x8x16xf32>
    %17 = vector.shape_cast %16 : vector<1x1x8x16xf32> to vector<8x16xf32>
    %cst_20 = arith.constant dense<0.000000e+00> : vector<8x286xf32>
    %18 = tpu.matmul %17, %15, %cst_20 {dimension_numbers = #tpu.dot_dimension_numbers<[1], [0], [0], [1], [0, 0, 1, 1], [], []>} : vector<8x16xf32>, vector<16x286xf32>, vector<8x286xf32> -> vector<8x286xf32>
    %19 = arith.addf %14, %18 : vector<8x286xf32>
    %c0_21 = arith.constant 0 : index
    %c18 = arith.constant 18 : index
    %20 = vector.load %arg12[%c0_21, %c18] : memref<48x324xf32, #tpu.memory_space<vmem>>, vector<16x286xf32>
    %c0_22 = arith.constant 0 : index
    %c3 = arith.constant 3 : index
    %c0_23 = arith.constant 0 : index
    %c0_24 = arith.constant 0 : index
    %21 = vector.load %arg4[%c0_22, %c3, %c0_23, %c0_24] : memref<1x9x8x16xf32, #tpu.memory_space<vmem>>, vector<1x1x8x16xf32>
    %22 = vector.shape_cast %21 : vector<1x1x8x16xf32> to vector<8x16xf32>
    %cst_25 = arith.constant dense<0.000000e+00> : vector<8x286xf32>
    %23 = tpu.matmul %22, %20, %cst_25 {dimension_numbers = #tpu.dot_dimension_numbers<[1], [0], [0], [1], [0, 0, 1, 1], [], []>} : vector<8x16xf32>, vector<16x286xf32>, vector<8x286xf32> -> vector<8x286xf32>
    %24 = arith.addf %19, %23 : vector<8x286xf32>
    %c0_26 = arith.constant 0 : index
    %c19 = arith.constant 19 : index
    %25 = vector.load %arg12[%c0_26, %c19] : memref<48x324xf32, #tpu.memory_space<vmem>>, vector<16x286xf32>
    %c0_27 = arith.constant 0 : index
    %c4 = arith.constant 4 : index
    %c0_28 = arith.constant 0 : index
    %c0_29 = arith.constant 0 : index
    %26 = vector.load %arg4[%c0_27, %c4, %c0_28, %c0_29] : memref<1x9x8x16xf32, #tpu.memory_space<vmem>>, vector<1x1x8x16xf32>
    %27 = vector.shape_cast %26 : vector<1x1x8x16xf32> to vector<8x16xf32>
    %cst_30 = arith.constant dense<0.000000e+00> : vector<8x286xf32>
    %28 = tpu.matmul %27, %25, %cst_30 {dimension_numbers = #tpu.dot_dimension_numbers<[1], [0], [0], [1], [0, 0, 1, 1], [], []>} : vector<8x16xf32>, vector<16x286xf32>, vector<8x286xf32> -> vector<8x286xf32>
    %29 = arith.addf %24, %28 : vector<8x286xf32>
    %c0_31 = arith.constant 0 : index
    %c20 = arith.constant 20 : index
    %30 = vector.load %arg12[%c0_31, %c20] : memref<48x324xf32, #tpu.memory_space<vmem>>, vector<16x286xf32>
    %c0_32 = arith.constant 0 : index
    %c5 = arith.constant 5 : index
    %c0_33 = arith.constant 0 : index
    %c0_34 = arith.constant 0 : index
    %31 = vector.load %arg4[%c0_32, %c5, %c0_33, %c0_34] : memref<1x9x8x16xf32, #tpu.memory_space<vmem>>, vector<1x1x8x16xf32>
    %32 = vector.shape_cast %31 : vector<1x1x8x16xf32> to vector<8x16xf32>
    %cst_35 = arith.constant dense<0.000000e+00> : vector<8x286xf32>
    %33 = tpu.matmul %32, %30, %cst_35 {dimension_numbers = #tpu.dot_dimension_numbers<[1], [0], [0], [1], [0, 0, 1, 1], [], []>} : vector<8x16xf32>, vector<16x286xf32>, vector<8x286xf32> -> vector<8x286xf32>
    %34 = arith.addf %29, %33 : vector<8x286xf32>
    %c0_36 = arith.constant 0 : index
    %c36 = arith.constant 36 : index
    %35 = vector.load %arg12[%c0_36, %c36] : memref<48x324xf32, #tpu.memory_space<vmem>>, vector<16x286xf32>
    %c0_37 = arith.constant 0 : index
    %c6 = arith.constant 6 : index
    %c0_38 = arith.constant 0 : index
    %c0_39 = arith.constant 0 : index
    %36 = vector.load %arg4[%c0_37, %c6, %c0_38, %c0_39] : memref<1x9x8x16xf32, #tpu.memory_space<vmem>>, vector<1x1x8x16xf32>
    %37 = vector.shape_cast %36 : vector<1x1x8x16xf32> to vector<8x16xf32>
    %cst_40 = arith.constant dense<0.000000e+00> : vector<8x286xf32>
    %38 = tpu.matmul %37, %35, %cst_40 {dimension_numbers = #tpu.dot_dimension_numbers<[1], [0], [0], [1], [0, 0, 1, 1], [], []>} : vector<8x16xf32>, vector<16x286xf32>, vector<8x286xf32> -> vector<8x286xf32>
    %39 = arith.addf %34, %38 : vector<8x286xf32>
    %c0_41 = arith.constant 0 : index
    %c37 = arith.constant 37 : index
    %40 = vector.load %arg12[%c0_41, %c37] : memref<48x324xf32, #tpu.memory_space<vmem>>, vector<16x286xf32>
    %c0_42 = arith.constant 0 : index
    %c7 = arith.constant 7 : index
    %c0_43 = arith.constant 0 : index
    %c0_44 = arith.constant 0 : index
    %41 = vector.load %arg4[%c0_42, %c7, %c0_43, %c0_44] : memref<1x9x8x16xf32, #tpu.memory_space<vmem>>, vector<1x1x8x16xf32>
    %42 = vector.shape_cast %41 : vector<1x1x8x16xf32> to vector<8x16xf32>
    %cst_45 = arith.constant dense<0.000000e+00> : vector<8x286xf32>
    %43 = tpu.matmul %42, %40, %cst_45 {dimension_numbers = #tpu.dot_dimension_numbers<[1], [0], [0], [1], [0, 0, 1, 1], [], []>} : vector<8x16xf32>, vector<16x286xf32>, vector<8x286xf32> -> vector<8x286xf32>
    %44 = arith.addf %39, %43 : vector<8x286xf32>
    %c0_46 = arith.constant 0 : index
    %c38 = arith.constant 38 : index
    %45 = vector.load %arg12[%c0_46, %c38] : memref<48x324xf32, #tpu.memory_space<vmem>>, vector<16x286xf32>
    %c0_47 = arith.constant 0 : index
    %c8 = arith.constant 8 : index
    %c0_48 = arith.constant 0 : index
    %c0_49 = arith.constant 0 : index
    %46 = vector.load %arg4[%c0_47, %c8, %c0_48, %c0_49] : memref<1x9x8x16xf32, #tpu.memory_space<vmem>>, vector<1x1x8x16xf32>
    %47 = vector.shape_cast %46 : vector<1x1x8x16xf32> to vector<8x16xf32>
    %cst_50 = arith.constant dense<0.000000e+00> : vector<8x286xf32>
    %48 = tpu.matmul %47, %45, %cst_50 {dimension_numbers = #tpu.dot_dimension_numbers<[1], [0], [0], [1], [0, 0, 1, 1], [], []>} : vector<8x16xf32>, vector<16x286xf32>, vector<8x286xf32> -> vector<8x286xf32>
    %49 = arith.addf %44, %48 : vector<8x286xf32>
    %c0_51 = arith.constant 0 : index
    %c0_52 = arith.constant 0 : index
    %c0_53 = arith.constant 0 : index
    %50 = vector.load %arg9[%c0_51, %c0_52, %c0_53] : memref<1x80x1xf32, #tpu.memory_space<vmem>>, vector<1x8x1xf32>
    %51 = vector.shape_cast %50 : vector<1x8x1xf32> to vector<8x1xf32>
    %52 = vector.broadcast %51 : vector<8x1xf32> to vector<8x286xf32>
    %53 = arith.addf %49, %52 : vector<8x286xf32>
    %cst_54 = arith.constant 0.000000e+00 : f32
    %54 = vector.broadcast %cst_54 : f32 to vector<8x286xf32>
    %55 = arith.cmpf oge, %53, %54 : vector<8x286xf32>
    %cst_55 = arith.constant 2.000000e-01 : f32
    %56 = vector.broadcast %cst_55 : f32 to vector<8x286xf32>
    %57 = arith.mulf %56, %53 : vector<8x286xf32>
    %58 = arith.select %55, %53, %57 : vector<8x286xi1>, vector<8x286xf32>
    %59 = vector.broadcast %0 : vector<1x286xf32> to vector<8x286xf32>
    %60 = arith.mulf %58, %59 : vector<8x286xf32>
    %c16 = arith.constant 16 : index
    %c19_56 = arith.constant 19 : index
    %61 = vector.load %arg12[%c16, %c19_56] : memref<48x324xf32, #tpu.memory_space<vmem>>, vector<8x286xf32>
    tpu.vector_store %arg12[%c16, %c19_56], %60 {strides = array<i32>} : memref<48x324xf32, #tpu.memory_space<vmem>>, vector<8x286xf32>,
    %cst_57 = arith.constant 0.000000e+00 : f32
    %62 = vector.broadcast %cst_57 : f32 to vector<8x286xf32>
    %c0_58 = arith.constant 0 : index
    %c0_59 = arith.constant 0 : index
    %63 = vector.load %arg12[%c0_58, %c0_59] : memref<48x324xf32, #tpu.memory_space<vmem>>, vector<24x286xf32>
    %c0_60 = arith.constant 0 : index
    %c0_61 = arith.constant 0 : index
    %c0_62 = arith.constant 0 : index
    %c0_63 = arith.constant 0 : index
    %64 = vector.load %arg5[%c0_60, %c0_61, %c0_62, %c0_63] : memref<1x9x8x24xf32, #tpu.memory_space<vmem>>, vector<1x1x8x24xf32>
    %65 = vector.shape_cast %64 : vector<1x1x8x24xf32> to vector<8x24xf32>
    %cst_64 = arith.constant dense<0.000000e+00> : vector<8x286xf32>
    %66 = tpu.matmul %65, %63, %cst_64 {dimension_numbers = #tpu.dot_dimension_numbers<[1], [0], [0], [1], [0, 0, 1, 1], [], []>} : vector<8x24xf32>, vector<24x286xf32>, vector<8x286xf32> -> vector<8x286xf32>
    %67 = arith.addf %62, %66 : vector<8x286xf32>
    %c0_65 = arith.constant 0 : index
    %c1_66 = arith.constant 1 : index
    %68 = vector.load %arg12[%c0_65, %c1_66] : memref<48x324xf32, #tpu.memory_space<vmem>>, vector<24x286xf32>
    %c0_67 = arith.constant 0 : index
    %c1_68 = arith.constant 1 : index
    %c0_69 = arith.constant 0 : index
    %c0_70 = arith.constant 0 : index
    %69 = vector.load %arg5[%c0_67, %c1_68, %c0_69, %c0_70] : memref<1x9x8x24xf32, #tpu.memory_space<vmem>>, vector<1x1x8x24xf32>
    %70 = vector.shape_cast %69 : vector<1x1x8x24xf32> to vector<8x24xf32>
    %cst_71 = arith.constant dense<0.000000e+00> : vector<8x286xf32>
    %71 = tpu.matmul %70, %68, %cst_71 {dimension_numbers = #tpu.dot_dimension_numbers<[1], [0], [0], [1], [0, 0, 1, 1], [], []>} : vector<8x24xf32>, vector<24x286xf32>, vector<8x286xf32> -> vector<8x286xf32>
    %72 = arith.addf %67, %71 : vector<8x286xf32>
    %c0_72 = arith.constant 0 : index
    %c2_73 = arith.constant 2 : index
    %73 = vector.load %arg12[%c0_72, %c2_73] : memref<48x324xf32, #tpu.memory_space<vmem>>, vector<24x286xf32>
    %c0_74 = arith.constant 0 : index
    %c2_75 = arith.constant 2 : index
    %c0_76 = arith.constant 0 : index
    %c0_77 = arith.constant 0 : index
    %74 = vector.load %arg5[%c0_74, %c2_75, %c0_76, %c0_77] : memref<1x9x8x24xf32, #tpu.memory_space<vmem>>, vector<1x1x8x24xf32>
    %75 = vector.shape_cast %74 : vector<1x1x8x24xf32> to vector<8x24xf32>
    %cst_78 = arith.constant dense<0.000000e+00> : vector<8x286xf32>
    %76 = tpu.matmul %75, %73, %cst_78 {dimension_numbers = #tpu.dot_dimension_numbers<[1], [0], [0], [1], [0, 0, 1, 1], [], []>} : vector<8x24xf32>, vector<24x286xf32>, vector<8x286xf32> -> vector<8x286xf32>
    %77 = arith.addf %72, %76 : vector<8x286xf32>
    %c0_79 = arith.constant 0 : index
    %c18_80 = arith.constant 18 : index
    %78 = vector.load %arg12[%c0_79, %c18_80] : memref<48x324xf32, #tpu.memory_space<vmem>>, vector<24x286xf32>
    %c0_81 = arith.constant 0 : index
    %c3_82 = arith.constant 3 : index
    %c0_83 = arith.constant 0 : index
    %c0_84 = arith.constant 0 : index
    %79 = vector.load %arg5[%c0_81, %c3_82, %c0_83, %c0_84] : memref<1x9x8x24xf32, #tpu.memory_space<vmem>>, vector<1x1x8x24xf32>
    %80 = vector.shape_cast %79 : vector<1x1x8x24xf32> to vector<8x24xf32>
    %cst_85 = arith.constant dense<0.000000e+00> : vector<8x286xf32>
    %81 = tpu.matmul %80, %78, %cst_85 {dimension_numbers = #tpu.dot_dimension_numbers<[1], [0], [0], [1], [0, 0, 1, 1], [], []>} : vector<8x24xf32>, vector<24x286xf32>, vector<8x286xf32> -> vector<8x286xf32>
    %82 = arith.addf %77, %81 : vector<8x286xf32>
    %c0_86 = arith.constant 0 : index
    %c19_87 = arith.constant 19 : index
    %83 = vector.load %arg12[%c0_86, %c19_87] : memref<48x324xf32, #tpu.memory_space<vmem>>, vector<24x286xf32>
    %c0_88 = arith.constant 0 : index
    %c4_89 = arith.constant 4 : index
    %c0_90 = arith.constant 0 : index
    %c0_91 = arith.constant 0 : index
    %84 = vector.load %arg5[%c0_88, %c4_89, %c0_90, %c0_91] : memref<1x9x8x24xf32, #tpu.memory_space<vmem>>, vector<1x1x8x24xf32>
    %85 = vector.shape_cast %84 : vector<1x1x8x24xf32> to vector<8x24xf32>
    %cst_92 = arith.constant dense<0.000000e+00> : vector<8x286xf32>
    %86 = tpu.matmul %85, %83, %cst_92 {dimension_numbers = #tpu.dot_dimension_numbers<[1], [0], [0], [1], [0, 0, 1, 1], [], []>} : vector<8x24xf32>, vector<24x286xf32>, vector<8x286xf32> -> vector<8x286xf32>
    %87 = arith.addf %82, %86 : vector<8x286xf32>
    %c0_93 = arith.constant 0 : index
    %c20_94 = arith.constant 20 : index
    %88 = vector.load %arg12[%c0_93, %c20_94] : memref<48x324xf32, #tpu.memory_space<vmem>>, vector<24x286xf32>
    %c0_95 = arith.constant 0 : index
    %c5_96 = arith.constant 5 : index
    %c0_97 = arith.constant 0 : index
    %c0_98 = arith.constant 0 : index
    %89 = vector.load %arg5[%c0_95, %c5_96, %c0_97, %c0_98] : memref<1x9x8x24xf32, #tpu.memory_space<vmem>>, vector<1x1x8x24xf32>
    %90 = vector.shape_cast %89 : vector<1x1x8x24xf32> to vector<8x24xf32>
    %cst_99 = arith.constant dense<0.000000e+00> : vector<8x286xf32>
    %91 = tpu.matmul %90, %88, %cst_99 {dimension_numbers = #tpu.dot_dimension_numbers<[1], [0], [0], [1], [0, 0, 1, 1], [], []>} : vector<8x24xf32>, vector<24x286xf32>, vector<8x286xf32> -> vector<8x286xf32>
    %92 = arith.addf %87, %91 : vector<8x286xf32>
    %c0_100 = arith.constant 0 : index
    %c36_101 = arith.constant 36 : index
    %93 = vector.load %arg12[%c0_100, %c36_101] : memref<48x324xf32, #tpu.memory_space<vmem>>, vector<24x286xf32>
    %c0_102 = arith.constant 0 : index
    %c6_103 = arith.constant 6 : index
    %c0_104 = arith.constant 0 : index
    %c0_105 = arith.constant 0 : index
    %94 = vector.load %arg5[%c0_102, %c6_103, %c0_104, %c0_105] : memref<1x9x8x24xf32, #tpu.memory_space<vmem>>, vector<1x1x8x24xf32>
    %95 = vector.shape_cast %94 : vector<1x1x8x24xf32> to vector<8x24xf32>
    %cst_106 = arith.constant dense<0.000000e+00> : vector<8x286xf32>
    %96 = tpu.matmul %95, %93, %cst_106 {dimension_numbers = #tpu.dot_dimension_numbers<[1], [0], [0], [1], [0, 0, 1, 1], [], []>} : vector<8x24xf32>, vector<24x286xf32>, vector<8x286xf32> -> vector<8x286xf32>
    %97 = arith.addf %92, %96 : vector<8x286xf32>
    %c0_107 = arith.constant 0 : index
    %c37_108 = arith.constant 37 : index
    %98 = vector.load %arg12[%c0_107, %c37_108] : memref<48x324xf32, #tpu.memory_space<vmem>>, vector<24x286xf32>
    %c0_109 = arith.constant 0 : index
    %c7_110 = arith.constant 7 : index
    %c0_111 = arith.constant 0 : index
    %c0_112 = arith.constant 0 : index
    %99 = vector.load %arg5[%c0_109, %c7_110, %c0_111, %c0_112] : memref<1x9x8x24xf32, #tpu.memory_space<vmem>>, vector<1x1x8x24xf32>
    %100 = vector.shape_cast %99 : vector<1x1x8x24xf32> to vector<8x24xf32>
    %cst_113 = arith.constant dense<0.000000e+00> : vector<8x286xf32>
    %101 = tpu.matmul %100, %98, %cst_113 {dimension_numbers = #tpu.dot_dimension_numbers<[1], [0], [0], [1], [0, 0, 1, 1], [], []>} : vector<8x24xf32>, vector<24x286xf32>, vector<8x286xf32> -> vector<8x286xf32>
    %102 = arith.addf %97, %101 : vector<8x286xf32>
    %c0_114 = arith.constant 0 : index
    %c38_115 = arith.constant 38 : index
    %103 = vector.load %arg12[%c0_114, %c38_115] : memref<48x324xf32, #tpu.memory_space<vmem>>, vector<24x286xf32>
    %c0_116 = arith.constant 0 : index
    %c8_117 = arith.constant 8 : index
    %c0_118 = arith.constant 0 : index
    %c0_119 = arith.constant 0 : index
    %104 = vector.load %arg5[%c0_116, %c8_117, %c0_118, %c0_119] : memref<1x9x8x24xf32, #tpu.memory_space<vmem>>, vector<1x1x8x24xf32>
    %105 = vector.shape_cast %104 : vector<1x1x8x24xf32> to vector<8x24xf32>
    %cst_120 = arith.constant dense<0.000000e+00> : vector<8x286xf32>
    %106 = tpu.matmul %105, %103, %cst_120 {dimension_numbers = #tpu.dot_dimension_numbers<[1], [0], [0], [1], [0, 0, 1, 1], [], []>} : vector<8x24xf32>, vector<24x286xf32>, vector<8x286xf32> -> vector<8x286xf32>
    %107 = arith.addf %102, %106 : vector<8x286xf32>
    %c0_121 = arith.constant 0 : index
    %c16_122 = arith.constant 16 : index
    %c0_123 = arith.constant 0 : index
    %108 = vector.load %arg9[%c0_121, %c16_122, %c0_123] : memref<1x80x1xf32, #tpu.memory_space<vmem>>, vector<1x8x1xf32>
    %109 = vector.shape_cast %108 : vector<1x8x1xf32> to vector<8x1xf32>
    %110 = vector.broadcast %109 : vector<8x1xf32> to vector<8x286xf32>
    %111 = arith.addf %107, %110 : vector<8x286xf32>
    %cst_124 = arith.constant 0.000000e+00 : f32
    %112 = vector.broadcast %cst_124 : f32 to vector<8x286xf32>
    %113 = arith.cmpf oge, %111, %112 : vector<8x286xf32>
    %cst_125 = arith.constant 2.000000e-01 : f32
    %114 = vector.broadcast %cst_125 : f32 to vector<8x286xf32>
    %115 = arith.mulf %114, %111 : vector<8x286xf32>
    %116 = arith.select %113, %111, %115 : vector<8x286xi1>, vector<8x286xf32>
    %117 = vector.broadcast %0 : vector<1x286xf32> to vector<8x286xf32>
    %118 = arith.mulf %116, %117 : vector<8x286xf32>
    %c24 = arith.constant 24 : index
    %c19_126 = arith.constant 19 : index
    %119 = vector.load %arg12[%c24, %c19_126] : memref<48x324xf32, #tpu.memory_space<vmem>>, vector<8x286xf32>
    tpu.vector_store %arg12[%c24, %c19_126], %118 {strides = array<i32>} : memref<48x324xf32, #tpu.memory_space<vmem>>, vector<8x286xf32>,
    %cst_127 = arith.constant 0.000000e+00 : f32
    %120 = vector.broadcast %cst_127 : f32 to vector<8x286xf32>
    %c0_128 = arith.constant 0 : index
    %c0_129 = arith.constant 0 : index
    %121 = vector.load %arg12[%c0_128, %c0_129] : memref<48x324xf32, #tpu.memory_space<vmem>>, vector<32x286xf32>
    %c0_130 = arith.constant 0 : index
    %c0_131 = arith.constant 0 : index
    %c0_132 = arith.constant 0 : index
    %c0_133 = arith.constant 0 : index
    %122 = vector.load %arg6[%c0_130, %c0_131, %c0_132, %c0_133] : memref<1x9x8x32xf32, #tpu.memory_space<vmem>>, vector<1x1x8x32xf32>
    %123 = vector.shape_cast %122 : vector<1x1x8x32xf32> to vector<8x32xf32>
    %cst_134 = arith.constant dense<0.000000e+00> : vector<8x286xf32>
    %124 = tpu.matmul %123, %121, %cst_134 {dimension_numbers = #tpu.dot_dimension_numbers<[1], [0], [0], [1], [0, 0, 1, 1], [], []>} : vector<8x32xf32>, vector<32x286xf32>, vector<8x286xf32> -> vector<8x286xf32>
    %125 = arith.addf %120, %124 : vector<8x286xf32>
    %c0_135 = arith.constant 0 : index
    %c1_136 = arith.constant 1 : index
    %126 = vector.load %arg12[%c0_135, %c1_136] : memref<48x324xf32, #tpu.memory_space<vmem>>, vector<32x286xf32>
    %c0_137 = arith.constant 0 : index
    %c1_138 = arith.constant 1 : index
    %c0_139 = arith.constant 0 : index
    %c0_140 = arith.constant 0 : index
    %127 = vector.load %arg6[%c0_137, %c1_138, %c0_139, %c0_140] : memref<1x9x8x32xf32, #tpu.memory_space<vmem>>, vector<1x1x8x32xf32>
    %128 = vector.shape_cast %127 : vector<1x1x8x32xf32> to vector<8x32xf32>
    %cst_141 = arith.constant dense<0.000000e+00> : vector<8x286xf32>
    %129 = tpu.matmul %128, %126, %cst_141 {dimension_numbers = #tpu.dot_dimension_numbers<[1], [0], [0], [1], [0, 0, 1, 1], [], []>} : vector<8x32xf32>, vector<32x286xf32>, vector<8x286xf32> -> vector<8x286xf32>
    %130 = arith.addf %125, %129 : vector<8x286xf32>
    %c0_142 = arith.constant 0 : index
    %c2_143 = arith.constant 2 : index
    %131 = vector.load %arg12[%c0_142, %c2_143] : memref<48x324xf32, #tpu.memory_space<vmem>>, vector<32x286xf32>
    %c0_144 = arith.constant 0 : index
    %c2_145 = arith.constant 2 : index
    %c0_146 = arith.constant 0 : index
    %c0_147 = arith.constant 0 : index
    %132 = vector.load %arg6[%c0_144, %c2_145, %c0_146, %c0_147] : memref<1x9x8x32xf32, #tpu.memory_space<vmem>>, vector<1x1x8x32xf32>
    %133 = vector.shape_cast %132 : vector<1x1x8x32xf32> to vector<8x32xf32>
    %cst_148 = arith.constant dense<0.000000e+00> : vector<8x286xf32>
    %134 = tpu.matmul %133, %131, %cst_148 {dimension_numbers = #tpu.dot_dimension_numbers<[1], [0], [0], [1], [0, 0, 1, 1], [], []>} : vector<8x32xf32>, vector<32x286xf32>, vector<8x286xf32> -> vector<8x286xf32>
    %135 = arith.addf %130, %134 : vector<8x286xf32>
    %c0_149 = arith.constant 0 : index
    %c18_150 = arith.constant 18 : index
    %136 = vector.load %arg12[%c0_149, %c18_150] : memref<48x324xf32, #tpu.memory_space<vmem>>, vector<32x286xf32>
    %c0_151 = arith.constant 0 : index
    %c3_152 = arith.constant 3 : index
    %c0_153 = arith.constant 0 : index
    %c0_154 = arith.constant 0 : index
    %137 = vector.load %arg6[%c0_151, %c3_152, %c0_153, %c0_154] : memref<1x9x8x32xf32, #tpu.memory_space<vmem>>, vector<1x1x8x32xf32>
    %138 = vector.shape_cast %137 : vector<1x1x8x32xf32> to vector<8x32xf32>
    %cst_155 = arith.constant dense<0.000000e+00> : vector<8x286xf32>
    %139 = tpu.matmul %138, %136, %cst_155 {dimension_numbers = #tpu.dot_dimension_numbers<[1], [0], [0], [1], [0, 0, 1, 1], [], []>} : vector<8x32xf32>, vector<32x286xf32>, vector<8x286xf32> -> vector<8x286xf32>
    %140 = arith.addf %135, %139 : vector<8x286xf32>
    %c0_156 = arith.constant 0 : index
    %c19_157 = arith.constant 19 : index
    %141 = vector.load %arg12[%c0_156, %c19_157] : memref<48x324xf32, #tpu.memory_space<vmem>>, vector<32x286xf32>
    %c0_158 = arith.constant 0 : index
    %c4_159 = arith.constant 4 : index
    %c0_160 = arith.constant 0 : index
    %c0_161 = arith.constant 0 : index
    %142 = vector.load %arg6[%c0_158, %c4_159, %c0_160, %c0_161] : memref<1x9x8x32xf32, #tpu.memory_space<vmem>>, vector<1x1x8x32xf32>
    %143 = vector.shape_cast %142 : vector<1x1x8x32xf32> to vector<8x32xf32>
    %cst_162 = arith.constant dense<0.000000e+00> : vector<8x286xf32>
    %144 = tpu.matmul %143, %141, %cst_162 {dimension_numbers = #tpu.dot_dimension_numbers<[1], [0], [0], [1], [0, 0, 1, 1], [], []>} : vector<8x32xf32>, vector<32x286xf32>, vector<8x286xf32> -> vector<8x286xf32>
    %145 = arith.addf %140, %144 : vector<8x286xf32>
    %c0_163 = arith.constant 0 : index
    %c20_164 = arith.constant 20 : index
    %146 = vector.load %arg12[%c0_163, %c20_164] : memref<48x324xf32, #tpu.memory_space<vmem>>, vector<32x286xf32>
    %c0_165 = arith.constant 0 : index
    %c5_166 = arith.constant 5 : index
    %c0_167 = arith.constant 0 : index
    %c0_168 = arith.constant 0 : index
    %147 = vector.load %arg6[%c0_165, %c5_166, %c0_167, %c0_168] : memref<1x9x8x32xf32, #tpu.memory_space<vmem>>, vector<1x1x8x32xf32>
    %148 = vector.shape_cast %147 : vector<1x1x8x32xf32> to vector<8x32xf32>
    %cst_169 = arith.constant dense<0.000000e+00> : vector<8x286xf32>
    %149 = tpu.matmul %148, %146, %cst_169 {dimension_numbers = #tpu.dot_dimension_numbers<[1], [0], [0], [1], [0, 0, 1, 1], [], []>} : vector<8x32xf32>, vector<32x286xf32>, vector<8x286xf32> -> vector<8x286xf32>
    %150 = arith.addf %145, %149 : vector<8x286xf32>
    %c0_170 = arith.constant 0 : index
    %c36_171 = arith.constant 36 : index
    %151 = vector.load %arg12[%c0_170, %c36_171] : memref<48x324xf32, #tpu.memory_space<vmem>>, vector<32x286xf32>
    %c0_172 = arith.constant 0 : index
    %c6_173 = arith.constant 6 : index
    %c0_174 = arith.constant 0 : index
    %c0_175 = arith.constant 0 : index
    %152 = vector.load %arg6[%c0_172, %c6_173, %c0_174, %c0_175] : memref<1x9x8x32xf32, #tpu.memory_space<vmem>>, vector<1x1x8x32xf32>
    %153 = vector.shape_cast %152 : vector<1x1x8x32xf32> to vector<8x32xf32>
    %cst_176 = arith.constant dense<0.000000e+00> : vector<8x286xf32>
    %154 = tpu.matmul %153, %151, %cst_176 {dimension_numbers = #tpu.dot_dimension_numbers<[1], [0], [0], [1], [0, 0, 1, 1], [], []>} : vector<8x32xf32>, vector<32x286xf32>, vector<8x286xf32> -> vector<8x286xf32>
    %155 = arith.addf %150, %154 : vector<8x286xf32>
    %c0_177 = arith.constant 0 : index
    %c37_178 = arith.constant 37 : index
    %156 = vector.load %arg12[%c0_177, %c37_178] : memref<48x324xf32, #tpu.memory_space<vmem>>, vector<32x286xf32>
    %c0_179 = arith.constant 0 : index
    %c7_180 = arith.constant 7 : index
    %c0_181 = arith.constant 0 : index
    %c0_182 = arith.constant 0 : index
    %157 = vector.load %arg6[%c0_179, %c7_180, %c0_181, %c0_182] : memref<1x9x8x32xf32, #tpu.memory_space<vmem>>, vector<1x1x8x32xf32>
    %158 = vector.shape_cast %157 : vector<1x1x8x32xf32> to vector<8x32xf32>
    %cst_183 = arith.constant dense<0.000000e+00> : vector<8x286xf32>
    %159 = tpu.matmul %158, %156, %cst_183 {dimension_numbers = #tpu.dot_dimension_numbers<[1], [0], [0], [1], [0, 0, 1, 1], [], []>} : vector<8x32xf32>, vector<32x286xf32>, vector<8x286xf32> -> vector<8x286xf32>
    %160 = arith.addf %155, %159 : vector<8x286xf32>
    %c0_184 = arith.constant 0 : index
    %c38_185 = arith.constant 38 : index
    %161 = vector.load %arg12[%c0_184, %c38_185] : memref<48x324xf32, #tpu.memory_space<vmem>>, vector<32x286xf32>
    %c0_186 = arith.constant 0 : index
    %c8_187 = arith.constant 8 : index
    %c0_188 = arith.constant 0 : index
    %c0_189 = arith.constant 0 : index
    %162 = vector.load %arg6[%c0_186, %c8_187, %c0_188, %c0_189] : memref<1x9x8x32xf32, #tpu.memory_space<vmem>>, vector<1x1x8x32xf32>
    %163 = vector.shape_cast %162 : vector<1x1x8x32xf32> to vector<8x32xf32>
    %cst_190 = arith.constant dense<0.000000e+00> : vector<8x286xf32>
    %164 = tpu.matmul %163, %161, %cst_190 {dimension_numbers = #tpu.dot_dimension_numbers<[1], [0], [0], [1], [0, 0, 1, 1], [], []>} : vector<8x32xf32>, vector<32x286xf32>, vector<8x286xf32> -> vector<8x286xf32>
    %165 = arith.addf %160, %164 : vector<8x286xf32>
    %c0_191 = arith.constant 0 : index
    %c32 = arith.constant 32 : index
    %c0_192 = arith.constant 0 : index
    %166 = vector.load %arg9[%c0_191, %c32, %c0_192] : memref<1x80x1xf32, #tpu.memory_space<vmem>>, vector<1x8x1xf32>
    %167 = vector.shape_cast %166 : vector<1x8x1xf32> to vector<8x1xf32>
    %168 = vector.broadcast %167 : vector<8x1xf32> to vector<8x286xf32>
    %169 = arith.addf %165, %168 : vector<8x286xf32>
    %cst_193 = arith.constant 0.000000e+00 : f32
    %170 = vector.broadcast %cst_193 : f32 to vector<8x286xf32>
    %171 = arith.cmpf oge, %169, %170 : vector<8x286xf32>
    %cst_194 = arith.constant 2.000000e-01 : f32
    %172 = vector.broadcast %cst_194 : f32 to vector<8x286xf32>
    %173 = arith.mulf %172, %169 : vector<8x286xf32>
    %174 = arith.select %171, %169, %173 : vector<8x286xi1>, vector<8x286xf32>
    %175 = vector.broadcast %0 : vector<1x286xf32> to vector<8x286xf32>
    %176 = arith.mulf %174, %175 : vector<8x286xf32>
    %c32_195 = arith.constant 32 : index
    %c19_196 = arith.constant 19 : index
    %177 = vector.load %arg12[%c32_195, %c19_196] : memref<48x324xf32, #tpu.memory_space<vmem>>, vector<8x286xf32>
    tpu.vector_store %arg12[%c32_195, %c19_196], %176 {strides = array<i32>} : memref<48x324xf32, #tpu.memory_space<vmem>>, vector<8x286xf32>,
    %cst_197 = arith.constant 0.000000e+00 : f32
    %178 = vector.broadcast %cst_197 : f32 to vector<8x286xf32>
    %c0_198 = arith.constant 0 : index
    %c0_199 = arith.constant 0 : index
    %179 = vector.load %arg12[%c0_198, %c0_199] : memref<48x324xf32, #tpu.memory_space<vmem>>, vector<40x286xf32>
    %c0_200 = arith.constant 0 : index
    %c0_201 = arith.constant 0 : index
    %c0_202 = arith.constant 0 : index
    %c0_203 = arith.constant 0 : index
    %180 = vector.load %arg7[%c0_200, %c0_201, %c0_202, %c0_203] : memref<1x9x8x40xf32, #tpu.memory_space<vmem>>, vector<1x1x8x40xf32>
    %181 = vector.shape_cast %180 : vector<1x1x8x40xf32> to vector<8x40xf32>
    %cst_204 = arith.constant dense<0.000000e+00> : vector<8x286xf32>
    %182 = tpu.matmul %181, %179, %cst_204 {dimension_numbers = #tpu.dot_dimension_numbers<[1], [0], [0], [1], [0, 0, 1, 1], [], []>} : vector<8x40xf32>, vector<40x286xf32>, vector<8x286xf32> -> vector<8x286xf32>
    %183 = arith.addf %178, %182 : vector<8x286xf32>
    %c0_205 = arith.constant 0 : index
    %c1_206 = arith.constant 1 : index
    %184 = vector.load %arg12[%c0_205, %c1_206] : memref<48x324xf32, #tpu.memory_space<vmem>>, vector<40x286xf32>
    %c0_207 = arith.constant 0 : index
    %c1_208 = arith.constant 1 : index
    %c0_209 = arith.constant 0 : index
    %c0_210 = arith.constant 0 : index
    %185 = vector.load %arg7[%c0_207, %c1_208, %c0_209, %c0_210] : memref<1x9x8x40xf32, #tpu.memory_space<vmem>>, vector<1x1x8x40xf32>
    %186 = vector.shape_cast %185 : vector<1x1x8x40xf32> to vector<8x40xf32>
    %cst_211 = arith.constant dense<0.000000e+00> : vector<8x286xf32>
    %187 = tpu.matmul %186, %184, %cst_211 {dimension_numbers = #tpu.dot_dimension_numbers<[1], [0], [0], [1], [0, 0, 1, 1], [], []>} : vector<8x40xf32>, vector<40x286xf32>, vector<8x286xf32> -> vector<8x286xf32>
    %188 = arith.addf %183, %187 : vector<8x286xf32>
    %c0_212 = arith.constant 0 : index
    %c2_213 = arith.constant 2 : index
    %189 = vector.load %arg12[%c0_212, %c2_213] : memref<48x324xf32, #tpu.memory_space<vmem>>, vector<40x286xf32>
    %c0_214 = arith.constant 0 : index
    %c2_215 = arith.constant 2 : index
    %c0_216 = arith.constant 0 : index
    %c0_217 = arith.constant 0 : index
    %190 = vector.load %arg7[%c0_214, %c2_215, %c0_216, %c0_217] : memref<1x9x8x40xf32, #tpu.memory_space<vmem>>, vector<1x1x8x40xf32>
    %191 = vector.shape_cast %190 : vector<1x1x8x40xf32> to vector<8x40xf32>
    %cst_218 = arith.constant dense<0.000000e+00> : vector<8x286xf32>
    %192 = tpu.matmul %191, %189, %cst_218 {dimension_numbers = #tpu.dot_dimension_numbers<[1], [0], [0], [1], [0, 0, 1, 1], [], []>} : vector<8x40xf32>, vector<40x286xf32>, vector<8x286xf32> -> vector<8x286xf32>
    %193 = arith.addf %188, %192 : vector<8x286xf32>
    %c0_219 = arith.constant 0 : index
    %c18_220 = arith.constant 18 : index
    %194 = vector.load %arg12[%c0_219, %c18_220] : memref<48x324xf32, #tpu.memory_space<vmem>>, vector<40x286xf32>
    %c0_221 = arith.constant 0 : index
    %c3_222 = arith.constant 3 : index
    %c0_223 = arith.constant 0 : index
    %c0_224 = arith.constant 0 : index
    %195 = vector.load %arg7[%c0_221, %c3_222, %c0_223, %c0_224] : memref<1x9x8x40xf32, #tpu.memory_space<vmem>>, vector<1x1x8x40xf32>
    %196 = vector.shape_cast %195 : vector<1x1x8x40xf32> to vector<8x40xf32>
    %cst_225 = arith.constant dense<0.000000e+00> : vector<8x286xf32>
    %197 = tpu.matmul %196, %194, %cst_225 {dimension_numbers = #tpu.dot_dimension_numbers<[1], [0], [0], [1], [0, 0, 1, 1], [], []>} : vector<8x40xf32>, vector<40x286xf32>, vector<8x286xf32> -> vector<8x286xf32>
    %198 = arith.addf %193, %197 : vector<8x286xf32>
    %c0_226 = arith.constant 0 : index
    %c19_227 = arith.constant 19 : index
    %199 = vector.load %arg12[%c0_226, %c19_227] : memref<48x324xf32, #tpu.memory_space<vmem>>, vector<40x286xf32>
    %c0_228 = arith.constant 0 : index
    %c4_229 = arith.constant 4 : index
    %c0_230 = arith.constant 0 : index
    %c0_231 = arith.constant 0 : index
    %200 = vector.load %arg7[%c0_228, %c4_229, %c0_230, %c0_231] : memref<1x9x8x40xf32, #tpu.memory_space<vmem>>, vector<1x1x8x40xf32>
    %201 = vector.shape_cast %200 : vector<1x1x8x40xf32> to vector<8x40xf32>
    %cst_232 = arith.constant dense<0.000000e+00> : vector<8x286xf32>
    %202 = tpu.matmul %201, %199, %cst_232 {dimension_numbers = #tpu.dot_dimension_numbers<[1], [0], [0], [1], [0, 0, 1, 1], [], []>} : vector<8x40xf32>, vector<40x286xf32>, vector<8x286xf32> -> vector<8x286xf32>
    %203 = arith.addf %198, %202 : vector<8x286xf32>
    %c0_233 = arith.constant 0 : index
    %c20_234 = arith.constant 20 : index
    %204 = vector.load %arg12[%c0_233, %c20_234] : memref<48x324xf32, #tpu.memory_space<vmem>>, vector<40x286xf32>
    %c0_235 = arith.constant 0 : index
    %c5_236 = arith.constant 5 : index
    %c0_237 = arith.constant 0 : index
    %c0_238 = arith.constant 0 : index
    %205 = vector.load %arg7[%c0_235, %c5_236, %c0_237, %c0_238] : memref<1x9x8x40xf32, #tpu.memory_space<vmem>>, vector<1x1x8x40xf32>
    %206 = vector.shape_cast %205 : vector<1x1x8x40xf32> to vector<8x40xf32>
    %cst_239 = arith.constant dense<0.000000e+00> : vector<8x286xf32>
    %207 = tpu.matmul %206, %204, %cst_239 {dimension_numbers = #tpu.dot_dimension_numbers<[1], [0], [0], [1], [0, 0, 1, 1], [], []>} : vector<8x40xf32>, vector<40x286xf32>, vector<8x286xf32> -> vector<8x286xf32>
    %208 = arith.addf %203, %207 : vector<8x286xf32>
    %c0_240 = arith.constant 0 : index
    %c36_241 = arith.constant 36 : index
    %209 = vector.load %arg12[%c0_240, %c36_241] : memref<48x324xf32, #tpu.memory_space<vmem>>, vector<40x286xf32>
    %c0_242 = arith.constant 0 : index
    %c6_243 = arith.constant 6 : index
    %c0_244 = arith.constant 0 : index
    %c0_245 = arith.constant 0 : index
    %210 = vector.load %arg7[%c0_242, %c6_243, %c0_244, %c0_245] : memref<1x9x8x40xf32, #tpu.memory_space<vmem>>, vector<1x1x8x40xf32>
    %211 = vector.shape_cast %210 : vector<1x1x8x40xf32> to vector<8x40xf32>
    %cst_246 = arith.constant dense<0.000000e+00> : vector<8x286xf32>
    %212 = tpu.matmul %211, %209, %cst_246 {dimension_numbers = #tpu.dot_dimension_numbers<[1], [0], [0], [1], [0, 0, 1, 1], [], []>} : vector<8x40xf32>, vector<40x286xf32>, vector<8x286xf32> -> vector<8x286xf32>
    %213 = arith.addf %208, %212 : vector<8x286xf32>
    %c0_247 = arith.constant 0 : index
    %c37_248 = arith.constant 37 : index
    %214 = vector.load %arg12[%c0_247, %c37_248] : memref<48x324xf32, #tpu.memory_space<vmem>>, vector<40x286xf32>
    %c0_249 = arith.constant 0 : index
    %c7_250 = arith.constant 7 : index
    %c0_251 = arith.constant 0 : index
    %c0_252 = arith.constant 0 : index
    %215 = vector.load %arg7[%c0_249, %c7_250, %c0_251, %c0_252] : memref<1x9x8x40xf32, #tpu.memory_space<vmem>>, vector<1x1x8x40xf32>
    %216 = vector.shape_cast %215 : vector<1x1x8x40xf32> to vector<8x40xf32>
    %cst_253 = arith.constant dense<0.000000e+00> : vector<8x286xf32>
    %217 = tpu.matmul %216, %214, %cst_253 {dimension_numbers = #tpu.dot_dimension_numbers<[1], [0], [0], [1], [0, 0, 1, 1], [], []>} : vector<8x40xf32>, vector<40x286xf32>, vector<8x286xf32> -> vector<8x286xf32>
    %218 = arith.addf %213, %217 : vector<8x286xf32>
    %c0_254 = arith.constant 0 : index
    %c38_255 = arith.constant 38 : index
    %219 = vector.load %arg12[%c0_254, %c38_255] : memref<48x324xf32, #tpu.memory_space<vmem>>, vector<40x286xf32>
    %c0_256 = arith.constant 0 : index
    %c8_257 = arith.constant 8 : index
    %c0_258 = arith.constant 0 : index
    %c0_259 = arith.constant 0 : index
    %220 = vector.load %arg7[%c0_256, %c8_257, %c0_258, %c0_259] : memref<1x9x8x40xf32, #tpu.memory_space<vmem>>, vector<1x1x8x40xf32>
    %221 = vector.shape_cast %220 : vector<1x1x8x40xf32> to vector<8x40xf32>
    %cst_260 = arith.constant dense<0.000000e+00> : vector<8x286xf32>
    %222 = tpu.matmul %221, %219, %cst_260 {dimension_numbers = #tpu.dot_dimension_numbers<[1], [0], [0], [1], [0, 0, 1, 1], [], []>} : vector<8x40xf32>, vector<40x286xf32>, vector<8x286xf32> -> vector<8x286xf32>
    %223 = arith.addf %218, %222 : vector<8x286xf32>
    %c0_261 = arith.constant 0 : index
    %c48 = arith.constant 48 : index
    %c0_262 = arith.constant 0 : index
    %224 = vector.load %arg9[%c0_261, %c48, %c0_262] : memref<1x80x1xf32, #tpu.memory_space<vmem>>, vector<1x8x1xf32>
    %225 = vector.shape_cast %224 : vector<1x8x1xf32> to vector<8x1xf32>
    %226 = vector.broadcast %225 : vector<8x1xf32> to vector<8x286xf32>
    %227 = arith.addf %223, %226 : vector<8x286xf32>
    %cst_263 = arith.constant 0.000000e+00 : f32
    %228 = vector.broadcast %cst_263 : f32 to vector<8x286xf32>
    %229 = arith.cmpf oge, %227, %228 : vector<8x286xf32>
    %cst_264 = arith.constant 2.000000e-01 : f32
    %230 = vector.broadcast %cst_264 : f32 to vector<8x286xf32>
    %231 = arith.mulf %230, %227 : vector<8x286xf32>
    %232 = arith.select %229, %227, %231 : vector<8x286xi1>, vector<8x286xf32>
    %233 = vector.broadcast %0 : vector<1x286xf32> to vector<8x286xf32>
    %234 = arith.mulf %232, %233 : vector<8x286xf32>
    %c40 = arith.constant 40 : index
    %c19_265 = arith.constant 19 : index
    %235 = vector.load %arg12[%c40, %c19_265] : memref<48x324xf32, #tpu.memory_space<vmem>>, vector<8x286xf32>
    tpu.vector_store %arg12[%c40, %c19_265], %234 {strides = array<i32>} : memref<48x324xf32, #tpu.memory_space<vmem>>, vector<8x286xf32>,
    %cst_266 = arith.constant 0.000000e+00 : f32
    %236 = vector.broadcast %cst_266 : f32 to vector<16x286xf32>
    %c0_267 = arith.constant 0 : index
    %c0_268 = arith.constant 0 : index
    %237 = vector.load %arg12[%c0_267, %c0_268] : memref<48x324xf32, #tpu.memory_space<vmem>>, vector<48x286xf32>
    %c0_269 = arith.constant 0 : index
    %c0_270 = arith.constant 0 : index
    %c0_271 = arith.constant 0 : index
    %c0_272 = arith.constant 0 : index
    %238 = vector.load %arg8[%c0_269, %c0_270, %c0_271, %c0_272] : memref<1x9x16x48xf32, #tpu.memory_space<vmem>>, vector<1x1x16x48xf32>
    %239 = vector.shape_cast %238 : vector<1x1x16x48xf32> to vector<16x48xf32>
    %cst_273 = arith.constant dense<0.000000e+00> : vector<16x286xf32>
    %240 = tpu.matmul %239, %237, %cst_273 {dimension_numbers = #tpu.dot_dimension_numbers<[1], [0], [0], [1], [0, 0, 1, 1], [], []>} : vector<16x48xf32>, vector<48x286xf32>, vector<16x286xf32> -> vector<16x286xf32>
    %241 = arith.addf %236, %240 : vector<16x286xf32>
    %c0_274 = arith.constant 0 : index
    %c1_275 = arith.constant 1 : index
    %242 = vector.load %arg12[%c0_274, %c1_275] : memref<48x324xf32, #tpu.memory_space<vmem>>, vector<48x286xf32>
    %c0_276 = arith.constant 0 : index
    %c1_277 = arith.constant 1 : index
    %c0_278 = arith.constant 0 : index
    %c0_279 = arith.constant 0 : index
    %243 = vector.load %arg8[%c0_276, %c1_277, %c0_278, %c0_279] : memref<1x9x16x48xf32, #tpu.memory_space<vmem>>, vector<1x1x16x48xf32>
    %244 = vector.shape_cast %243 : vector<1x1x16x48xf32> to vector<16x48xf32>
    %cst_280 = arith.constant dense<0.000000e+00> : vector<16x286xf32>
    %245 = tpu.matmul %244, %242, %cst_280 {dimension_numbers = #tpu.dot_dimension_numbers<[1], [0], [0], [1], [0, 0, 1, 1], [], []>} : vector<16x48xf32>, vector<48x286xf32>, vector<16x286xf32> -> vector<16x286xf32>
    %246 = arith.addf %241, %245 : vector<16x286xf32>
    %c0_281 = arith.constant 0 : index
    %c2_282 = arith.constant 2 : index
    %247 = vector.load %arg12[%c0_281, %c2_282] : memref<48x324xf32, #tpu.memory_space<vmem>>, vector<48x286xf32>
    %c0_283 = arith.constant 0 : index
    %c2_284 = arith.constant 2 : index
    %c0_285 = arith.constant 0 : index
    %c0_286 = arith.constant 0 : index
    %248 = vector.load %arg8[%c0_283, %c2_284, %c0_285, %c0_286] : memref<1x9x16x48xf32, #tpu.memory_space<vmem>>, vector<1x1x16x48xf32>
    %249 = vector.shape_cast %248 : vector<1x1x16x48xf32> to vector<16x48xf32>
    %cst_287 = arith.constant dense<0.000000e+00> : vector<16x286xf32>
    %250 = tpu.matmul %249, %247, %cst_287 {dimension_numbers = #tpu.dot_dimension_numbers<[1], [0], [0], [1], [0, 0, 1, 1], [], []>} : vector<16x48xf32>, vector<48x286xf32>, vector<16x286xf32> -> vector<16x286xf32>
    %251 = arith.addf %246, %250 : vector<16x286xf32>
    %c0_288 = arith.constant 0 : index
    %c18_289 = arith.constant 18 : index
    %252 = vector.load %arg12[%c0_288, %c18_289] : memref<48x324xf32, #tpu.memory_space<vmem>>, vector<48x286xf32>
    %c0_290 = arith.constant 0 : index
    %c3_291 = arith.constant 3 : index
    %c0_292 = arith.constant 0 : index
    %c0_293 = arith.constant 0 : index
    %253 = vector.load %arg8[%c0_290, %c3_291, %c0_292, %c0_293] : memref<1x9x16x48xf32, #tpu.memory_space<vmem>>, vector<1x1x16x48xf32>
    %254 = vector.shape_cast %253 : vector<1x1x16x48xf32> to vector<16x48xf32>
    %cst_294 = arith.constant dense<0.000000e+00> : vector<16x286xf32>
    %255 = tpu.matmul %254, %252, %cst_294 {dimension_numbers = #tpu.dot_dimension_numbers<[1], [0], [0], [1], [0, 0, 1, 1], [], []>} : vector<16x48xf32>, vector<48x286xf32>, vector<16x286xf32> -> vector<16x286xf32>
    %256 = arith.addf %251, %255 : vector<16x286xf32>
    %c0_295 = arith.constant 0 : index
    %c19_296 = arith.constant 19 : index
    %257 = vector.load %arg12[%c0_295, %c19_296] : memref<48x324xf32, #tpu.memory_space<vmem>>, vector<48x286xf32>
    %c0_297 = arith.constant 0 : index
    %c4_298 = arith.constant 4 : index
    %c0_299 = arith.constant 0 : index
    %c0_300 = arith.constant 0 : index
    %258 = vector.load %arg8[%c0_297, %c4_298, %c0_299, %c0_300] : memref<1x9x16x48xf32, #tpu.memory_space<vmem>>, vector<1x1x16x48xf32>
    %259 = vector.shape_cast %258 : vector<1x1x16x48xf32> to vector<16x48xf32>
    %cst_301 = arith.constant dense<0.000000e+00> : vector<16x286xf32>
    %260 = tpu.matmul %259, %257, %cst_301 {dimension_numbers = #tpu.dot_dimension_numbers<[1], [0], [0], [1], [0, 0, 1, 1], [], []>} : vector<16x48xf32>, vector<48x286xf32>, vector<16x286xf32> -> vector<16x286xf32>
    %261 = arith.addf %256, %260 : vector<16x286xf32>
    %c0_302 = arith.constant 0 : index
    %c20_303 = arith.constant 20 : index
    %262 = vector.load %arg12[%c0_302, %c20_303] : memref<48x324xf32, #tpu.memory_space<vmem>>, vector<48x286xf32>
    %c0_304 = arith.constant 0 : index
    %c5_305 = arith.constant 5 : index
    %c0_306 = arith.constant 0 : index
    %c0_307 = arith.constant 0 : index
    %263 = vector.load %arg8[%c0_304, %c5_305, %c0_306, %c0_307] : memref<1x9x16x48xf32, #tpu.memory_space<vmem>>, vector<1x1x16x48xf32>
    %264 = vector.shape_cast %263 : vector<1x1x16x48xf32> to vector<16x48xf32>
    %cst_308 = arith.constant dense<0.000000e+00> : vector<16x286xf32>
    %265 = tpu.matmul %264, %262, %cst_308 {dimension_numbers = #tpu.dot_dimension_numbers<[1], [0], [0], [1], [0, 0, 1, 1], [], []>} : vector<16x48xf32>, vector<48x286xf32>, vector<16x286xf32> -> vector<16x286xf32>
    %266 = arith.addf %261, %265 : vector<16x286xf32>
    %c0_309 = arith.constant 0 : index
    %c36_310 = arith.constant 36 : index
    %267 = vector.load %arg12[%c0_309, %c36_310] : memref<48x324xf32, #tpu.memory_space<vmem>>, vector<48x286xf32>
    %c0_311 = arith.constant 0 : index
    %c6_312 = arith.constant 6 : index
    %c0_313 = arith.constant 0 : index
    %c0_314 = arith.constant 0 : index
    %268 = vector.load %arg8[%c0_311, %c6_312, %c0_313, %c0_314] : memref<1x9x16x48xf32, #tpu.memory_space<vmem>>, vector<1x1x16x48xf32>
    %269 = vector.shape_cast %268 : vector<1x1x16x48xf32> to vector<16x48xf32>
    %cst_315 = arith.constant dense<0.000000e+00> : vector<16x286xf32>
    %270 = tpu.matmul %269, %267, %cst_315 {dimension_numbers = #tpu.dot_dimension_numbers<[1], [0], [0], [1], [0, 0, 1, 1], [], []>} : vector<16x48xf32>, vector<48x286xf32>, vector<16x286xf32> -> vector<16x286xf32>
    %271 = arith.addf %266, %270 : vector<16x286xf32>
    %c0_316 = arith.constant 0 : index
    %c37_317 = arith.constant 37 : index
    %272 = vector.load %arg12[%c0_316, %c37_317] : memref<48x324xf32, #tpu.memory_space<vmem>>, vector<48x286xf32>
    %c0_318 = arith.constant 0 : index
    %c7_319 = arith.constant 7 : index
    %c0_320 = arith.constant 0 : index
    %c0_321 = arith.constant 0 : index
    %273 = vector.load %arg8[%c0_318, %c7_319, %c0_320, %c0_321] : memref<1x9x16x48xf32, #tpu.memory_space<vmem>>, vector<1x1x16x48xf32>
    %274 = vector.shape_cast %273 : vector<1x1x16x48xf32> to vector<16x48xf32>
    %cst_322 = arith.constant dense<0.000000e+00> : vector<16x286xf32>
    %275 = tpu.matmul %274, %272, %cst_322 {dimension_numbers = #tpu.dot_dimension_numbers<[1], [0], [0], [1], [0, 0, 1, 1], [], []>} : vector<16x48xf32>, vector<48x286xf32>, vector<16x286xf32> -> vector<16x286xf32>
    %276 = arith.addf %271, %275 : vector<16x286xf32>
    %c0_323 = arith.constant 0 : index
    %c38_324 = arith.constant 38 : index
    %277 = vector.load %arg12[%c0_323, %c38_324] : memref<48x324xf32, #tpu.memory_space<vmem>>, vector<48x286xf32>
    %c0_325 = arith.constant 0 : index
    %c8_326 = arith.constant 8 : index
    %c0_327 = arith.constant 0 : index
    %c0_328 = arith.constant 0 : index
    %278 = vector.load %arg8[%c0_325, %c8_326, %c0_327, %c0_328] : memref<1x9x16x48xf32, #tpu.memory_space<vmem>>, vector<1x1x16x48xf32>
    %279 = vector.shape_cast %278 : vector<1x1x16x48xf32> to vector<16x48xf32>
    %cst_329 = arith.constant dense<0.000000e+00> : vector<16x286xf32>
    %280 = tpu.matmul %279, %277, %cst_329 {dimension_numbers = #tpu.dot_dimension_numbers<[1], [0], [0], [1], [0, 0, 1, 1], [], []>} : vector<16x48xf32>, vector<48x286xf32>, vector<16x286xf32> -> vector<16x286xf32>
    %281 = arith.addf %276, %280 : vector<16x286xf32>
    %c0_330 = arith.constant 0 : index
    %c64 = arith.constant 64 : index
    %c0_331 = arith.constant 0 : index
    %282 = vector.load %arg9[%c0_330, %c64, %c0_331] : memref<1x80x1xf32, #tpu.memory_space<vmem>>, vector<1x16x1xf32>
    %283 = vector.shape_cast %282 : vector<1x16x1xf32> to vector<16x1xf32>
    %284 = vector.broadcast %283 : vector<16x1xf32> to vector<16x286xf32>
    %285 = arith.addf %281, %284 : vector<16x286xf32>
    %cst_332 = arith.constant 2.000000e-01 : f32
    %286 = vector.broadcast %cst_332 : f32 to vector<16x286xf32>
    %287 = arith.mulf %285, %286 : vector<16x286xf32>
    %c0_333 = arith.constant 0 : index
    %c19_334 = arith.constant 19 : index
    %288 = vector.load %arg12[%c0_333, %c19_334] : memref<48x324xf32, #tpu.memory_space<vmem>>, vector<16x286xf32>
    %289 = arith.addf %287, %288 : vector<16x286xf32>
    %290 = vector.broadcast %0 : vector<1x286xf32> to vector<16x286xf32>
    %291 = arith.mulf %289, %290 : vector<16x286xf32>
    %c0_335 = arith.constant 0 : index
    %c19_336 = arith.constant 19 : index
    %292 = vector.load %arg12[%c0_335, %c19_336] : memref<48x324xf32, #tpu.memory_space<vmem>>, vector<16x286xf32>
    tpu.vector_store %arg12[%c0_335, %c19_336], %291 {strides = array<i32>} : memref<48x324xf32, #tpu.memory_space<vmem>>, vector<16x286xf32>,
    %c2_i32 = arith.constant 2 : i32
    %293 = arith.cmpi eq, %arg1, %c2_i32 : i32
    %294 = arith.extui %293 : i1 to i32
    %c0_i32_337 = arith.constant 0 : i32
    %295 = arith.cmpi ne, %294, %c0_i32_337 : i32
    scf.if %295 {
      %c0_338 = arith.constant 0 : index
      %296 = memref.load %arg2[%c0_338] : memref<1xf32, #tpu.memory_space<smem>>
      %c0_339 = arith.constant 0 : index
      %c0_340 = arith.constant 0 : index
      %297 = vector.load %arg12[%c0_339, %c0_340] : memref<48x324xf32, #tpu.memory_space<vmem>>, vector<16x324xf32>
      %298 = vector.broadcast %296 : f32 to vector<16x324xf32>
      %299 = arith.mulf %297, %298 : vector<16x324xf32>
      %c0_341 = arith.constant 0 : index
      %c0_342 = arith.constant 0 : index
      %c0_343 = arith.constant 0 : index
      %300 = vector.load %arg3[%c0_341, %c0_342, %c0_343] : memref<1x16x324xf32, #tpu.memory_space<vmem>>, vector<1x16x324xf32>
      %301 = vector.shape_cast %300 : vector<1x16x324xf32> to vector<16x324xf32>
      %302 = arith.addf %299, %301 : vector<16x324xf32>
      %c0_344 = arith.constant 0 : index
      %c0_345 = arith.constant 0 : index
      %c0_346 = arith.constant 0 : index
      %303 = vector.load %arg11[%c0_344, %c0_345, %c0_346] : memref<1x16x324xf32, #tpu.memory_space<vmem>>, vector<1x16x324xf32>
      %304 = vector.shape_cast %303 : vector<1x16x324xf32> to vector<16x324xf32>
      %305 = vector.shape_cast %302 : vector<16x324xf32> to vector<1x16x324xf32>
      tpu.vector_store %arg11[%c0_344, %c0_345, %c0_346], %305 {strides = array<i32>} : memref<1x16x324xf32, #tpu.memory_space<vmem>>, vector<1x16x324xf32>,
    } else {
    }
    return
  }
  func.func @transform_0(%arg0: i32, %arg1: i32, %arg2: memref<1xf32, #tpu.memory_space<smem>>) -> (i32, i32, i32) {
    %c0_i32 = arith.constant 0 : i32
    %c0_i32_0 = arith.constant 0 : i32
    %c0_i32_1 = arith.constant 0 : i32
    return %arg0, %c0_i32, %c0_i32_0 : i32, i32, i32
  }
  func.func @transform_1(%arg0: i32, %arg1: i32, %arg2: memref<1xf32, #tpu.memory_space<smem>>) -> (i32, i32, i32, i32) {
    %c0_i32 = arith.constant 0 : i32
    %c0_i32_0 = arith.constant 0 : i32
    %c0_i32_1 = arith.constant 0 : i32
    %c0_i32_2 = arith.constant 0 : i32
    return %arg1, %c0_i32, %c0_i32_0, %c0_i32_1 : i32, i32, i32, i32
  }
  func.func @transform_2(%arg0: i32, %arg1: i32, %arg2: memref<1xf32, #tpu.memory_space<smem>>) -> (i32, i32, i32, i32) {
    %c0_i32 = arith.constant 0 : i32
    %c0_i32_0 = arith.constant 0 : i32
    %c0_i32_1 = arith.constant 0 : i32
    %c0_i32_2 = arith.constant 0 : i32
    return %arg1, %c0_i32, %c0_i32_0, %c0_i32_1 : i32, i32, i32, i32
  }
  func.func @transform_3(%arg0: i32, %arg1: i32, %arg2: memref<1xf32, #tpu.memory_space<smem>>) -> (i32, i32, i32, i32) {
    %c0_i32 = arith.constant 0 : i32
    %c0_i32_0 = arith.constant 0 : i32
    %c0_i32_1 = arith.constant 0 : i32
    %c0_i32_2 = arith.constant 0 : i32
    return %arg1, %c0_i32, %c0_i32_0, %c0_i32_1 : i32, i32, i32, i32
  }
  func.func @transform_4(%arg0: i32, %arg1: i32, %arg2: memref<1xf32, #tpu.memory_space<smem>>) -> (i32, i32, i32, i32) {
    %c0_i32 = arith.constant 0 : i32
    %c0_i32_0 = arith.constant 0 : i32
    %c0_i32_1 = arith.constant 0 : i32
    %c0_i32_2 = arith.constant 0 : i32
    return %arg1, %c0_i32, %c0_i32_0, %c0_i32_1 : i32, i32, i32, i32
  }
  func.func @transform_5(%arg0: i32, %arg1: i32, %arg2: memref<1xf32, #tpu.memory_space<smem>>) -> (i32, i32, i32, i32) {
    %c0_i32 = arith.constant 0 : i32
    %c0_i32_0 = arith.constant 0 : i32
    %c0_i32_1 = arith.constant 0 : i32
    %c0_i32_2 = arith.constant 0 : i32
    return %arg1, %c0_i32, %c0_i32_0, %c0_i32_1 : i32, i32, i32, i32
  }
  func.func @transform_6(%arg0: i32, %arg1: i32, %arg2: memref<1xf32, #tpu.memory_space<smem>>) -> (i32, i32, i32) {
    %c0_i32 = arith.constant 0 : i32
    %c0_i32_0 = arith.constant 0 : i32
    %c0_i32_1 = arith.constant 0 : i32
    return %arg1, %c0_i32, %c0_i32_0 : i32, i32, i32
  }
  func.func @transform_7(%arg0: i32, %arg1: i32, %arg2: memref<1xf32, #tpu.memory_space<smem>>) -> (i32, i32) {
    %c0_i32 = arith.constant 0 : i32
    %c0_i32_0 = arith.constant 0 : i32
    %c0_i32_1 = arith.constant 0 : i32
    return %c0_i32, %c0_i32_0 : i32, i32
  }
  func.func @transform_8(%arg0: i32, %arg1: i32, %arg2: memref<1xf32, #tpu.memory_space<smem>>) -> (i32, i32, i32) {
    %c0_i32 = arith.constant 0 : i32
    %c0_i32_0 = arith.constant 0 : i32
    %c0_i32_1 = arith.constant 0 : i32
    return %arg0, %c0_i32, %c0_i32_0 : i32, i32, i32
  }
}

</mosaic_0001>

<bundles_post_ra>
// kernel: rrdb_ada_pallas.1
= control target key start
LH: loop header
LB: loop body
LE: loop exit
PB: predicated region body
PF: predicated region fallthrough
CT: control target
= control target key end

     0   :  { %s12504_s11 = smov 0   ;;  %s12506_s12 = smov 0   ;;  %s14699_s0 = inlined_call_operand.<no memory space> [shape: f32[1], index: 0, kind: input, shape index: {}]   ;;  %s14700_s1 = inlined_call_operand.vmem [shape: f32[2,16,324], index: 1, kind: input, shape index: {}]   ;;  %s14701_s2 = inlined_call_operand.vmem [shape: f32[3,9,8,16], index: 2, kind: input, shape index: {}]   ;;  %s14702_s3 = inlined_call_operand.vmem [shape: f32[3,9,8,24], index: 3, kind: input, shape index: {}]   ;;  %s14703_s4 = inlined_call_operand.vmem [shape: f32[3,9,8,32], index: 4, kind: input, shape index: {}]   ;;  %s14704_s5 = inlined_call_operand.vmem [shape: f32[3,9,8,40], index: 5, kind: input, shape index: {}]   ;;  %s14705_s6 = inlined_call_operand.vmem [shape: f32[3,9,16,48], index: 6, kind: input, shape index: {}]   ;;  %s14706_s7 = inlined_call_operand.vmem [shape: f32[3,80,1], index: 7, kind: input, shape index: {}]   ;;  %s14707_s8 = inlined_call_operand.vmem [shape: f32[1,286], index: 8, kind: input, shape index: {}]   ;;  %s14708_s9 = inlined_call_operand.vmem [shape: f32[2,16,324], index: 9, kind: output, shape index: {}]  }
   0x1   :  { %14709 = sst [smem:[#allocation6_spill]] %s14700_s1  ;;  %s12508_s13 = smov 0  }
   0x2   :  { %14710 = sst [smem:[#allocation7_spill]] %s14701_s2  ;;  %s12510_s14 = smov 0  }
   0x3   :  { %14711 = sst [smem:[#allocation8_spill]] %s14702_s3  ;;  %s12512_s15 = smov 0  }
   0x4   :  { %14712 = sst [smem:[#allocation9_spill]] %s14707_s8 }
   0x5   :  { %14 = sst [smem:[#allocation4]] %s14699_s0 }
   0x6 LB: > { %s29_s0 = sadd.s32 1, %s12427_s13  ;;  %s32_s16 = sadd.s32 1, %s12431_s14  ;;  %s12435_s15 = sphi %s12512_s15, %s20_s15   ;;  %s12431_s14 = sphi %s12510_s14, %s14722_s14   ;;  %s12427_s13 = sphi %s12508_s13, %s14721_s13   ;;  %s12423_s12 = sphi %s12506_s12, %s14720_s12   ;;  %s12419_s11 = sphi %s12504_s11, %s14719_s11  }
   0x7   : > { %p30_p0 = scmp.ge.s32.totalorder %s29_s0, 3  ;;  %p9643_p1 = scmp.ge.s32.totalorder %s12435_s15, 1 }
   0x8   : > { %p336_p2 = scmp.lt.s32.totalorder %s12435_s15, 7 }
   0x9   : > { %s14724_s0 = smov (%p30_p0, %s29_s0), 0  ;;  %s14726_s16 = smov (!%p30_p0, %s32_s16), %s12431_s14 }
   0xa   : > { %p337_p3 = pnand %p9643_p1, %p336_p2  ;;  %p34_p4 = scmp.ge.s32.totalorder %s14726_s16, 2 }
   0xb   : > { %p400_p5 = scmp.lt.s32.totalorder (!%p337_p3), %s12423_s12, 1  ;;  %p405_p6 = scmp.lt.s32.totalorder (!%p337_p3), %s12419_s11, 2 }
   0xc   : > { %s14728_s16 = smov (%p34_p4, %s14726_s16), 0  ;;  %340 = sbr.rel (%p337_p3) target bundleno = 2787 (0xae3), region = 52 }
   0xd   : > { %14713 = sst [smem:[#allocation5_spill]] %s14728_s16  ;;  %s14714_s8 = sld [smem:[#allocation9_spill]] (!%p337_p3) }
   0xe   : > { %s14715_s1 = sld [smem:[#allocation6_spill]] (!%p337_p3)  ;;  %s14716_s2 = sld [smem:[#allocation7_spill]] (!%p337_p3) }
   0xf   : > { %s14717_s3 = sld [smem:[#allocation8_spill]] (!%p337_p3)  ;;  %p9652_p7 = scmp.ne.s32.totalorder (!%p337_p3), %s12419_s11, 0 }
  0x13   : > { %v12540_v0 = vld [vmem:[%s14714_s8] sm:$0x7]  ;;  %s14730_s12 = smov (!%p400_p5, %s12423_s12), 1  ;;  %vm453_vm0 = vcmask (!%p9652_p7), 556032   ;;  %v12437_v7 = vmov (!%p9652_p7), 0.0  }
  0x14   : > { %s406_s19 = scalar_select %p405_p6, %s12419_s11, 2 }
  0x15   : > { %s11247_s20 = smul.u32 48, %s14730_s12  ;;  %458 = vst [vmem:[#allocation2 + $0x30] sm:$0xff] (!%p9652_p7), %v12437_v7  ;;  %459 = vst [vmem:[#allocation2 + $0x38] sm:$0xff] (!%p9652_p7), %v12437_v7 }
  0x16   : > { %s11248_s21 = smul.u32 72, %s406_s19  ;;  %460 = vst.msk [vmem:[#allocation2 + $0x40] sm:$0xff] (!%p9652_p7), %vm453_vm0, %v12437_v7  ;;  %461 = vst [vmem:[#allocation2 + $0x48] sm:$0xff] (!%p9652_p7), %v12437_v7 }
  0x17   : > { %s12546_s24 = scalar_lea.vmem %s14715_s1, %s11247_s20  ;;  %s11249_s25 = smul.u32 144, %s406_s19  ;;  %462 = vst [vmem:[#allocation2 + $0x50] sm:$0xff] (!%p9652_p7), %v12437_v7  ;;  %463 = vst.msk [vmem:[#allocation2 + $0x58] sm:$0xff] (!%p9652_p7), %vm453_vm0, %v12437_v7 }
  0x18   : > { %s12551_s28 = scalar_lea.vmem %s14716_s2, %s11248_s21  ;;  %s12556_s10 = scalar_lea.vmem %s14717_s3, %s11248_s21  ;;  %v445_v1 = vld [vmem:[%s12546_s24] sm:$0xff] (!%p9652_p7)  ;;  %v446_v2 = vld [vmem:[%s12546_s24 + $0x8] sm:$0xff] (!%p9652_p7)  ;;  %v447_v3 = vld [vmem:[%s12546_s24 + $0x10] sm:$0xff] (!%p9652_p7)  ;;  %464 = vst [vmem:[#allocation2 + $0x60] sm:$0xff] (!%p9652_p7), %v12437_v7 }
  0x19   : > { %s12561_s12 = scalar_lea.vmem %s14703_s4, %s11248_s21  ;;  %s12566_s23 = scalar_lea.vmem %s14704_s5, %s11248_s21  ;;  %451 = vst [vmem:[#allocation2] sm:$0xff] (!%p9652_p7), %v445_v1  ;;  %452 = vst [vmem:[#allocation2 + $0x8] sm:$0xff] (!%p9652_p7), %v446_v2  ;;  %v448_v4 = vld [vmem:[%s12546_s24 + $0x18] sm:$0xff] (!%p9652_p7)  ;;  %v449_v5 = vld [vmem:[%s12546_s24 + $0x20] sm:$0xff] (!%p9652_p7) }
  0x1a   : > { %s12571_s26 = scalar_lea.vmem %s14705_s6, %s11249_s25  ;;  %s11250_s27 = smul.u32 80, %s406_s19  ;;  %454 = vst.msk [vmem:[#allocation2 + $0x10] sm:$0xff] (!%p9652_p7), %vm453_vm0, %v447_v3  ;;  %v450_v6 = vld [vmem:[%s12546_s24 + $0x28] sm:$0xff] (!%p9652_p7)  ;;  %465 = vst [vmem:[#allocation2 + $0x68] sm:$0xff] (!%p9652_p7), %v12437_v7 }
  0x1b   : > { %s12576_s30 = scalar_lea.vmem %s14708_s9, %s11247_s20  ;;  %444 = sbr.rel (%p9652_p7) target bundleno = 34 (0x22), region = 56  ;;  %466 = vst.msk [vmem:[#allocation2 + $0x70] sm:$0xff] (!%p9652_p7), %vm453_vm0, %v12437_v7  ;;  %467 = vst [vmem:[#allocation2 + $0x78] sm:$0xff] (!%p9652_p7), %v12437_v7 }
  0x1c   : > { %s12581_s18 = scalar_lea.vmem %s14706_s7, %s11250_s27  ;;  %469 = vst.msk [vmem:[#allocation2 + $0x88] sm:$0xff] (!%p9652_p7), %vm453_vm0, %v12437_v7  ;;  %455 = vst [vmem:[#allocation2 + $0x18] sm:$0xff] (!%p9652_p7), %v448_v4 }
  0x1d   : > { %456 = vst [vmem:[#allocation2 + $0x20] sm:$0xff] (!%p9652_p7), %v449_v5  ;;  %457 = vst.msk [vmem:[#allocation2 + $0x28] sm:$0xff] (!%p9652_p7), %vm453_vm0, %v450_v6 }
  0x22 PF: > { %v12596_v8 = vld [vmem:[#allocation2 + $0x8] sm:$0xff]  ;;  %v12598_v9 = vld [vmem:[#allocation2 + $0x10] sm:$0xff]  ;;  %v12600_v10 = vld [vmem:[#allocation2] sm:$0xff]  ;;  %v12438_v15 = vmov 0.0|0.0   ;;  %s12439_s1 = smov 127   ;;  %v12440_v18 = vmov 0.0  }
  0x23   : > { %v12604_v11 = vpack.i.bf16 %v12598_v9, %v12596_v8  ;;  %v12606_v12 = vld [vmem:[#allocation2 + $0x18] sm:$0xff]  ;;  %10545 = vmatprep.subr.bf16.mxu1 %v12438_v15  ;;  %576 = vmatprep.mubr.f32.mxu0 %v12440_v18  ;;  %vm12441_vm1 = vmmov 0   ;;  %s12442_s2 = smov 126   ;;  %s12443_s3 = smov 110   ;;  %v2001_v19 = vld [vmem:[%s12581_s18] sm:$0xff]  ;;  %v12449_v20 = vmov 0  }
  0x24   : > { %v12608_v13 = vld [vmem:[#allocation2 + $0x20] sm:$0xff]  ;;  %v12610_v14 = vld [vmem:[#allocation2 + $0x28] sm:$0xff]  ;;  %v12615_v16 = vpack.i.bf16 %v12606_v12, %v12600_v10  ;;  %10050 = vmatprep.mubr.msk.f32.mxu1 %vm12441_vm1, %v12440_v18  ;;  %s12444_s8 = smov 109   ;;  %s12445_s16 = smov 108   ;;  %11425 = vset.pattern.permute.xlu0 %v12449_v20  ;;  %vm497_vm2 = vcmask 1039360   ;;  %vm811_vm3 = vcmask 1031168   ;;  %v12690_v48 = vpack.c.bf16 %v12606_v12, %v12600_v10 }
  0x25   : > { %11306 = vrot.lane.b32.xlu0 %v12604_v11, %s12439_s1  ;;  %v12621_v17 = vpack.i.bf16 %v12610_v14, %v12608_v13  ;;  %s12446_s19 = smov 92   ;;  %s12447_s20 = smov 91   ;;  %11546 = vset.pattern.permute.xlu1 %v12449_v20  ;;  %v12679_v41 = vpack.c.bf16 %v12608_v13, %v12596_v8  ;;  %v12683_v45 = vpack.c.bf16 %v12610_v14, %v12598_v9  ;;  %v9653_v47 = vld [vmem:[%s12551_s28 + $0x8] sm:$0xff]  ;;  %vm508_vm4 = vcmask 130048   ;;  %v476_v57 = vld [vmem:[%s12551_s28] sm:$0xff]  ;;  %v9658_v3 = vld [vmem:[%s12551_s28 + $0x10] sm:$0xff] }
  0x26   : > { %11316 = vrot.lane.b32.xlu1 %v12615_v16, %s12439_s1  ;;  %s12448_s21 = smov 90   ;;  %vm983_vm5 = vcmask 900096   ;;  %vm1155_vm6 = vcmask 891904   ;;  %vm1327_vm7 = vcmask 883712   ;;  %vm1499_vm8 = vcmask 752640   ;;  %s12450_s25 = smov 19  }
  0x27   : > { %vm1671_vm9 = vcmask 744448   ;;  %vm1843_vm10 = vcmask 736256   ;;  %vm2053_vm14 = vcmask 1047704   ;;  %vm2047_vm15 = vcmask 154624   ;;  %p9809_p8 = scmp.ne.s32.totalorder %s12419_s11, 2 }
  0x28   : > { %vm2056_vm0 = vcmask 400384  }
  0x29   : > { %11311 = vrot.lane.b32.xlu0 %v12621_v17, %s12439_s1 }
  0x2a   : > { %11321 = vrot.lane.b32.xlu1 %v12604_v11, %s12442_s2 }
  0x2d   : > { %11326 = vrot.lane.b32.xlu0 %v12621_v17, %s12442_s2 }
  0x2e   : > { %11331 = vrot.lane.b32.xlu1 %v12615_v16, %s12442_s2 }
  0x31   : > { %11336 = vrot.lane.b32.xlu0 %v12604_v11, %s12443_s3 }
  0x32   : > { %11341 = vrot.lane.b32.xlu1 %v12621_v17, %s12443_s3 }
  0x35   : > { %11346 = vrot.lane.b32.xlu0 %v12615_v16, %s12443_s3 }
  0x36   : > { %11351 = vrot.lane.b32.xlu1 %v12604_v11, %s12444_s8 }
  0x39   : > { %11356 = vrot.lane.b32.xlu0 %v12621_v17, %s12444_s8 }
  0x3a   : > { %11361 = vrot.lane.b32.xlu1 %v12615_v16, %s12444_s8 }
  0x3d   : > { %11366 = vrot.lane.b32.xlu0 %v12604_v11, %s12445_s16 }
  0x3e   : > { %11371 = vrot.lane.b32.xlu1 %v12621_v17, %s12445_s16 }
  0x41   : > { %11376 = vrot.lane.b32.xlu0 %v12615_v16, %s12445_s16 }
  0x42   : > { %11381 = vrot.lane.b32.xlu1 %v12604_v11, %s12446_s19 }
  0x45   : > { %11386 = vrot.lane.b32.xlu0 %v12621_v17, %s12446_s19 }
  0x46   : > { %11391 = vrot.lane.b32.xlu1 %v12615_v16, %s12446_s19 }
  0x49   : > { %11396 = vrot.lane.b32.xlu0 %v12604_v11, %s12447_s20 }
  0x4a   : > { %11401 = vrot.lane.b32.xlu1 %v12621_v17, %s12447_s20 }
  0x4d   : > { %11406 = vrot.lane.b32.xlu0 %v12615_v16, %s12447_s20 }
  0x4e   : > { %11411 = vrot.lane.b32.xlu1 %v12604_v11, %s12448_s21 }
  0x51   : > { %11416 = vrot.lane.b32.xlu0 %v12621_v17, %s12448_s21 }
  0x52   : > { %11421 = vrot.lane.b32.xlu1 %v12615_v16, %s12448_s21 }
  0x55   : > { %2004 = vperm.xlu0 %11425, %v2001_v19  }
  0x97   : > { %v11307_v21 = vpop.permute.xlu0 %11306 }
  0x98   : > { %v11317_v22 = vpop.permute.xlu1 %11316  ;;  %v11308_v23 = vunpack.i.l.bf16 %v11307_v21  ;;  %v11309_v24 = vunpack.i.h.bf16 %v11307_v21  ;;  %v9661_v21 = vld [vmem:[%s12551_s28 + $0x18] sm:$0xff] }
  0x99   : > { %v11319_v25 = vunpack.i.h.bf16 %v11317_v22  ;;  %v11318_v26 = vunpack.i.l.bf16 %v11317_v22 }
  0x9a   : > { %v499_v31 = vsel %vm497_vm2, %v11308_v23, %v11309_v24 }
  0x9b   : > { %v11312_v27 = vpop.permute.xlu0 %11311  ;;  %v498_v36 = vsel %vm497_vm2, %v11318_v26, %v11308_v23 }
  0x9c   : > { %v11313_v28 = vunpack.i.l.bf16 %v11312_v27  ;;  %v11314_v29 = vunpack.i.h.bf16 %v11312_v27  ;;  %v11322_v30 = vpop.permute.xlu1 %11321 }
  0x9d   : > { %v11324_v32 = vunpack.i.h.bf16 %v11322_v30  ;;  %v11323_v33 = vunpack.i.l.bf16 %v11322_v30  ;;  %v12727_v30 = vld [vmem:[%s12551_s28 + $0x20] sm:$0xff] }
  0x9e   : > { %v10546_v34 = vpack.c.bf16 %v11314_v29, %v11309_v24  ;;  %v501_v35 = vsel %vm497_vm2, %v11313_v28, %v11314_v29  ;;  %v500_v37 = vsel %vm497_vm2, %v11319_v25, %v11313_v28 }
  0x9f   : > { %v10541_v38 = vpack.c.bf16 %v501_v35, %v499_v31  ;;  %v10543_v39 = vpack.c.bf16 %v500_v37, %v498_v36  ;;  %v11327_v40 = vpop.permute.xlu0 %11326  ;;  %v813_v46 = vsel %vm811_vm3, %v11323_v33, %v11324_v32 }
  0xa0   : > { %10547 = vmatpush3.bf16.msra.mxu1 %v10546_v34  ;;  %v11329_v42 = vunpack.i.h.bf16 %v11327_v40  ;;  %v11328_v43 = vunpack.i.l.bf16 %v11327_v40  ;;  %v11332_v44 = vpop.permute.xlu1 %11331 }
  0xa1   : > { %10542 = vmatprep.subr.bf16.mxu0 %v10541_v38  ;;  %10552 = vmatprep.subr.bf16.mxu1 %v12438_v15  ;;  %v11334_v50 = vunpack.i.h.bf16 %v11332_v44  ;;  %v11333_v51 = vunpack.i.l.bf16 %v11332_v44 }
  0xa2   : > { %10544 = vmatpush1.bf16.msra.mxu0 %v10543_v39  ;;  %v815_v49 = vsel %vm811_vm3, %v11328_v43, %v11329_v42  ;;  %v10560_v54 = vpack.c.bf16 %v11329_v42, %v11324_v32  ;;  %v12738_v42 = vld [vmem:[%s12551_s28 + $0x28] sm:$0xff] }
  0xa3   : > { %10051 = vmatmul.mubr.msk.f32.vlgmr.msra.gmra.mrb[0].mxu1 %vm508_vm4, %v9653_v47  ;;  %10549 = vmatprep.subr.bf16.mxu0 %v12679_v41  ;;  %v11337_v52 = vpop.permute.xlu0 %11336  ;;  %v10555_v53 = vpack.c.bf16 %v815_v49, %v813_v46  ;;  %v814_v61 = vsel %vm811_vm3, %v11334_v50, %v11328_v43  ;;  %v812_v62 = vsel %vm811_vm3, %v11333_v51, %v11323_v33 }
  0xa4   : > { %10554 = vmatpush3.bf16.msra.mxu1 %v12683_v45  ;;  %v11339_v55 = vunpack.i.h.bf16 %v11337_v52  ;;  %v11338_v56 = vunpack.i.l.bf16 %v11337_v52  ;;  %10057 = vmatprep.mubr.msk.f32.mxu1 %vm12441_vm1, %v12440_v18  ;;  %v11342_v58 = vpop.permute.xlu1 %11341  ;;  %v10557_v6 = vpack.c.bf16 %v814_v61, %v812_v62 }
  0xa5   : > { %9654 = vmatmul.mubr.msk.f32.vlgmr.msra.gmra.mrb[0].mxu0 %vm508_vm4, %v9653_v47  ;;  %10559 = vmatprep.subr.bf16.mxu1 %v12438_v15  ;;  %v11344_v59 = vunpack.i.h.bf16 %v11342_v58  ;;  %v11343_v60 = vunpack.i.l.bf16 %v11342_v58 }
  0xa6   : > { %10551 = vmatpush1.bf16.msra.mxu0 %v12690_v48  ;;  %720 = vmatprep.mubr.f32.mxu0 %v12440_v18  ;;  %v985_v4 = vsel %vm983_vm5, %v11338_v56, %v11339_v55 }
  0xa7   : > { %10058 = vmatmul.mubr.msk.f32.vlgmr.msra.gmra.mrb[2].mxu1 %vm508_vm4, %v476_v57  ;;  %10556 = vmatprep.subr.bf16.mxu0 %v10555_v53  ;;  %v11347_v63 = vpop.permute.xlu0 %11346  ;;  %v10567_v1 = vpack.c.bf16 %v11344_v59, %v11339_v55  ;;  %v987_v5 = vsel %vm983_vm5, %v11343_v60, %v11344_v59 }
  0xa8   : > { %10561 = vmatpush3.bf16.msra.mxu1 %v10560_v54  ;;  %10064 = vmatprep.mubr.msk.f32.mxu1 %vm12441_vm1, %v12440_v18  ;;  %v11352_v2 = vpop.permute.xlu1 %11351  ;;  %v11349_v8 = vunpack.i.h.bf16 %v11347_v63  ;;  %v11348_v9 = vunpack.i.l.bf16 %v11347_v63  ;;  %v10562_v10 = vpack.c.bf16 %v987_v5, %v985_v4  ;;  %v12756_v63 = vld [vmem:[%s12551_s28 + $0x30] sm:$0xff] }
  0xa9   : > { %10566 = vmatprep.subr.bf16.mxu1 %v12438_v15  ;;  %v11354_v7 = vunpack.i.h.bf16 %v11352_v2  ;;  %v11353_v13 = vunpack.i.l.bf16 %v11352_v2 }
  0xaa   : > { %v984_v23 = vsel %vm983_vm5, %v11348_v9, %v11338_v56  ;;  %v986_v24 = vsel %vm983_vm5, %v11349_v8, %v11343_v60  ;;  %v9673_v9 = vld [vmem:[%s12551_s28 + $0x38] sm:$0xff] }
  0xab   : > { %10065 = vmatmul.mubr.msk.f32.vlgmr.msra.gmra.mrb[4].mxu1 %vm508_vm4, %v9658_v3  ;;  %v11357_v12 = vpop.permute.xlu0 %11356  ;;  %v1157_v27 = vsel %vm1155_vm6, %v11353_v13, %v11354_v7  ;;  %v10564_v32 = vpack.c.bf16 %v986_v24, %v984_v23 }
  0xac   : > { %10568 = vmatpush3.bf16.msra.mxu1 %v10567_v1  ;;  %v11359_v14 = vunpack.i.h.bf16 %v11357_v12  ;;  %v11358_v19 = vunpack.i.l.bf16 %v11357_v12  ;;  %v11362_v20 = vpop.permute.xlu1 %11361  ;;  %10071 = vmatprep.mubr.msk.f32.mxu1 %vm12441_vm1, %v12440_v18 }
  0xad   : > { %9656 = vmatmul.mubr.msk.f32.vlgmr.msra.gmra.mrb[0].mxu0 %vm508_vm4, %v476_v57  ;;  %10573 = vmatprep.subr.bf16.mxu1 %v12438_v15  ;;  %v11364_v33 = vunpack.i.h.bf16 %v11362_v20  ;;  %v11363_v34 = vunpack.i.l.bf16 %v11362_v20 }
  0xae   : > { %10558 = vmatpush1.bf16.msra.mxu0 %v10557_v6  ;;  %889 = vmatprep.mubr.f32.mxu0 %v12440_v18  ;;  %v10574_v22 = vpack.c.bf16 %v11359_v14, %v11354_v7  ;;  %v1159_v28 = vsel %vm1155_vm6, %v11358_v19, %v11359_v14 }
  0xaf   : > { %10563 = vmatprep.subr.bf16.mxu0 %v10562_v10  ;;  %v11367_v25 = vpop.permute.xlu0 %11366  ;;  %10072 = vmatmul.mubr.msk.f32.vlgmr.msra.gmra.mrb[6].mxu1 %vm508_vm4, %v9661_v21  ;;  %v10569_v35 = vpack.c.bf16 %v1159_v28, %v1157_v27  ;;  %v1158_v44 = vsel %vm1155_vm6, %v11364_v33, %v11358_v19  ;;  %v1156_v46 = vsel %vm1155_vm6, %v11363_v34, %v11353_v13 }
  0xb0   : > { %v11369_v26 = vunpack.i.h.bf16 %v11367_v25  ;;  %10575 = vmatpush3.bf16.msra.mxu1 %v10574_v22  ;;  %v11372_v29 = vpop.permute.xlu1 %11371  ;;  %10078 = vmatprep.mubr.msk.f32.mxu1 %vm12441_vm1, %v12440_v18  ;;  %v11368_v38 = vunpack.i.l.bf16 %v11367_v25  ;;  %v10571_v53 = vpack.c.bf16 %v1158_v44, %v1156_v46 }
  0xb1   : > { %v11374_v31 = vunpack.i.h.bf16 %v11372_v29  ;;  %10580 = vmatprep.subr.bf16.mxu1 %v12438_v15  ;;  %v11373_v39 = vunpack.i.l.bf16 %v11372_v29  ;;  %v9676_v29 = vld [vmem:[%s12551_s28 + $0x40] sm:$0xff]  ;;  %s9468_s28 = sld [smem:[#allocation4]] (!%p9809_p8) }
  0xb2   : > { %v1329_v49 = vsel %vm1327_vm7, %v11368_v38, %v11369_v26 }
  0xb3   : > { %v11377_v36 = vpop.permute.xlu0 %11376  ;;  %v10581_v37 = vpack.c.bf16 %v11374_v31, %v11369_v26  ;;  %10079 = vmatmul.mubr.msk.f32.vlgmr.msra.gmra.mrb[8].mxu1 %vm508_vm4, %v12727_v30  ;;  %v1331_v50 = vsel %vm1327_vm7, %v11373_v39, %v11374_v31 }
  0xb4   : > { %v12732_v40 = vpop.permute.xlu1 %11381  ;;  %10085 = vmatprep.mubr.msk.f32.mxu1 %vm12441_vm1, %v12440_v18  ;;  %v11379_v55 = vunpack.i.h.bf16 %v11377_v36  ;;  %v11378_v56 = vunpack.i.l.bf16 %v11377_v36  ;;  %v10576_v57 = vpack.c.bf16 %v1331_v50, %v1329_v49 }
  0xb5   : > { %9659 = vmatmul.mubr.msk.f32.vlgmr.msra.gmra.mrb[0].mxu0 %vm508_vm4, %v9658_v3  ;;  %10582 = vmatpush3.bf16.msra.mxu1 %v10581_v37  ;;  %v11384_v43 = vunpack.i.h.bf16 %v12732_v40  ;;  %v11383_v59 = vunpack.i.l.bf16 %v12732_v40 }
  0xb6   : > { %10565 = vmatpush1.bf16.msra.mxu0 %v10564_v32  ;;  %1061 = vmatprep.mubr.f32.mxu0 %v12440_v18  ;;  %v1328_v2 = vsel %vm1327_vm7, %v11378_v56, %v11368_v38  ;;  %v1330_v3 = vsel %vm1327_vm7, %v11379_v55, %v11373_v39 }
  0xb7   : > { %10570 = vmatprep.subr.bf16.mxu0 %v10569_v35  ;;  %v11387_v47 = vpop.permute.xlu0 %11386  ;;  %10587 = vmatprep.subr.bf16.mxu1 %v12438_v15  ;;  %v1501_v6 = vsel %vm1499_vm8, %v11383_v59, %v11384_v43  ;;  %v10578_v10 = vpack.c.bf16 %v1330_v3, %v1328_v2 }
  0xb8   : > { %v11389_v51 = vunpack.i.h.bf16 %v11387_v47  ;;  %v11392_v52 = vpop.permute.xlu1 %11391  ;;  %10086 = vmatmul.mubr.msk.f32.vlgmr.msra.gmra.mrb[10].mxu1 %vm508_vm4, %v12738_v42  ;;  %v11388_v60 = vunpack.i.l.bf16 %v11387_v47 }
  0xb9   : > { %10092 = vmatprep.mubr.msk.f32.mxu1 %vm12441_vm1, %v12440_v18  ;;  %v11394_v13 = vunpack.i.h.bf16 %v11392_v52  ;;  %v11393_v14 = vunpack.i.l.bf16 %v11392_v52 }
  0xba   : > { %v10588_v54 = vpack.c.bf16 %v11389_v51, %v11384_v43  ;;  %v1503_v7 = vsel %vm1499_vm8, %v11388_v60, %v11389_v51 }
  0xbb   : > { %v12751_v58 = vpop.permute.xlu0 %11396  ;;  %v10583_v19 = vpack.c.bf16 %v1503_v7, %v1501_v6  ;;  %v1502_v25 = vsel %vm1499_vm8, %v11394_v13, %v11388_v60  ;;  %v1500_v26 = vsel %vm1499_vm8, %v11393_v14, %v11383_v59 }
  0xbc   : > { %v11399_v61 = vunpack.i.h.bf16 %v12751_v58  ;;  %10589 = vmatpush3.bf16.msra.mxu1 %v10588_v54  ;;  %v11402_v62 = vpop.permute.xlu1 %11401 }
  0xbd   : > { %9662 = vmatmul.mubr.msk.f32.vlgmr.msra.gmra.mrb[0].mxu0 %vm508_vm4, %v9661_v21  ;;  %v11404_v1 = vunpack.i.h.bf16 %v11402_v62  ;;  %10594 = vmatprep.subr.bf16.mxu1 %v12438_v15  ;;  %v11398_v21 = vunpack.i.l.bf16 %v12751_v58  ;;  %v11403_v22 = vunpack.i.l.bf16 %v11402_v62 }
  0xbe   : > { %10572 = vmatpush1.bf16.msra.mxu0 %v10571_v53  ;;  %1233 = vmatprep.mubr.f32.mxu0 %v12440_v18 }
  0xbf   : > { %10577 = vmatprep.subr.bf16.mxu0 %v10576_v57  ;;  %v11407_v4 = vpop.permute.xlu0 %11406  ;;  %v10595_v5 = vpack.c.bf16 %v11404_v1, %v11399_v61  ;;  %10093 = vmatmul.mubr.msk.f32.vlgmr.msra.gmra.mrb[12].mxu1 %vm508_vm4, %v12756_v63  ;;  %v1673_v27 = vsel %vm1671_vm9, %v11398_v21, %v11399_v61  ;;  %v1675_v28 = vsel %vm1671_vm9, %v11403_v22, %v11404_v1 }
  0xc0   : > { %v11412_v8 = vpop.permute.xlu1 %11411  ;;  %10099 = vmatprep.mubr.msk.f32.mxu1 %vm12441_vm1, %v12440_v18  ;;  %v11409_v31 = vunpack.i.h.bf16 %v11407_v4  ;;  %v11408_v32 = vunpack.i.l.bf16 %v11407_v4  ;;  %v10590_v33 = vpack.c.bf16 %v1675_v28, %v1673_v27 }
  0xc1   : > { %10596 = vmatpush3.bf16.msra.mxu1 %v10595_v5  ;;  %v11414_v12 = vunpack.i.h.bf16 %v11412_v8  ;;  %v11413_v34 = vunpack.i.l.bf16 %v11412_v8  ;;  %v2020_v8 = vlaneseq }
  0xc2   : > { %10601 = vmatprep.subr.bf16.mxu1 %v12438_v15  ;;  %v1672_v36 = vsel %vm1671_vm9, %v11408_v32, %v11398_v21  ;;  %v1674_v37 = vsel %vm1671_vm9, %v11409_v31, %v11403_v22 }
  0xc3   : > { %v11417_v20 = vpop.permute.xlu0 %11416  ;;  %v1845_v39 = vsel %vm1843_vm10, %v11413_v34, %v11414_v12  ;;  %v10592_v43 = vpack.c.bf16 %v1674_v37, %v1672_v36  ;;  %v2021_v13 = vshrl.u32 %v2020_v8, 7 }
  0xc4   : > { %v11419_v23 = vunpack.i.h.bf16 %v11417_v20  ;;  %10100 = vmatmul.mubr.msk.f32.vlgmr.msra.gmra.mrb[14].mxu1 %vm508_vm4, %v9673_v9  ;;  %v11418_v35 = vunpack.i.l.bf16 %v11417_v20  ;;  %v11422_v38 = vpop.permute.xlu1 %11421 }
  0xc5   : > { %9665 = vmatmul.mubr.msk.f32.vlgmr.msra.gmra.mrb[0].mxu0 %vm508_vm4, %v12727_v30  ;;  %10106 = vmatprep.mubr.msk.f32.mxu1 %vm12441_vm1, %v12440_v18  ;;  %v10585_v30 = vpack.c.bf16 %v1502_v25, %v1500_v26  ;;  %v11424_v44 = vunpack.i.h.bf16 %v11422_v38  ;;  %v11423_v46 = vunpack.i.l.bf16 %v11422_v38  ;;  %v2030_v20 = vsub.s32 2, %v2021_v13 }
  0xc6   : > { %10579 = vmatpush1.bf16.msra.mxu0 %v10578_v10  ;;  %1405 = vmatprep.mubr.f32.mxu0 %v12440_v18  ;;  %v10602_v24 = vpack.c.bf16 %v11419_v23, %v11414_v12  ;;  %v1847_v40 = vsel %vm1843_vm10, %v11418_v35, %v11419_v23  ;;  %v2022_v28 = vsub.s32 0, %v2021_v13 }
  0xc7   : > { %10584 = vmatprep.subr.bf16.mxu0 %v10583_v19  ;;  %v10597_v47 = vpack.c.bf16 %v1847_v40, %v1845_v39  ;;  %v1844_v49 = vsel %vm1843_vm10, %v11423_v46, %v11413_v34  ;;  %v2026_v34 = vsub.s32 1, %v2021_v13 }
  0xc8   : > { %10603 = vmatpush3.bf16.msra.mxu1 %v10602_v24  ;;  %v12804_v24 = vrot.slane %v12540_v0, %v2030_v20 }
  0xc9   : > { %10608 = vmatprep.subr.bf16.mxu1 %v12438_v15  ;;  %v12819_v39 = vrot.slane %v12540_v0, %v2026_v34 }
  0xcb   : > { %10107 = vmatmul.mubr.msk.f32.vlgmr.msra.gmra.mrb[16].mxu1 %vm508_vm4, %v9676_v29 }
  0xcc   : > { %10115 = vmatprep.mubr.msk.f32.mxu1 %vm12441_vm1, %v12440_v18 }
  0xcd   : > { %9668 = vmatmul.mubr.msk.f32.vlgmr.msra.gmra.mrb[0].mxu0 %vm508_vm4, %v12738_v42  ;;  %v1846_v42 = vsel %vm1843_vm10, %v11424_v44, %v11418_v35 }
  0xce   : > { %10586 = vmatpush1.bf16.msra.mxu0 %v10585_v30  ;;  %1577 = vmatprep.mubr.f32.mxu0 %v12440_v18  ;;  %v10599_v50 = vpack.c.bf16 %v1846_v42, %v1844_v49 }
  0xcf   : > { %10591 = vmatprep.subr.bf16.mxu0 %v10590_v33  ;;  %v12815_v33 = vrot.slane %v12540_v0, %v2022_v28 }
  0xd4   : > { %v2005_v19 = vpop.permute.xlu0 %2004 }
  0xd5   : > { %9671 = vmatmul.mubr.msk.f32.vlgmr.msra.gmra.mrb[0].mxu0 %vm508_vm4, %v12756_v63 }
  0xd6   : > { %10593 = vmatpush1.bf16.msra.mxu0 %v10592_v43  ;;  %1749 = vmatprep.mubr.f32.mxu0 %v12440_v18 }
  0xd7   : > { %10598 = vmatprep.subr.bf16.mxu0 %v10597_v47 }
  0xdd   : > { %9674 = vmatmul.mubr.msk.f32.vlgmr.msra.gmra.mrb[0].mxu0 %vm508_vm4, %v9673_v9 }
  0xde   : > { %10600 = vmatpush1.bf16.msra.mxu0 %v10599_v50  ;;  %1921 = vmatprep.mubr.f32.mxu0 %v12440_v18 }
  0xe5   : > { %9677 = vmatmul.mubr.msk.f32.vlgmr.msra.gmra.mrb[0].mxu0 %vm508_vm4, %v9676_v29  ;;  %vm2112_vm4 = vcmask 195584  }
  0xe6   : > { %2180 = vmatprep.mubr.f32.mxu0 %v12440_v18 }
 0x176   : > { %v649_v51 = vpop.f32.mrb[0].mxu1 }
 0x177   : > { %v10052_v52 = vpop.f32.mrb[1].mxu1 }
 0x17a   : > { %v793_v53 = vpop.f32.mrb[2].mxu1 }
 0x17b   : > { %v794_v54 = vadd.f32 %v793_v53, %v649_v51  ;;  %v10059_v55 = vpop.f32.mrb[3].mxu1 }
 0x17e   : > { %v962_v56 = vpop.f32.mrb[4].mxu1 }
 0x17f   : > { %v968_v57 = vadd.f32 %v962_v56, %v794_v54  ;;  %v10066_v58 = vpop.f32.mrb[5].mxu1 }
 0x182   : > { %v1134_v59 = vpop.f32.mrb[6].mxu1 }
 0x183   : > { %v1140_v60 = vadd.f32 %v1134_v59, %v968_v57  ;;  %v10073_v61 = vpop.f32.mrb[7].mxu1 }
 0x186   : > { %v1306_v62 = vpop.f32.mrb[8].mxu1 }
 0x187   : > { %v1312_v63 = vadd.f32 %v1306_v62, %v1140_v60  ;;  %v10080_v1 = vpop.f32.mrb[9].mxu1 }
 0x18b   : > { %v1478_v2 = vpop.f32.mrb[10].mxu1 }
 0x18c   : > { %v1484_v3 = vadd.f32 %v1478_v2, %v1312_v63  ;;  %v10087_v4 = vpop.f32.mrb[11].mxu1 }
 0x192   : > { %v1650_v5 = vpop.f32.mrb[12].mxu1 }
 0x193   : > { %v1656_v6 = vadd.f32 %v1650_v5, %v1484_v3  ;;  %v10094_v7 = vpop.f32.mrb[13].mxu1 }
 0x197   : > { %v1822_v9 = vpop.f32.mrb[14].mxu1 }
 0x198   : > { %v1828_v10 = vadd.f32 %v1822_v9, %v1656_v6  ;;  %v10101_v12 = vpop.f32.mrb[15].mxu1 }
 0x199   : > { %v9679_v12 = vld [vmem:[%s12556_s10 + $0x8] sm:$0xff] }
 0x19e   : > { %v1994_v14 = vpop.f32.mrb[16].mxu1 }
 0x19f   : > { %v2000_v21 = vadd.f32 %v1994_v14, %v1828_v10  ;;  %v10108_v22 = vpop.f32.mrb[17].mxu1 }
 0x1a0   : > { %v2067_v22 = vld [vmem:[%s12556_s10] sm:$0xff] }
 0x1a1   : > { %v2009_v23 = vadd.f32 %v2005_v19, %v2000_v21 }
 0x1a3   : > { %vm2012_vm11 = vcmp.ge.f32.partialorder %v2009_v23, 0.0  ;;  %v2015_v25 = vmul.f32 0.2, %v2009_v23 }
 0x1a5   : > { %v2018_v26 = vsel %vm2012_vm11, %v2009_v23, %v2015_v25 }
 0x1a6   : > { %v2037_v27 = vmul.f32 %v12804_v24, %v2018_v26 }
 0x1a8   : > { %2045 = vrot.lane.b32.xlu0 %v2037_v27, %s12450_s25 }
 0x1ac   : > { %11432 = vrot.lane.b32.xlu0 %v12621_v17, %s12439_s1 }
 0x1b0   : > { %11447 = vrot.lane.b32.xlu0 %v12621_v17, %s12442_s2 }
 0x1b4   : > { %11462 = vrot.lane.b32.xlu0 %v12621_v17, %s12443_s3 }
 0x1b8   : > { %v1923_v29 = vpop.f32.mrb[0].mxu0 }
 0x1b9   : > { %v2007_v30 = vadd.f32 %v2005_v19, %v1923_v29  ;;  %v1925_v31 = vpop.f32.mrb[1].mxu0 }
 0x1ba   : > { %v2008_v32 = vadd.f32 %v2005_v19, %v1925_v31 }
 0x1bb   : > { %vm2010_vm12 = vcmp.ge.f32.partialorder %v2007_v30, 0.0  ;;  %v2013_v35 = vmul.f32 0.2, %v2007_v30 }
 0x1bc   : > { %vm2011_vm13 = vcmp.ge.f32.partialorder %v2008_v32, 0.0  ;;  %v2014_v36 = vmul.f32 0.2, %v2008_v32 }
 0x1bd   : > { %v2016_v37 = vsel %vm2010_vm12, %v2007_v30, %v2013_v35 }
 0x1be   : > { %v2035_v38 = vmul.f32 %v12815_v33, %v2016_v37  ;;  %v2017_v40 = vsel %vm2011_vm13, %v2008_v32, %v2014_v36 }
 0x1bf   : > { %v2036_v43 = vmul.f32 %v12819_v39, %v2017_v40 }
 0x1c0   : > { %2041 = vrot.lane.b32.xlu1 %v2035_v38, %s12450_s25 }
 0x1c4   : > { %2043 = vrot.lane.b32.xlu1 %v2036_v43, %s12450_s25 }
 0x1c8   : > { %11427 = vrot.lane.b32.xlu1 %v12604_v11, %s12439_s1 }
 0x1cc   : > { %11437 = vrot.lane.b32.xlu1 %v12615_v16, %s12439_s1 }
 0x1d0   : > { %11442 = vrot.lane.b32.xlu1 %v12604_v11, %s12442_s2 }
 0x1d4   : > { %11452 = vrot.lane.b32.xlu1 %v12615_v16, %s12442_s2 }
 0x1d8   : > { %11457 = vrot.lane.b32.xlu1 %v12604_v11, %s12443_s3 }
 0x1dc   : > { %11467 = vrot.lane.b32.xlu1 %v12615_v16, %s12443_s3 }
 0x1e0   : > { %11472 = vrot.lane.b32.xlu1 %v12604_v11, %s12444_s8 }
 0x21a   : > { %v2046_v0 = vpop.permute.xlu0 %2045 }
 0x21e   : > { %v11433_v46 = vpop.permute.xlu0 %11432 }
 0x21f   : > { %v11435_v50 = vunpack.i.h.bf16 %v11433_v46  ;;  %v11434_v51 = vunpack.i.l.bf16 %v11433_v46 }
 0x221   : > { %v2100_v56 = vsel %vm497_vm2, %v11434_v51, %v11435_v50 }
 0x222   : > { %v11448_v6 = vpop.permute.xlu0 %11447 }
 0x223   : > { %v11450_v19 = vunpack.i.h.bf16 %v11448_v6  ;;  %v11449_v27 = vunpack.i.l.bf16 %v11448_v6 }
 0x225   : > { %v2424_v36 = vsel %vm811_vm3, %v11449_v27, %v11450_v19 }
 0x226   : > { %v12935_v8 = vpop.permute.xlu0 %11462 }
 0x227   : > { %v11465_v38 = vunpack.i.h.bf16 %v12935_v8 }
 0x232   : > { %v2042_v44 = vpop.permute.xlu1 %2041 }
 0x233   : > { %2054 = vst.msk [vmem:[#allocation2 + $0x30] sm:$0xff] %vm2053_vm14, %v2042_v44 }
 0x236   : > { %v2044_v47 = vpop.permute.xlu1 %2043 }
 0x237   : > { %v12840_v42 = vsel %vm2047_vm15, %v2042_v44, %v2044_v47  ;;  %v2049_v49 = vsel %vm2047_vm15, %v2044_v47, %v2046_v0  ;;  %v9684_v0 = vld [vmem:[%s12556_s10 + $0x10] sm:$0xff] }
 0x238   : > { %2055 = vst [vmem:[#allocation2 + $0x38] sm:$0xff] %v12840_v42  ;;  %2057 = vst.msk [vmem:[#allocation2 + $0x40] sm:$0xff] %vm2056_vm0, %v2049_v49  ;;  %v11464_v49 = vunpack.i.l.bf16 %v12935_v8 }
 0x23a   : > { %v12845_v52 = vld [vmem:[#allocation2 + $0x30] sm:$0xff]  ;;  %v11428_v53 = vpop.permute.xlu1 %11427 }
 0x23b   : > { %2091 = vrot.lane.b32.xlu0 %v12845_v52, %s12439_s1  ;;  %v11430_v54 = vunpack.i.h.bf16 %v11428_v53  ;;  %v11429_v55 = vunpack.i.l.bf16 %v11428_v53 }
 0x23d   : > { %v10609_v57 = vpack.c.bf16 %v11435_v50, %v11430_v54  ;;  %v2098_v58 = vsel %vm497_vm2, %v11429_v55, %v11430_v54 }
 0x23e   : > { %v11438_v59 = vpop.permute.xlu1 %11437  ;;  %v10604_v60 = vpack.c.bf16 %v2100_v56, %v2098_v58  ;;  %v2606_v58 = vsel %vm983_vm5, %v11464_v49, %v11465_v38 }
 0x23f   : > { %2415 = vrot.lane.b32.xlu0 %v12845_v52, %s12442_s2  ;;  %v12853_v61 = vld [vmem:[#allocation2 + $0x40] sm:$0xff]  ;;  %v11440_v62 = vunpack.i.h.bf16 %v11438_v59  ;;  %v11439_v63 = vunpack.i.l.bf16 %v11438_v59  ;;  %10610 = vmatpush3.bf16.msra.mxu1 %v10609_v57 }
 0x240   : > { %2095 = vrot.lane.b32.xlu1 %v12853_v61, %s12439_s1  ;;  %10605 = vmatprep.subr.bf16.mxu0 %v10604_v60 }
 0x241   : > { %v2097_v1 = vsel %vm497_vm2, %v11439_v63, %v11429_v55  ;;  %v2099_v2 = vsel %vm497_vm2, %v11440_v62, %v11434_v51  ;;  %10113 = vmatprep.subr.mxu1 %v12440_v18 }
 0x242   : > { %v10606_v3 = vpack.c.bf16 %v2099_v2, %v2097_v1  ;;  %v11443_v4 = vpop.permute.xlu1 %11442 }
 0x243   : > { %2597 = vrot.lane.b32.xlu0 %v12845_v52, %s12443_s3  ;;  %v11445_v14 = vunpack.i.h.bf16 %v11443_v4  ;;  %v11444_v26 = vunpack.i.l.bf16 %v11443_v4 }
 0x244   : > { %11482 = vrot.lane.b32.xlu1 %v12615_v16, %s12444_s8  ;;  %10607 = vmatpush1.bf16.msra.mxu0 %v10606_v3 }
 0x245   : > { %v10623_v23 = vpack.c.bf16 %v11450_v19, %v11445_v14  ;;  %v2422_v35 = vsel %vm811_vm3, %v11444_v26, %v11445_v14 }
 0x246   : > { %v10618_v43 = vpack.c.bf16 %v2424_v36, %v2422_v35 }
 0x247   : > { %2093 = vrot.lane.b32.xlu0 %v12840_v42, %s12439_s1 }
 0x248   : > { %11487 = vrot.lane.b32.xlu1 %v12604_v11, %s12445_s16 }
 0x24b   : > { %11477 = vrot.lane.b32.xlu0 %v12621_v17, %s12444_s8 }
 0x24c   : > { %11497 = vrot.lane.b32.xlu1 %v12615_v16, %s12445_s16 }
 0x24f   : > { %2779 = vrot.lane.b32.xlu0 %v12845_v52, %s12444_s8 }
 0x250   : > { %2419 = vrot.lane.b32.xlu1 %v12853_v61, %s12442_s2 }
 0x253   : > { %11492 = vrot.lane.b32.xlu0 %v12621_v17, %s12445_s16 }
 0x254   : > { %11502 = vrot.lane.b32.xlu1 %v12604_v11, %s12446_s19 }
 0x257   : > { %2417 = vrot.lane.b32.xlu0 %v12840_v42, %s12442_s2 }
 0x258   : > { %2601 = vrot.lane.b32.xlu1 %v12853_v61, %s12443_s3 }
 0x25b   : > { %2961 = vrot.lane.b32.xlu0 %v12845_v52, %s12445_s16 }
 0x25c   : > { %11512 = vrot.lane.b32.xlu1 %v12615_v16, %s12446_s19 }
 0x25f   : > { %2599 = vrot.lane.b32.xlu0 %v12840_v42, %s12443_s3 }
 0x260   : > { %2783 = vrot.lane.b32.xlu1 %v12853_v61, %s12444_s8 }
 0x263   : > { %11507 = vrot.lane.b32.xlu0 %v12621_v17, %s12446_s19 }
 0x264   : > { %11517 = vrot.lane.b32.xlu1 %v12604_v11, %s12447_s20 }
 0x267   : > { %2781 = vrot.lane.b32.xlu0 %v12840_v42, %s12444_s8 }
 0x268   : > { %2965 = vrot.lane.b32.xlu1 %v12853_v61, %s12445_s16 }
 0x26b   : > { %3143 = vrot.lane.b32.xlu0 %v12845_v52, %s12446_s19 }
 0x26c   : > { %11527 = vrot.lane.b32.xlu1 %v12615_v16, %s12447_s20 }
 0x26f   : > { %2963 = vrot.lane.b32.xlu0 %v12840_v42, %s12445_s16 }
 0x270   : > { %3147 = vrot.lane.b32.xlu1 %v12853_v61, %s12446_s19 }
 0x273   : > { %11522 = vrot.lane.b32.xlu0 %v12621_v17, %s12447_s20 }
 0x274   : > { %11532 = vrot.lane.b32.xlu1 %v12604_v11, %s12448_s21  ;;  %v3675_v11 = vld [vmem:[%s12581_s18 + $0x10] sm:$0xff] }
 0x277   : > { %3145 = vrot.lane.b32.xlu0 %v12840_v42, %s12446_s19 }
 0x278   : > { %3329 = vrot.lane.b32.xlu1 %v12853_v61, %s12447_s20 }
 0x27b   : > { %3325 = vrot.lane.b32.xlu0 %v12845_v52, %s12447_s20 }
 0x27c   : > { %11542 = vrot.lane.b32.xlu1 %v12615_v16, %s12448_s21  ;;  %v11453_v16 = vpop.permute.xlu1 %11452 }
 0x27d   : > { %v11455_v30 = vunpack.i.h.bf16 %v11453_v16  ;;  %v11454_v31 = vunpack.i.l.bf16 %v11453_v16 }
 0x27f   : > { %3327 = vrot.lane.b32.xlu0 %v12840_v42, %s12447_s20  ;;  %v2423_v40 = vsel %vm811_vm3, %v11455_v30, %v11449_v27  ;;  %v9690_v27 = vld [vmem:[%s12556_s10 + $0x20] sm:$0xff] }
 0x280   : > { %3511 = vrot.lane.b32.xlu1 %v12853_v61, %s12448_s21  ;;  %v12931_v5 = vpop.permute.xlu1 %11457 }
 0x281   : > { %v11460_v37 = vunpack.i.h.bf16 %v12931_v5  ;;  %v11459_v47 = vunpack.i.l.bf16 %v12931_v5 }
 0x283   : > { %11537 = vrot.lane.b32.xlu0 %v12621_v17, %s12448_s21  ;;  %v10630_v46 = vpack.c.bf16 %v11465_v38, %v11460_v37  ;;  %v2604_v57 = vsel %vm983_vm5, %v11459_v47, %v11460_v37 }
 0x284   : > { %3678 = vperm.xlu1 %11546, %v3675_v11   ;;  %v12933_v7 = vpop.permute.xlu1 %11467  ;;  %v9687_v11 = vld [vmem:[%s12556_s10 + $0x18] sm:$0xff]  ;;  %v10625_v4 = vpack.c.bf16 %v2606_v58, %v2604_v57 }
 0x285   : > { %v11470_v51 = vunpack.i.h.bf16 %v12933_v7  ;;  %v11469_v54 = vunpack.i.l.bf16 %v12933_v7 }
 0x287   : > { %3509 = vrot.lane.b32.xlu0 %v12840_v42, %s12448_s21  ;;  %v2605_v59 = vsel %vm983_vm5, %v11470_v51, %v11464_v49  ;;  %v2603_v62 = vsel %vm983_vm5, %v11469_v54, %v11459_v47  ;;  %v9693_v49 = vld [vmem:[%s12556_s10 + $0x28] sm:$0xff] }
 0x288   : > { %v12937_v9 = vpop.permute.xlu1 %11472  ;;  %v10627_v8 = vpack.c.bf16 %v2605_v59, %v2603_v62 }
 0x289   : > { %v11475_v63 = vunpack.i.h.bf16 %v12937_v9  ;;  %v11474_v6 = vunpack.i.l.bf16 %v12937_v9 }
 0x28b   : > { %3507 = vrot.lane.b32.xlu0 %v12845_v52, %s12448_s21  ;;  %v2786_v19 = vsel %vm1155_vm6, %v11474_v6, %v11475_v63 }
 0x2ad   : > { %v2092_v17 = vpop.permute.xlu0 %2091 }
 0x2b1   : > { %v12939_v10 = vpop.permute.xlu0 %2415 }
 0x2b2   : > { %v2096_v13 = vpop.permute.xlu1 %2095 }
 0x2b3   : > { %10114 = vmatpush3.msra.mxu1 %v2096_v13 }
 0x2b4   : > { %10615 = vmatprep.subr.bf16.mxu1 %v12438_v15  ;;  %10116 = vmatmul.mubr.msk.f32.vlgmr.msra.gmra.mrb[18].mxu1 %vm2112_vm4, %v9679_v12 }
 0x2b5   : > { %v12944_v20 = vpop.permute.xlu0 %2597  ;;  %10617 = vmatpush3.bf16.msra.mxu1 %v12683_v45  ;;  %10124 = vmatprep.mubr.msk.f32.mxu1 %vm12441_vm1, %v12440_v18 }
 0x2b6   : > { %v12949_v21 = vpop.permute.xlu1 %11482  ;;  %10122 = vmatprep.subr.mxu1 %v12440_v18 }
 0x2b9   : > { %v2094_v25 = vpop.permute.xlu0 %2093  ;;  %10123 = vmatpush3.msra.mxu1 %v12853_v61 }
 0x2ba   : > { %v12954_v28 = vpop.permute.xlu1 %11487  ;;  %10622 = vmatprep.subr.bf16.mxu1 %v12438_v15  ;;  %v2102_v45 = vsel %vm497_vm2, %v2094_v25, %v2096_v13  ;;  %10125 = vmatmul.mubr.msk.f32.vlgmr.msra.gmra.mrb[20].mxu1 %vm2112_vm4, %v2067_v22  ;;  %v2101_v29 = vsel %vm497_vm2, %v2092_v17, %v2094_v25  ;;  %v11485_v17 = vunpack.i.h.bf16 %v12949_v21 }
 0x2bb   : > { %2120 = vmatprep.subr.mxu0 %v2102_v45  ;;  %10624 = vmatpush3.bf16.msra.mxu1 %v10623_v23 }
 0x2bc   : > { %2121 = vmatpush1.msra.mxu0 %v2101_v29  ;;  %10131 = vmatprep.subr.mxu1 %v12440_v18 }
 0x2bd   : > { %v12961_v32 = vpop.permute.xlu0 %11477  ;;  %9680 = vmatmul.mubr.msk.f32.vlgmr.msra.gmra.mrb[2].mxu0 %vm2112_vm4, %v9679_v12  ;;  %10612 = vmatprep.subr.bf16.mxu0 %v12679_v41  ;;  %v2421_v41 = vsel %vm811_vm3, %v11454_v31, %v11444_v26  ;;  %v11484_v12 = vunpack.i.l.bf16 %v12949_v21 }
 0x2be   : > { %v12965_v34 = vpop.permute.xlu1 %11497  ;;  %10614 = vmatpush1.bf16.msra.mxu0 %v12690_v48  ;;  %2324 = vmatprep.mubr.f32.mxu0 %v12440_v18  ;;  %v10620_v50 = vpack.c.bf16 %v2423_v40, %v2421_v41  ;;  %v11480_v56 = vunpack.i.h.bf16 %v12961_v32  ;;  %v11479_v16 = vunpack.i.l.bf16 %v12961_v32  ;;  %v11489_v32 = vunpack.i.l.bf16 %v12954_v28 }
 0x2bf   : > { %2264 = vmatprep.subr.mxu0 %v12840_v42  ;;  %10133 = vmatprep.mubr.msk.f32.mxu1 %vm12441_vm1, %v12440_v18  ;;  %v2785_v29 = vsel %vm1155_vm6, %v11484_v12, %v11474_v6  ;;  %v11499_v38 = vunpack.i.l.bf16 %v12965_v34 }
 0x2c0   : > { %v10637_v5 = vpack.c.bf16 %v11480_v56, %v11475_v63  ;;  %v2788_v13 = vsel %vm1155_vm6, %v11479_v16, %v11480_v56  ;;  %v2787_v23 = vsel %vm1155_vm6, %v11485_v17, %v11479_v16 }
 0x2c1   : > { %v12978_v48 = vpop.permute.xlu0 %2779  ;;  %v10632_v45 = vpack.c.bf16 %v2788_v13, %v2786_v19  ;;  %v10634_v36 = vpack.c.bf16 %v2787_v23, %v2785_v29  ;;  %v2967_v51 = vsel %vm1327_vm7, %v11499_v38, %v11489_v32 }
 0x2c2   : > { %v2420_v44 = vpop.permute.xlu1 %2419  ;;  %2265 = vmatpush1.msra.mxu0 %v12845_v52 }
 0x2c3   : > { %10619 = vmatprep.subr.bf16.mxu0 %v10618_v43  ;;  %10132 = vmatpush3.msra.mxu1 %v2420_v44 }
 0x2c4   : > { %10629 = vmatprep.subr.bf16.mxu1 %v12438_v15  ;;  %10134 = vmatmul.mubr.msk.f32.vlgmr.msra.gmra.mrb[22].mxu1 %vm2112_vm4, %v9684_v0 }
 0x2c5   : > { %v12987_v53 = vpop.permute.xlu0 %11492  ;;  %9682 = vmatmul.mubr.msk.f32.vlgmr.msra.gmra.mrb[2].mxu0 %vm2112_vm4, %v2067_v22  ;;  %10631 = vmatpush3.bf16.msra.mxu1 %v10630_v46  ;;  %v11490_v22 = vunpack.i.h.bf16 %v12954_v28 }
 0x2c6   : > { %10621 = vmatpush1.bf16.msra.mxu0 %v10620_v50  ;;  %v12991_v55 = vpop.permute.xlu1 %11502  ;;  %10140 = vmatprep.subr.mxu1 %v12440_v18  ;;  %v11495_v9 = vunpack.i.h.bf16 %v12987_v53  ;;  %v11494_v30 = vunpack.i.l.bf16 %v12987_v53 }
 0x2c7   : > { %10142 = vmatprep.mubr.msk.f32.mxu1 %vm12441_vm1, %v12440_v18  ;;  %2503 = vmatprep.mubr.f32.mxu0 %v12440_v18  ;;  %v2968_v43 = vsel %vm1327_vm7, %v11489_v32, %v11490_v22  ;;  %v11504_v58 = vunpack.i.l.bf16 %v12991_v55 }
 0x2c8   : > { %v10644_v31 = vpack.c.bf16 %v11495_v9, %v11490_v22  ;;  %v2970_v28 = vsel %vm1327_vm7, %v11494_v30, %v11495_v9 }
 0x2c9   : > { %v2418_v60 = vpop.permute.xlu0 %2417  ;;  %v10639_v50 = vpack.c.bf16 %v2970_v28, %v2968_v43 }
 0x2ca   : > { %v2602_v1 = vpop.permute.xlu1 %2601  ;;  %v2426_v2 = vsel %vm811_vm3, %v2418_v60, %v2420_v44  ;;  %v2425_v3 = vsel %vm811_vm3, %v12939_v10, %v2418_v60  ;;  %v11505_v44 = vunpack.i.h.bf16 %v12991_v55  ;;  %v9696_v55 = vld [vmem:[%s12556_s10 + $0x30] sm:$0xff] }
 0x2cb   : > { %2443 = vmatprep.subr.mxu0 %v2426_v2  ;;  %10141 = vmatpush3.msra.mxu1 %v2602_v1 }
 0x2cc   : > { %2444 = vmatpush1.msra.mxu0 %v2425_v3  ;;  %10636 = vmatprep.subr.bf16.mxu1 %v12438_v15 }
 0x2cd   : > { %v13010_v7 = vpop.permute.xlu0 %2961  ;;  %10626 = vmatprep.subr.bf16.mxu0 %v10625_v4  ;;  %10143 = vmatmul.mubr.msk.f32.vlgmr.msra.gmra.mrb[24].mxu1 %vm2112_vm4, %v9687_v11  ;;  %v3150_v4 = vsel %vm1499_vm8, %v11504_v58, %v11505_v44 }
 0x2ce   : > { %10638 = vmatpush3.bf16.msra.mxu1 %v10637_v5  ;;  %v13014_v10 = vpop.permute.xlu1 %11512  ;;  %9685 = vmatmul.mubr.msk.f32.vlgmr.msra.gmra.mrb[2].mxu0 %vm2112_vm4, %v9684_v0 }
 0x2cf   : > { %10628 = vmatpush1.bf16.msra.mxu0 %v10627_v8  ;;  %10149 = vmatprep.subr.mxu1 %v12440_v18  ;;  %v11514_v60 = vunpack.i.l.bf16 %v13014_v10 }
 0x2d0   : > { %10151 = vmatprep.mubr.msk.f32.mxu1 %vm12441_vm1, %v12440_v18  ;;  %2685 = vmatprep.mubr.f32.mxu0 %v12440_v18 }
 0x2d1   : > { %v2600_v14 = vpop.permute.xlu0 %2599  ;;  %v3149_v5 = vsel %vm1499_vm8, %v11514_v60, %v11504_v58 }
 0x2d2   : > { %v2784_v25 = vpop.permute.xlu1 %2783  ;;  %v2608_v26 = vsel %vm983_vm5, %v2600_v14, %v2602_v1  ;;  %v2607_v21 = vsel %vm983_vm5, %v12944_v20, %v2600_v14  ;;  %v11500_v20 = vunpack.i.h.bf16 %v12965_v34 }
 0x2d3   : > { %2625 = vmatprep.subr.mxu0 %v2608_v26  ;;  %10150 = vmatpush3.msra.mxu1 %v2784_v25 }
 0x2d4   : > { %2626 = vmatpush1.msra.mxu0 %v2607_v21  ;;  %10643 = vmatprep.subr.bf16.mxu1 %v12438_v15  ;;  %v2969_v0 = vsel %vm1327_vm7, %v11500_v20, %v11494_v30 }
 0x2d5   : > { %v11508_v35 = vpop.permute.xlu0 %11507  ;;  %10633 = vmatprep.subr.bf16.mxu0 %v10632_v45  ;;  %10152 = vmatmul.mubr.msk.f32.vlgmr.msra.gmra.mrb[26].mxu1 %vm2112_vm4, %v9690_v27  ;;  %v10641_v57 = vpack.c.bf16 %v2969_v0, %v2967_v51 }
 0x2d6   : > { %10645 = vmatpush3.bf16.msra.mxu1 %v10644_v31  ;;  %v13037_v37 = vpop.permute.xlu1 %11517  ;;  %9688 = vmatmul.mubr.msk.f32.vlgmr.msra.gmra.mrb[2].mxu0 %vm2112_vm4, %v9687_v11  ;;  %v11510_v41 = vunpack.i.h.bf16 %v11508_v35  ;;  %v11509_v53 = vunpack.i.l.bf16 %v11508_v35  ;;  %v9699_v31 = vld [vmem:[%s12556_s10 + $0x38] sm:$0xff] }
 0x2d7   : > { %10635 = vmatpush1.bf16.msra.mxu0 %v10634_v36  ;;  %10158 = vmatprep.subr.mxu1 %v12440_v18  ;;  %v11520_v6 = vunpack.i.h.bf16 %v13037_v37 }
 0x2d8   : > { %10160 = vmatprep.mubr.msk.f32.mxu1 %vm12441_vm1, %v12440_v18  ;;  %2867 = vmatprep.mubr.f32.mxu0 %v12440_v18  ;;  %v10651_v54 = vpack.c.bf16 %v11510_v41, %v11505_v44  ;;  %v3152_v62 = vsel %vm1499_vm8, %v11509_v53, %v11510_v41 }
 0x2d9   : > { %v2782_v40 = vpop.permute.xlu0 %2781  ;;  %v10646_v16 = vpack.c.bf16 %v3152_v62, %v3150_v4 }
 0x2da   : > { %v2966_v46 = vpop.permute.xlu1 %2965  ;;  %v2790_v47 = vsel %vm1155_vm6, %v2782_v40, %v2784_v25  ;;  %v2789_v34 = vsel %vm1155_vm6, %v12978_v48, %v2782_v40  ;;  %v11515_v48 = vunpack.i.h.bf16 %v13014_v10  ;;  %v11519_v10 = vunpack.i.l.bf16 %v13037_v37 }
 0x2db   : > { %2807 = vmatprep.subr.mxu0 %v2790_v47  ;;  %10159 = vmatpush3.msra.mxu1 %v2966_v46 }
 0x2dc   : > { %2808 = vmatpush1.msra.mxu0 %v2789_v34  ;;  %10650 = vmatprep.subr.bf16.mxu1 %v12438_v15  ;;  %v3151_v1 = vsel %vm1499_vm8, %v11515_v48, %v11509_v53  ;;  %v9702_v48 = vld [vmem:[%s12556_s10 + $0x40] sm:$0xff] }
 0x2dd   : > { %v3144_v56 = vpop.permute.xlu0 %3143  ;;  %10640 = vmatprep.subr.bf16.mxu0 %v10639_v50  ;;  %10161 = vmatmul.mubr.msk.f32.vlgmr.msra.gmra.mrb[28].mxu1 %vm2112_vm4, %v9693_v49  ;;  %v10648_v17 = vpack.c.bf16 %v3151_v1, %v3149_v5 }
 0x2de   : > { %10652 = vmatpush3.bf16.msra.mxu1 %v10651_v54  ;;  %v11528_v59 = vpop.permute.xlu1 %11527  ;;  %9691 = vmatmul.mubr.msk.f32.vlgmr.msra.gmra.mrb[2].mxu0 %vm2112_vm4, %v9690_v27  ;;  %v3332_v27 = vsel %vm1671_vm9, %v11519_v10, %v11520_v6 }
 0x2df   : > { %10642 = vmatpush1.bf16.msra.mxu0 %v10641_v57  ;;  %10167 = vmatprep.subr.mxu1 %v12440_v18  ;;  %v11529_v14 = vunpack.i.l.bf16 %v11528_v59 }
 0x2e0   : > { %10169 = vmatprep.mubr.msk.f32.mxu1 %vm12441_vm1, %v12440_v18  ;;  %3049 = vmatprep.mubr.f32.mxu0 %v12440_v18 }
 0x2e1   : > { %v2964_v63 = vpop.permute.xlu0 %2963  ;;  %v3331_v30 = vsel %vm1671_vm9, %v11529_v14, %v11519_v10 }
 0x2e2   : > { %v3148_v2 = vpop.permute.xlu1 %3147  ;;  %v2972_v3 = vsel %vm1327_vm7, %v2964_v63, %v2966_v46  ;;  %v2971_v11 = vsel %vm1327_vm7, %v13010_v7, %v2964_v63  ;;  %v11530_v7 = vunpack.i.h.bf16 %v11528_v59 }
 0x2e3   : > { %2989 = vmatprep.subr.mxu0 %v2972_v3  ;;  %10168 = vmatpush3.msra.mxu1 %v3148_v2 }
 0x2e4   : > { %2990 = vmatpush1.msra.mxu0 %v2971_v11  ;;  %10170 = vmatmul.mubr.msk.f32.vlgmr.msra.gmra.mrb[30].mxu1 %vm2112_vm4, %v9696_v55 }
 0x2e5   : > { %v11523_v8 = vpop.permute.xlu0 %11522  ;;  %10647 = vmatprep.subr.bf16.mxu0 %v10646_v16  ;;  %10657 = vmatprep.subr.bf16.mxu1 %v12438_v15 }
 0x2e6   : > { %v11525_v12 = vunpack.i.h.bf16 %v11523_v8  ;;  %v11524_v9 = vunpack.i.l.bf16 %v11523_v8  ;;  %v11533_v13 = vpop.permute.xlu1 %11532  ;;  %9694 = vmatmul.mubr.msk.f32.vlgmr.msra.gmra.mrb[2].mxu0 %vm2112_vm4, %v9693_v49  ;;  %10178 = vmatprep.mubr.msk.f32.mxu1 %vm12441_vm1, %v12440_v18 }
 0x2e7   : > { %10649 = vmatpush1.bf16.msra.mxu0 %v10648_v17  ;;  %3231 = vmatprep.mubr.f32.mxu0 %v12440_v18  ;;  %v11535_v41 = vunpack.i.h.bf16 %v11533_v13  ;;  %v11534_v28 = vunpack.i.l.bf16 %v11533_v13 }
 0x2e8   : > { %v10658_v19 = vpack.c.bf16 %v11525_v12, %v11520_v6  ;;  %v3334_v22 = vsel %vm1671_vm9, %v11524_v9, %v11525_v12  ;;  %v3333_v25 = vsel %vm1671_vm9, %v11530_v7, %v11524_v9 }
 0x2e9   : > { %v3146_v23 = vpop.permute.xlu0 %3145  ;;  %v10653_v29 = vpack.c.bf16 %v3334_v22, %v3332_v27  ;;  %v10655_v35 = vpack.c.bf16 %v3333_v25, %v3331_v30  ;;  %v3514_v47 = vsel %vm1843_vm10, %v11534_v28, %v11535_v41 }
 0x2ea   : > { %10659 = vmatpush3.bf16.msra.mxu1 %v10658_v19  ;;  %v3154_v26 = vsel %vm1499_vm8, %v3146_v23, %v3148_v2  ;;  %v3153_v21 = vsel %vm1499_vm8, %v3144_v56, %v3146_v23  ;;  %v3330_v45 = vpop.permute.xlu1 %3329 }
 0x2eb   : > { %3171 = vmatprep.subr.mxu0 %v3154_v26  ;;  %10176 = vmatprep.subr.mxu1 %v12440_v18 }
 0x2ec   : > { %3172 = vmatpush1.msra.mxu0 %v3153_v21 }
 0x2ed   : > { %v3326_v32 = vpop.permute.xlu0 %3325  ;;  %10654 = vmatprep.subr.bf16.mxu0 %v10653_v29 }
 0x2ee   : > { %9697 = vmatmul.mubr.msk.f32.vlgmr.msra.gmra.mrb[2].mxu0 %vm2112_vm4, %v9696_v55  ;;  %10177 = vmatpush3.msra.mxu1 %v3330_v45  ;;  %v11543_v36 = vpop.permute.xlu1 %11542 }
 0x2ef   : > { %10656 = vmatpush1.bf16.msra.mxu0 %v10655_v35  ;;  %10179 = vmatmul.mubr.msk.f32.vlgmr.msra.gmra.mrb[32].mxu1 %vm2112_vm4, %v9699_v31  ;;  %v11545_v40 = vunpack.i.h.bf16 %v11543_v36  ;;  %v11544_v43 = vunpack.i.l.bf16 %v11543_v36 }
 0x2f0   : > { %3413 = vmatprep.mubr.f32.mxu0 %v12440_v18  ;;  %10664 = vmatprep.subr.bf16.mxu1 %v12438_v15 }
 0x2f1   : > { %v3328_v20 = vpop.permute.xlu0 %3327  ;;  %10187 = vmatprep.mubr.msk.f32.mxu1 %vm12441_vm1, %v12440_v18  ;;  %v3513_v34 = vsel %vm1843_vm10, %v11544_v43, %v11534_v28  ;;  %v13115_v43 = vld [vmem:[#allocation2 + $0x10] sm:$0xff] }
 0x2f2   : > { %v3336_v37 = vsel %vm1671_vm9, %v3328_v20, %v3330_v45  ;;  %v3335_v38 = vsel %vm1671_vm9, %v3326_v32, %v3328_v20  ;;  %v3512_v57 = vpop.permute.xlu1 %3511 }
 0x2f3   : > { %3353 = vmatprep.subr.mxu0 %v3336_v37 }
 0x2f4   : > { %3354 = vmatpush1.msra.mxu0 %v3335_v38 }
 0x2f5   : > { %v11538_v0 = vpop.permute.xlu0 %11537 }
 0x2f6   : > { %v11540_v44 = vunpack.i.h.bf16 %v11538_v0  ;;  %v11539_v46 = vunpack.i.l.bf16 %v11538_v0  ;;  %9700 = vmatmul.mubr.msk.f32.vlgmr.msra.gmra.mrb[2].mxu0 %vm2112_vm4, %v9699_v31 }
 0x2f7   : > { %3595 = vmatprep.mubr.f32.mxu0 %v12440_v18 }
 0x2f8   : > { %v3515_v49 = vsel %vm1843_vm10, %v11545_v40, %v11539_v46  ;;  %v10665_v50 = vpack.c.bf16 %v11540_v44, %v11535_v41  ;;  %v3516_v51 = vsel %vm1843_vm10, %v11539_v46, %v11540_v44  ;;  %v13113_v40 = vld [vmem:[#allocation2 + $0x8] sm:$0xff]  ;;  %v13120_v46 = vld [vmem:[#allocation2 + $0x20] sm:$0xff] }
 0x2f9   : > { %v3510_v53 = vpop.permute.xlu0 %3509  ;;  %v10660_v54 = vpack.c.bf16 %v3516_v51, %v3514_v47  ;;  %v10662_v56 = vpack.c.bf16 %v3515_v49, %v3513_v34  ;;  %v13122_v47 = vld [vmem:[#allocation2 + $0x28] sm:$0xff]  ;;  %v13126_v34 = vpack.i.bf16 %v13115_v43, %v13113_v40  ;;  %v13131_v51 = vld [vmem:[#allocation2 + $0x18] sm:$0xff] }
 0x2fa   : > { %10666 = vmatpush3.bf16.msra.mxu1 %v10665_v50  ;;  %v3518_v58 = vsel %vm1843_vm10, %v3510_v53, %v3512_v57  ;;  %v13129_v50 = vld [vmem:[#allocation2] sm:$0xff] }
 0x2fb   : > { %10661 = vmatprep.subr.bf16.mxu0 %v10660_v54  ;;  %10185 = vmatprep.subr.mxu1 %v12440_v18  ;;  %v13142_v54 = vpack.i.bf16 %v13131_v51, %v13129_v50 }
 0x2fc   : > { %10663 = vmatpush1.bf16.msra.mxu0 %v10662_v56  ;;  %v13150_v56 = vpack.i.bf16 %v12853_v61, %v12840_v42 }
 0x2fd   : > { %v3508_v59 = vpop.permute.xlu0 %3507  ;;  %3535 = vmatprep.subr.mxu0 %v3518_v58 }
 0x2fe   : > { %v3517_v60 = vsel %vm1843_vm10, %v3508_v59, %v3510_v53  ;;  %10186 = vmatpush3.msra.mxu1 %v3512_v57  ;;  %v13136_v53 = vpack.i.bf16 %v13122_v47, %v13120_v46 }
 0x2ff   : > { %10188 = vmatmul.mubr.msk.f32.vlgmr.msra.gmra.mrb[34].mxu1 %vm2112_vm4, %v9702_v48  ;;  %10675 = vmatprep.subr.bf16.mxu1 %v12438_v15 }
 0x300   : > { %3536 = vmatpush1.msra.mxu0 %v3517_v60  ;;  %10198 = vmatprep.mubr.msk.f32.mxu1 %vm12441_vm1, %v12440_v18 }
 0x301   : > { %9703 = vmatmul.mubr.msk.f32.vlgmr.msra.gmra.mrb[2].mxu0 %vm2112_vm4, %v9702_v48  ;;  %vm3784_vm4 = vcmask 261120  }
 0x302   : > { %3852 = vmatprep.mubr.f32.mxu0 %v12440_v18 }
 0x303   : > { %v3679_v21 = vpop.permute.xlu1 %3678 }
 0x387   : > { %v2253_v62 = vpop.f32.mrb[18].mxu1 }
 0x388   : > { %v10117_v63 = vpop.f32.mrb[19].mxu1 }
 0x38d   : > { %v2397_v55 = vpop.f32.mrb[20].mxu1 }
 0x38e   : > { %v2398_v1 = vadd.f32 %v2397_v55, %v2253_v62  ;;  %v10126_v2 = vpop.f32.mrb[21].mxu1 }
 0x397   : > { %v2576_v3 = vpop.f32.mrb[22].mxu1 }
 0x398   : > { %v2582_v11 = vadd.f32 %v2576_v3, %v2398_v1  ;;  %v10135_v4 = vpop.f32.mrb[23].mxu1 }
 0x3a0   : > { %v2758_v16 = vpop.f32.mrb[24].mxu1 }
 0x3a1   : > { %v2764_v5 = vadd.f32 %v2758_v16, %v2582_v11  ;;  %v10144_v6 = vpop.f32.mrb[25].mxu1 }
 0x3a8   : > { %v2940_v8 = vpop.f32.mrb[26].mxu1 }
 0x3a9   : > { %v2946_v17 = vadd.f32 %v2940_v8, %v2764_v5  ;;  %v10153_v10 = vpop.f32.mrb[27].mxu1 }
 0x3b0   : > { %v3122_v7 = vpop.f32.mrb[28].mxu1 }
 0x3b1   : > { %v3128_v12 = vadd.f32 %v3122_v7, %v2946_v17  ;;  %v10162_v9 = vpop.f32.mrb[29].mxu1 }
 0x3b7   : > { %v3304_v13 = vpop.f32.mrb[30].mxu1 }
 0x3b8   : > { %v3310_v14 = vadd.f32 %v3304_v13, %v3128_v12  ;;  %v10171_v19 = vpop.f32.mrb[31].mxu1 }
 0x3c2   : > { %v3486_v22 = vpop.f32.mrb[32].mxu1 }
 0x3c3   : > { %v3492_v23 = vadd.f32 %v3486_v22, %v3310_v14  ;;  %v10180_v25 = vpop.f32.mrb[33].mxu1  ;;  %v13198_v14 = vld [vmem:[#allocation2 + $0x30] sm:$0xff] }
 0x3d2   : > { %v3668_v26 = vpop.f32.mrb[34].mxu1 }
 0x3d3   : > { %v3674_v27 = vadd.f32 %v3668_v26, %v3492_v23  ;;  %v10189_v45 = vpop.f32.mrb[35].mxu1 }
 0x3d4   : > { %v3597_v29 = vpop.f32.mrb[2].mxu0 }
 0x3d5   : > { %v3683_v30 = vadd.f32 %v3679_v21, %v3674_v27  ;;  %v3681_v31 = vadd.f32 %v3679_v21, %v3597_v29  ;;  %v3599_v32 = vpop.f32.mrb[3].mxu0 }
 0x3d6   : > { %v3682_v35 = vadd.f32 %v3679_v21, %v3599_v32  ;;  %v13212_v21 = vld [vmem:[#allocation2 + $0x30] sm:$0xff] }
 0x3d7   : > { %vm3684_vm11 = vcmp.ge.f32.partialorder %v3681_v31, 0.0  ;;  %v3687_v36 = vmul.f32 0.2, %v3681_v31  ;;  %v3689_v20 = vmul.f32 0.2, %v3683_v30  ;;  %vm3686_vm13 = vcmp.ge.f32.partialorder %v3683_v30, 0.0 }
 0x3d8   : > { %vm3685_vm12 = vcmp.ge.f32.partialorder %v3682_v35, 0.0  ;;  %v3688_v37 = vmul.f32 0.2, %v3682_v35 }
 0x3d9   : > { %v3690_v38 = vsel %vm3684_vm11, %v3681_v31, %v3687_v36  ;;  %v3692_v44 = vsel %vm3686_vm13, %v3683_v30, %v3689_v20  ;;  %v5424_v30 = vld [vmem:[%s12581_s18 + $0x20] sm:$0xff] }
 0x3da   : > { %v3693_v41 = vmul.f32 %v3690_v38, %v12815_v33  ;;  %v3691_v28 = vsel %vm3685_vm12, %v3682_v35, %v3688_v37  ;;  %v3695_v49 = vmul.f32 %v3692_v44, %v12804_v24 }
 0x3db   : > { %v3694_v0 = vmul.f32 %v3691_v28, %v12819_v39 }
 0x3dc   : > { %3699 = vrot.lane.b32.xlu0 %v3693_v41, %s12450_s25 }
 0x3dd   : > { %3701 = vrot.lane.b32.xlu1 %v3694_v0, %s12450_s25 }
 0x3e0   : > { %3703 = vrot.lane.b32.xlu0 %v3695_v49, %s12450_s25 }
 0x3e1   : > { %11548 = vrot.lane.b32.xlu1 %v13126_v34, %s12439_s1 }
 0x3e4   : > { %11553 = vrot.lane.b32.xlu0 %v13136_v53, %s12439_s1 }
 0x3e5   : > { %11558 = vrot.lane.b32.xlu1 %v13142_v54, %s12439_s1 }
 0x3e8   : > { %11563 = vrot.lane.b32.xlu0 %v13150_v56, %s12439_s1 }
 0x3e9   : > { %11568 = vrot.lane.b32.xlu1 %v13126_v34, %s12442_s2 }
 0x3ec   : > { %11573 = vrot.lane.b32.xlu0 %v13136_v53, %s12442_s2 }
 0x3ed   : > { %11578 = vrot.lane.b32.xlu1 %v13142_v54, %s12442_s2 }
 0x3f0   : > { %11583 = vrot.lane.b32.xlu0 %v13150_v56, %s12442_s2 }
 0x3f1   : > { %11588 = vrot.lane.b32.xlu1 %v13126_v34, %s12443_s3 }
 0x3f4   : > { %11593 = vrot.lane.b32.xlu0 %v13136_v53, %s12443_s3 }
 0x3f5   : > { %11598 = vrot.lane.b32.xlu1 %v13142_v54, %s12443_s3 }
 0x3f8   : > { %11603 = vrot.lane.b32.xlu0 %v13150_v56, %s12443_s3 }
 0x3f9   : > { %11608 = vrot.lane.b32.xlu1 %v13126_v34, %s12444_s8 }
 0x3fc   : > { %11613 = vrot.lane.b32.xlu0 %v13136_v53, %s12444_s8 }
 0x44e   : > { %v3700_v42 = vpop.permute.xlu0 %3699 }
 0x44f   : > { %3710 = vst.msk [vmem:[#allocation2 + $0x48] sm:$0xff] %vm2053_vm14, %v3700_v42  ;;  %v3702_v61 = vpop.permute.xlu1 %3701 }
 0x450   : > { %v13176_v57 = vsel %vm2047_vm15, %v3700_v42, %v3702_v61 }
 0x451   : > { %3711 = vst [vmem:[#allocation2 + $0x50] sm:$0xff] %v13176_v57 }
 0x452   : > { %v3704_v58 = vpop.permute.xlu0 %3703 }
 0x453   : > { %v3706_v48 = vsel %vm2047_vm15, %v3702_v61, %v3704_v58  ;;  %v11549_v59 = vpop.permute.xlu1 %11548 }
 0x454   : > { %3712 = vst.msk [vmem:[#allocation2 + $0x58] sm:$0xff] %vm2056_vm0, %v3706_v48  ;;  %v11551_v60 = vunpack.i.h.bf16 %v11549_v59  ;;  %v11550_v62 = vunpack.i.l.bf16 %v11549_v59 }
 0x456   : > { %v11554_v63 = vpop.permute.xlu0 %11553  ;;  %v13181_v55 = vld [vmem:[#allocation2 + $0x48] sm:$0xff]  ;;  %v3765_v4 = vsel %vm497_vm2, %v11550_v62, %v11551_v60 }
 0x457   : > { %v11556_v1 = vunpack.i.h.bf16 %v11554_v63  ;;  %v11555_v2 = vunpack.i.l.bf16 %v11554_v63  ;;  %v11617_v3 = vpack.i.bf16 %v13181_v55, %v12845_v52  ;;  %v11559_v11 = vpop.permute.xlu1 %11558  ;;  %v13192_v52 = vld [vmem:[#allocation2 + $0x48] sm:$0xff] }
 0x458   : > { %v11561_v16 = vunpack.i.h.bf16 %v11559_v11  ;;  %v11560_v5 = vunpack.i.l.bf16 %v11559_v11  ;;  %v13203_v19 = vpack.i.bf16 %v13192_v52, %v13198_v14  ;;  %v10813_v22 = vpack.c.bf16 %v13192_v52, %v13198_v14  ;;  %v13210_v25 = vld [vmem:[#allocation2 + $0x48] sm:$0xff]  ;;  %v7315_v26 = vld [vmem:[#allocation2 + $0x50] sm:$0xff] }
 0x459   : > { %11618 = vrot.lane.b32.xlu0 %v11617_v3, %s12439_s1  ;;  %v10676_v6 = vpack.c.bf16 %v11556_v1, %v11551_v60  ;;  %v3767_v8 = vsel %vm497_vm2, %v11555_v2, %v11556_v1  ;;  %v13218_v27 = vpack.i.bf16 %v13210_v25, %v13212_v21  ;;  %v10949_v29 = vpack.c.bf16 %v13210_v25, %v13212_v21 }
 0x45a   : > { %v3766_v17 = vsel %vm497_vm2, %v11561_v16, %v11555_v2  ;;  %v3764_v10 = vsel %vm497_vm2, %v11560_v5, %v11550_v62  ;;  %v10667_v7 = vpack.c.bf16 %v3767_v8, %v3765_v4  ;;  %v11564_v31 = vpop.permute.xlu0 %11563  ;;  %v10681_v16 = vpack.c.bf16 %v13120_v46, %v13113_v40  ;;  %v9705_v5 = vld [vmem:[%s12561_s12 + $0x8] sm:$0xff] }
 0x45b   : > { %v13190_v12 = vld [vmem:[#allocation2 + $0x58] sm:$0xff]  ;;  %10677 = vmatpush3.bf16.msra.mxu1 %v10676_v6  ;;  %v10669_v9 = vpack.c.bf16 %v3766_v17, %v3764_v10  ;;  %v13271_v35 = vpop.permute.xlu1 %11568  ;;  %v11566_v49 = vunpack.i.h.bf16 %v11564_v31  ;;  %v10690_v6 = vpack.c.bf16 %v13122_v47, %v13115_v43  ;;  %v10683_v40 = vpack.c.bf16 %v13131_v51, %v13129_v50 }
 0x45c   : > { %v11632_v13 = vpack.i.bf16 %v13190_v12, %v13176_v57  ;;  %10668 = vmatprep.subr.bf16.mxu0 %v10667_v7  ;;  %10678 = vmatprep.subr.bf16.mxu1 %v12438_v15  ;;  %v7316_v23 = vld [vmem:[#allocation2 + $0x58] sm:$0xff]  ;;  %v11571_v10 = vunpack.i.h.bf16 %v13271_v35  ;;  %v11570_v7 = vunpack.i.l.bf16 %v13271_v35 }
 0x45d   : > { %11623 = vrot.lane.b32.xlu0 %v11617_v3, %s12442_s2  ;;  %10670 = vmatpush1.bf16.msra.mxu0 %v10669_v9  ;;  %v13220_v45 = vpack.i.bf16 %v7316_v23, %v7315_v26 }
 0x45e   : > { %11633 = vrot.lane.b32.xlu1 %v11632_v13, %s12439_s1  ;;  %v13269_v32 = vpop.permute.xlu0 %11573  ;;  %v4100_v50 = vsel %vm811_vm3, %v11570_v7, %v11571_v10 }
 0x45f   : > { %v13275_v20 = vpop.permute.xlu1 %11578  ;;  %v11576_v8 = vunpack.i.h.bf16 %v13269_v32  ;;  %v11575_v17 = vunpack.i.l.bf16 %v13269_v32 }
 0x460   : > { %v11581_v43 = vunpack.i.h.bf16 %v13275_v20  ;;  %v11580_v47 = vunpack.i.l.bf16 %v13275_v20  ;;  %v12389_v20 = vld [vmem:[#allocation2 + $0x30] sm:$0xff] }
 0x461   : > { %11628 = vrot.lane.b32.xlu0 %v11617_v3, %s12443_s3  ;;  %v4102_v51 = vsel %vm811_vm3, %v11575_v17, %v11576_v8 }
 0x462   : > { %11638 = vrot.lane.b32.xlu1 %v13142_v54, %s12444_s8  ;;  %v13273_v36 = vpop.permute.xlu0 %11583 }
 0x463   : > { %v13279_v38 = vpop.permute.xlu1 %11588  ;;  %v11586_v32 = vunpack.i.h.bf16 %v13273_v36  ;;  %v11585_v35 = vunpack.i.l.bf16 %v13273_v36 }
 0x464   : > { %v11590_v36 = vunpack.i.l.bf16 %v13279_v38 }
 0x465   : > { %11643 = vrot.lane.b32.xlu0 %v13150_v56, %s12444_s8 }
 0x466   : > { %11653 = vrot.lane.b32.xlu1 %v13126_v34, %s12445_s16  ;;  %v13277_v37 = vpop.permute.xlu0 %11593 }
 0x467   : > { %v13285_v0 = vpop.permute.xlu1 %11598 }
 0x469   : > { %11648 = vrot.lane.b32.xlu0 %v11617_v3, %s12444_s8 }
 0x46a   : > { %11663 = vrot.lane.b32.xlu1 %v13142_v54, %s12445_s16  ;;  %v13281_v41 = vpop.permute.xlu0 %11603 }
 0x46b   : > { %v13287_v44 = vpop.permute.xlu1 %11608 }
 0x46d   : > { %11658 = vrot.lane.b32.xlu0 %v13136_v53, %s12445_s16 }
 0x46e   : > { %11678 = vrot.lane.b32.xlu1 %v11632_v13, %s12442_s2  ;;  %v13283_v28 = vpop.permute.xlu0 %11613 }
 0x471   : > { %11668 = vrot.lane.b32.xlu0 %v13150_v56, %s12445_s16 }
 0x472   : > { %11683 = vrot.lane.b32.xlu1 %v13126_v34, %s12446_s19 }
 0x475   : > { %11673 = vrot.lane.b32.xlu0 %v11617_v3, %s12445_s16 }
 0x476   : > { %11693 = vrot.lane.b32.xlu1 %v11632_v13, %s12443_s3 }
 0x479   : > { %11688 = vrot.lane.b32.xlu0 %v13136_v53, %s12446_s19 }
 0x47a   : > { %11698 = vrot.lane.b32.xlu1 %v13142_v54, %s12446_s19 }
 0x47d   : > { %11703 = vrot.lane.b32.xlu0 %v13150_v56, %s12446_s19 }
 0x47e   : > { %11713 = vrot.lane.b32.xlu1 %v11632_v13, %s12444_s8 }
 0x481   : > { %11708 = vrot.lane.b32.xlu0 %v11617_v3, %s12446_s19 }
 0x482   : > { %11718 = vrot.lane.b32.xlu1 %v13126_v34, %s12447_s20 }
 0x485   : > { %11723 = vrot.lane.b32.xlu0 %v13136_v53, %s12447_s20 }
 0x486   : > { %11728 = vrot.lane.b32.xlu1 %v11632_v13, %s12445_s16 }
 0x489   : > { %11738 = vrot.lane.b32.xlu0 %v13150_v56, %s12447_s20 }
 0x48a   : > { %11733 = vrot.lane.b32.xlu1 %v13142_v54, %s12447_s20 }
 0x48d   : > { %11743 = vrot.lane.b32.xlu0 %v11617_v3, %s12447_s20 }
 0x48e   : > { %11748 = vrot.lane.b32.xlu1 %v11632_v13, %s12446_s19 }
 0x491   : > { %11758 = vrot.lane.b32.xlu0 %v13136_v53, %s12448_s21  ;;  %v11565_v53 = vunpack.i.l.bf16 %v11564_v31 }
 0x492   : > { %11753 = vrot.lane.b32.xlu1 %v13126_v34, %s12448_s21 }
 0x493   : > { %v3769_v59 = vsel %vm497_vm2, %v11565_v53, %v11566_v49 }
 0x495   : > { %11773 = vrot.lane.b32.xlu0 %v13150_v56, %s12448_s21 }
 0x496   : > { %11763 = vrot.lane.b32.xlu1 %v11632_v13, %s12447_s20 }
 0x499   : > { %11783 = vrot.lane.b32.xlu0 %v11617_v3, %s12448_s21 }
 0x49a   : > { %11768 = vrot.lane.b32.xlu1 %v13142_v54, %s12448_s21 }
 0x49e   : > { %11778 = vrot.lane.b32.xlu1 %v11632_v13, %s12448_s21  ;;  %v12387_v13 = vld [vmem:[#allocation2 + $0x38] sm:$0xff] }
 0x49f   : > { %v10685_v23 = vpack.c.bf16 %v13176_v57, %v12387_v13 }
 0x4a2   : > { %5427 = vperm.xlu1 %11546, %v5424_v30   ;;  %v12388_v30 = vld [vmem:[#allocation2 + $0x40] sm:$0xff] }
 0x4a3   : > { %v10693_v31 = vpack.c.bf16 %v13190_v12, %v12388_v30  ;;  %v9710_v30 = vld [vmem:[%s12561_s12 + $0x10] sm:$0xff] }
 0x4cb   : > { %v11619_v34 = vpop.permute.xlu0 %11618 }
 0x4cc   : > { %v11620_v54 = vunpack.i.l.bf16 %v11619_v34  ;;  %v11621_v61 = vunpack.i.h.bf16 %v11619_v34  ;;  %v10687_v34 = vpack.c.bf16 %v13181_v55, %v12389_v20  ;;  %v10704_v55 = vpack.c.bf16 %v11576_v8, %v11571_v10 }
 0x4cd   : > { %v11610_v20 = vunpack.i.l.bf16 %v13287_v44 }
 0x4ce   : > { %v3768_v60 = vsel %vm497_vm2, %v11620_v54, %v11565_v53  ;;  %v4099_v53 = vsel %vm811_vm3, %v11580_v47, %v11570_v7  ;;  %v11591_v54 = vunpack.i.h.bf16 %v13279_v38  ;;  %v11606_v7 = vunpack.i.h.bf16 %v13281_v41 }
 0x4cf   : > { %v13289_v56 = vpop.permute.xlu0 %11623 }
 0x4d0   : > { %v11634_v42 = vpop.permute.xlu1 %11633  ;;  %v11626_v38 = vunpack.i.h.bf16 %v13289_v56 }
 0x4d1   : > { %v11636_v58 = vunpack.i.h.bf16 %v11634_v42  ;;  %v11635_v48 = vunpack.i.l.bf16 %v11634_v42  ;;  %v10695_v42 = vpack.c.bf16 %v4102_v51, %v4100_v50  ;;  %v11611_v51 = vunpack.i.h.bf16 %v13287_v44 }
 0x4d3   : > { %v10679_v62 = vpack.c.bf16 %v11636_v58, %v11566_v49  ;;  %v3770_v63 = vsel %vm497_vm2, %v11621_v61, %v11635_v48  ;;  %v13294_v1 = vpop.permute.xlu0 %11628  ;;  %v3771_v2 = vsel %vm497_vm2, %v11635_v48, %v11636_v58  ;;  %v4101_v49 = vsel %vm811_vm3, %v11581_v43, %v11575_v17  ;;  %v3725_v61 = vld [vmem:[%s12561_s12] sm:$0xff] }
 0x4d4   : > { %v13297_v3 = vpop.permute.xlu1 %11638  ;;  %v10671_v11 = vpack.c.bf16 %v3771_v2, %v3769_v59  ;;  %v10673_v4 = vpack.c.bf16 %v3770_v63, %v3768_v60  ;;  %v11596_v58 = vunpack.i.h.bf16 %v13277_v37  ;;  %v11595_v48 = vunpack.i.l.bf16 %v13277_v37 }
 0x4d5   : > { %10680 = vmatpush3.bf16.msra.mxu1 %v10679_v62  ;;  %v11625_v59 = vunpack.i.l.bf16 %v13289_v56  ;;  %v11601_v62 = vunpack.i.h.bf16 %v13285_v0  ;;  %v10697_v2 = vpack.c.bf16 %v4101_v49, %v4099_v53  ;;  %v11600_v37 = vunpack.i.l.bf16 %v13285_v0 }
 0x4d6   : > { %10672 = vmatprep.subr.bf16.mxu0 %v10671_v11  ;;  %10689 = vmatprep.subr.bf16.mxu1 %v12438_v15  ;;  %v4104_v11 = vsel %vm811_vm3, %v11585_v35, %v11586_v32  ;;  %v4295_v8 = vsel %vm983_vm5, %v11595_v48, %v11596_v58  ;;  %v11631_v53 = vunpack.i.h.bf16 %v13294_v1  ;;  %v11641_v44 = vunpack.i.h.bf16 %v13297_v3 }
 0x4d7   : > { %v13309_v9 = vpop.permute.xlu0 %11643  ;;  %10674 = vmatpush1.bf16.msra.mxu0 %v10673_v4  ;;  %v4292_v50 = vsel %vm983_vm5, %v11600_v37, %v11590_v36 }
 0x4d8   : > { %v13313_v46 = vpop.permute.xlu1 %11653  ;;  %10199 = vmatmul.mubr.msk.f32.vlgmr.msra.gmra.mrb[36].mxu1 %vm3784_vm4, %v9705_v5  ;;  %10682 = vmatprep.subr.bf16.mxu0 %v10681_v16 }
 0x4d9   : > { %10691 = vmatpush3.bf16.msra.mxu1 %v10690_v6  ;;  %10209 = vmatprep.mubr.msk.f32.mxu1 %vm12441_vm1, %v12440_v18  ;;  %v4293_v6 = vsel %vm983_vm5, %v11590_v36, %v11591_v54 }
 0x4da   : > { %9706 = vmatmul.mubr.msk.f32.vlgmr.msra.gmra.mrb[4].mxu0 %vm3784_vm4, %v9705_v5  ;;  %10692 = vmatprep.subr.bf16.mxu1 %v12438_v15  ;;  %v4103_v5 = vsel %vm811_vm3, %v11625_v59, %v11585_v35  ;;  %v11615_v35 = vunpack.i.l.bf16 %v13283_v28 }
 0x4db   : > { %v13325_v26 = vpop.permute.xlu0 %11648  ;;  %10684 = vmatpush1.bf16.msra.mxu0 %v10683_v40  ;;  %3996 = vmatprep.mubr.f32.mxu0 %v12440_v18  ;;  %v11605_v40 = vunpack.i.l.bf16 %v13281_v41  ;;  %v11630_v41 = vunpack.i.l.bf16 %v13294_v1  ;;  %v4486_v1 = vsel %vm1155_vm6, %v11610_v20, %v11611_v51 }
 0x4dc   : > { %v13331_v57 = vpop.permute.xlu1 %11663  ;;  %10686 = vmatprep.subr.bf16.mxu0 %v10685_v23  ;;  %v4294_v23 = vsel %vm983_vm5, %v11601_v62, %v11595_v48  ;;  %v11640_v48 = vunpack.i.l.bf16 %v13297_v3 }
 0x4dd   : > { %10694 = vmatpush3.bf16.msra.mxu1 %v10693_v31  ;;  %v10709_v31 = vpack.c.bf16 %v4295_v8, %v4293_v6  ;;  %v11645_v8 = vunpack.i.l.bf16 %v13309_v9 }
 0x4de   : > { %10703 = vmatprep.subr.bf16.mxu1 %v12438_v15 }
 0x4df   : > { %v13343_v60 = vpop.permute.xlu0 %11658  ;;  %10688 = vmatpush1.bf16.msra.mxu0 %v10687_v34  ;;  %v10718_v34 = vpack.c.bf16 %v11596_v58, %v11591_v54  ;;  %v4296_v54 = vsel %vm983_vm5, %v11630_v41, %v11605_v40 }
 0x4e0   : > { %v11679_v63 = vpop.permute.xlu1 %11678  ;;  %10696 = vmatprep.subr.bf16.mxu0 %v10695_v42  ;;  %10210 = vmatmul.mubr.msk.f32.vlgmr.msra.gmra.mrb[38].mxu1 %vm3784_vm4, %v3725_v61 }
 0x4e1   : > { %v11681_v4 = vunpack.i.h.bf16 %v11679_v63  ;;  %v11680_v16 = vunpack.i.l.bf16 %v11679_v63  ;;  %10705 = vmatpush3.bf16.msra.mxu1 %v10704_v55  ;;  %10220 = vmatprep.mubr.msk.f32.mxu1 %vm12441_vm1, %v12440_v18 }
 0x4e2   : > { %9708 = vmatmul.mubr.msk.f32.vlgmr.msra.gmra.mrb[4].mxu0 %vm3784_vm4, %v3725_v61  ;;  %10706 = vmatprep.subr.bf16.mxu1 %v12438_v15  ;;  %v10711_v61 = vpack.c.bf16 %v4294_v23, %v4292_v50  ;;  %v11655_v23 = vunpack.i.l.bf16 %v13313_v46  ;;  %v11651_v50 = vunpack.i.h.bf16 %v13325_v26 }
 0x4e3   : > { %v10707_v0 = vpack.c.bf16 %v11681_v4, %v11586_v32  ;;  %v4105_v56 = vsel %vm811_vm3, %v11626_v38, %v11680_v16  ;;  %v13358_v17 = vpop.permute.xlu0 %11668  ;;  %10698 = vmatpush1.bf16.msra.mxu0 %v10697_v2  ;;  %v4106_v10 = vsel %vm811_vm3, %v11680_v16, %v11681_v4  ;;  %4186 = vmatprep.mubr.f32.mxu0 %v12440_v18  ;;  %v11616_v32 = vunpack.i.h.bf16 %v13283_v28 }
 0x4e4   : > { %v13364_v43 = vpop.permute.xlu1 %11683  ;;  %v10699_v47 = vpack.c.bf16 %v4106_v10, %v4104_v11  ;;  %v10701_v13 = vpack.c.bf16 %v4105_v56, %v4103_v5  ;;  %v4297_v28 = vsel %vm983_vm5, %v11605_v40, %v11606_v7  ;;  %v4487_v38 = vsel %vm1155_vm6, %v11641_v44, %v11615_v35  ;;  %v9713_v5 = vld [vmem:[%s12561_s12 + $0x18] sm:$0xff] }
 0x4e5   : > { %10708 = vmatpush3.bf16.msra.mxu1 %v10707_v0  ;;  %v4488_v58 = vsel %vm1155_vm6, %v11615_v35, %v11616_v32  ;;  %v4485_v4 = vsel %vm1155_vm6, %v11640_v48, %v11610_v20  ;;  %v11646_v16 = vunpack.i.h.bf16 %v13309_v9  ;;  %v11650_v0 = vunpack.i.l.bf16 %v13325_v26 }
 0x4e6   : > { %10700 = vmatprep.subr.bf16.mxu0 %v10699_v47  ;;  %10717 = vmatprep.subr.bf16.mxu1 %v12438_v15  ;;  %v10723_v6 = vpack.c.bf16 %v4488_v58, %v4486_v1  ;;  %v11661_v56 = vunpack.i.h.bf16 %v13343_v60  ;;  %v11660_v10 = vunpack.i.l.bf16 %v13343_v60  ;;  %v11656_v47 = vunpack.i.h.bf16 %v13313_v46 }
 0x4e7   : > { %v13375_v49 = vpop.permute.xlu0 %11673  ;;  %10702 = vmatpush1.bf16.msra.mxu0 %v10701_v13  ;;  %v10725_v9 = vpack.c.bf16 %v4487_v38, %v4485_v4  ;;  %v11665_v26 = vunpack.i.l.bf16 %v13331_v57  ;;  %v11686_v48 = vunpack.i.h.bf16 %v13364_v43 }
 0x4e8   : > { %v11694_v42 = vpop.permute.xlu1 %11693  ;;  %10221 = vmatmul.mubr.msk.f32.vlgmr.msra.gmra.mrb[40].mxu1 %vm3784_vm4, %v9710_v30  ;;  %10710 = vmatprep.subr.bf16.mxu0 %v10709_v31  ;;  %v11666_v31 = vunpack.i.h.bf16 %v13331_v57  ;;  %v4681_v46 = vsel %vm1327_vm7, %v11660_v10, %v11661_v56  ;;  %v11675_v1 = vunpack.i.l.bf16 %v13375_v49 }
 0x4e9   : > { %v11696_v36 = vunpack.i.h.bf16 %v11694_v42  ;;  %v11695_v59 = vunpack.i.l.bf16 %v11694_v42  ;;  %10719 = vmatpush3.bf16.msra.mxu1 %v10718_v34  ;;  %10231 = vmatprep.mubr.msk.f32.mxu1 %vm12441_vm1, %v12440_v18  ;;  %v11670_v42 = vunpack.i.l.bf16 %v13358_v17 }
 0x4ea   : > { %9711 = vmatmul.mubr.msk.f32.vlgmr.msra.gmra.mrb[4].mxu0 %vm3784_vm4, %v9710_v30  ;;  %10720 = vmatprep.subr.bf16.mxu1 %v12438_v15  ;;  %v4680_v57 = vsel %vm1327_vm7, %v11666_v31, %v11660_v10  ;;  %v9719_v31 = vld [vmem:[%s12561_s12 + $0x28] sm:$0xff] }
 0x4eb   : > { %v10721_v55 = vpack.c.bf16 %v11696_v36, %v11606_v7  ;;  %v4298_v3 = vsel %vm983_vm5, %v11631_v53, %v11695_v59  ;;  %v13390_v62 = vpop.permute.xlu0 %11688  ;;  %10712 = vmatpush1.bf16.msra.mxu0 %v10711_v61  ;;  %v4299_v63 = vsel %vm983_vm5, %v11695_v59, %v11696_v36  ;;  %4379 = vmatprep.mubr.f32.mxu0 %v12440_v18  ;;  %v11671_v53 = vunpack.i.h.bf16 %v13358_v17  ;;  %v9716_v59 = vld [vmem:[%s12561_s12 + $0x20] sm:$0xff] }
 0x4ec   : > { %v13394_v2 = vpop.permute.xlu1 %11698  ;;  %v10713_v11 = vpack.c.bf16 %v4299_v63, %v4297_v28  ;;  %v10715_v37 = vpack.c.bf16 %v4298_v3, %v4296_v54  ;;  %v10732_v7 = vpack.c.bf16 %v11616_v32, %v11611_v51  ;;  %v4489_v51 = vsel %vm1155_vm6, %v11650_v0, %v11645_v8 }
 0x4ed   : > { %10722 = vmatpush3.bf16.msra.mxu1 %v10721_v55  ;;  %v4490_v32 = vsel %vm1155_vm6, %v11645_v8, %v11646_v16  ;;  %v11685_v36 = vunpack.i.l.bf16 %v13364_v43  ;;  %v4679_v54 = vsel %vm1327_vm7, %v11655_v23, %v11656_v47  ;;  %v11691_v58 = vunpack.i.h.bf16 %v13390_v62 }
 0x4ee   : > { %10714 = vmatprep.subr.bf16.mxu0 %v10713_v11  ;;  %10731 = vmatprep.subr.bf16.mxu1 %v12438_v15  ;;  %v11690_v17 = vunpack.i.l.bf16 %v13390_v62  ;;  %v10737_v55 = vpack.c.bf16 %v4681_v46, %v4679_v54  ;;  %v4678_v3 = vsel %vm1327_vm7, %v11665_v26, %v11655_v23  ;;  %v10746_v63 = vpack.c.bf16 %v11661_v56, %v11656_v47 }
 0x4ef   : > { %v13405_v40 = vpop.permute.xlu0 %11703  ;;  %10716 = vmatpush1.bf16.msra.mxu0 %v10715_v37  ;;  %v11676_v43 = vunpack.i.h.bf16 %v13375_v49  ;;  %v10739_v38 = vpack.c.bf16 %v4680_v57, %v4678_v3  ;;  %v4683_v4 = vsel %vm1327_vm7, %v11670_v42, %v11671_v53  ;;  %v11701_v62 = vunpack.i.h.bf16 %v13394_v2 }
 0x4f0   : > { %v11714_v13 = vpop.permute.xlu1 %11713  ;;  %10232 = vmatmul.mubr.msk.f32.vlgmr.msra.gmra.mrb[42].mxu1 %vm3784_vm4, %v9713_v5  ;;  %10724 = vmatprep.subr.bf16.mxu0 %v10723_v6  ;;  %v4682_v8 = vsel %vm1327_vm7, %v11675_v1, %v11670_v42  ;;  %v4872_v49 = vsel %vm1499_vm8, %v11685_v36, %v11686_v48  ;;  %v4874_v0 = vsel %vm1499_vm8, %v11690_v17, %v11691_v58  ;;  %v11706_v47 = vunpack.i.h.bf16 %v13405_v40 }
 0x4f1   : > { %v11716_v30 = vunpack.i.h.bf16 %v11714_v13  ;;  %v11715_v60 = vunpack.i.l.bf16 %v11714_v13  ;;  %10733 = vmatpush3.bf16.msra.mxu1 %v10732_v7  ;;  %10242 = vmatprep.mubr.msk.f32.mxu1 %vm12441_vm1, %v12440_v18  ;;  %v11705_v13 = vunpack.i.l.bf16 %v13405_v40 }
 0x4f2   : > { %9714 = vmatmul.mubr.msk.f32.vlgmr.msra.gmra.mrb[4].mxu0 %vm3784_vm4, %v9713_v5  ;;  %10734 = vmatprep.subr.bf16.mxu1 %v12438_v15 }
 0x4f3   : > { %v10735_v35 = vpack.c.bf16 %v11716_v30, %v11646_v16  ;;  %v4491_v20 = vsel %vm1155_vm6, %v11651_v50, %v11715_v60  ;;  %v13421_v41 = vpop.permute.xlu0 %11708  ;;  %10726 = vmatpush1.bf16.msra.mxu0 %v10725_v9  ;;  %v4492_v34 = vsel %vm1155_vm6, %v11715_v60, %v11716_v30  ;;  %4572 = vmatprep.mubr.f32.mxu0 %v12440_v18  ;;  %v11700_v16 = vunpack.i.l.bf16 %v13394_v2 }
 0x4f4   : > { %v13427_v61 = vpop.permute.xlu1 %11718  ;;  %v10727_v28 = vpack.c.bf16 %v4492_v34, %v4490_v32  ;;  %v10729_v44 = vpack.c.bf16 %v4491_v20, %v4489_v51  ;;  %v4873_v30 = vsel %vm1499_vm8, %v11701_v62, %v11690_v17  ;;  %v11710_v51 = vunpack.i.l.bf16 %v13421_v41 }
 0x4f5   : > { %10736 = vmatpush3.bf16.msra.mxu1 %v10735_v35  ;;  %v4871_v60 = vsel %vm1499_vm8, %v11700_v16, %v11685_v36  ;;  %v10751_v32 = vpack.c.bf16 %v4874_v0, %v4872_v49  ;;  %v11721_v46 = vunpack.i.h.bf16 %v13427_v61  ;;  %v11720_v26 = vunpack.i.l.bf16 %v13427_v61  ;;  %v9722_v16 = vld [vmem:[%s12561_s12 + $0x30] sm:$0xff] }
 0x4f6   : > { %10728 = vmatprep.subr.bf16.mxu0 %v10727_v28  ;;  %10745 = vmatprep.subr.bf16.mxu1 %v12438_v15  ;;  %v10760_v20 = vpack.c.bf16 %v11691_v58, %v11686_v48  ;;  %v10753_v28 = vpack.c.bf16 %v4873_v30, %v4871_v60  ;;  %v4876_v61 = vsel %vm1499_vm8, %v11705_v13, %v11706_v47 }
 0x4f7   : > { %v13439_v11 = vpop.permute.xlu0 %11723  ;;  %10730 = vmatpush1.bf16.msra.mxu0 %v10729_v44  ;;  %v4875_v48 = vsel %vm1499_vm8, %v11710_v51, %v11705_v13 }
 0x4f8   : > { %v11729_v37 = vpop.permute.xlu1 %11728  ;;  %10243 = vmatmul.mubr.msk.f32.vlgmr.msra.gmra.mrb[44].mxu1 %vm3784_vm4, %v9716_v59  ;;  %10738 = vmatprep.subr.bf16.mxu0 %v10737_v55  ;;  %v11726_v35 = vunpack.i.h.bf16 %v13439_v11  ;;  %v11725_v40 = vunpack.i.l.bf16 %v13439_v11 }
 0x4f9   : > { %v11731_v5 = vunpack.i.h.bf16 %v11729_v37  ;;  %v11730_v6 = vunpack.i.l.bf16 %v11729_v37  ;;  %10747 = vmatpush3.bf16.msra.mxu1 %v10746_v63  ;;  %10253 = vmatprep.mubr.msk.f32.mxu1 %vm12441_vm1, %v12440_v18 }
 0x4fa   : > { %9717 = vmatmul.mubr.msk.f32.vlgmr.msra.gmra.mrb[4].mxu0 %vm3784_vm4, %v9716_v59  ;;  %10748 = vmatprep.subr.bf16.mxu1 %v12438_v15  ;;  %v5067_v54 = vsel %vm1671_vm9, %v11725_v40, %v11726_v35 }
 0x4fb   : > { %v10749_v56 = vpack.c.bf16 %v11731_v5, %v11671_v53  ;;  %v4684_v2 = vsel %vm1327_vm7, %v11676_v43, %v11730_v6  ;;  %v13454_v10 = vpop.permute.xlu0 %11738  ;;  %10740 = vmatpush1.bf16.msra.mxu0 %v10739_v38  ;;  %v4685_v7 = vsel %vm1327_vm7, %v11730_v6, %v11731_v5  ;;  %4765 = vmatprep.mubr.f32.mxu0 %v12440_v18  ;;  %v11711_v53 = vunpack.i.h.bf16 %v13421_v41 }
 0x4fc   : > { %v11734_v9 = vpop.permute.xlu1 %11733  ;;  %v10741_v23 = vpack.c.bf16 %v4685_v7, %v4683_v4  ;;  %v10743_v50 = vpack.c.bf16 %v4684_v2, %v4682_v8  ;;  %v5065_v41 = vsel %vm1671_vm9, %v11720_v26, %v11721_v46  ;;  %v11741_v3 = vunpack.i.h.bf16 %v13454_v10 }
 0x4fd   : > { %10750 = vmatpush3.bf16.msra.mxu1 %v10749_v56  ;;  %v11736_v44 = vunpack.i.h.bf16 %v11734_v9  ;;  %v11735_v57 = vunpack.i.l.bf16 %v11734_v9  ;;  %v11740_v63 = vunpack.i.l.bf16 %v13454_v10  ;;  %v10765_v5 = vpack.c.bf16 %v5067_v54, %v5065_v41 }
 0x4fe   : > { %10742 = vmatprep.subr.bf16.mxu0 %v10741_v23  ;;  %10759 = vmatprep.subr.bf16.mxu1 %v12438_v15  ;;  %v10774_v56 = vpack.c.bf16 %v11726_v35, %v11721_v46 }
 0x4ff   : > { %v13469_v34 = vpop.permute.xlu0 %11743  ;;  %10744 = vmatpush1.bf16.msra.mxu0 %v10743_v50  ;;  %v5066_v38 = vsel %vm1671_vm9, %v11736_v44, %v11725_v40  ;;  %v5064_v4 = vsel %vm1671_vm9, %v11735_v57, %v11720_v26  ;;  %v5069_v7 = vsel %vm1671_vm9, %v11740_v63, %v11741_v3 }
 0x500   : > { %v11749_v42 = vpop.permute.xlu1 %11748  ;;  %10254 = vmatmul.mubr.msk.f32.vlgmr.msra.gmra.mrb[46].mxu1 %vm3784_vm4, %v9719_v31  ;;  %10752 = vmatprep.subr.bf16.mxu0 %v10751_v32  ;;  %v11745_v62 = vunpack.i.l.bf16 %v13469_v34  ;;  %v10767_v23 = vpack.c.bf16 %v5066_v38, %v5064_v4  ;;  %v9728_v38 = vld [vmem:[%s12561_s12 + $0x40] sm:$0xff] }
 0x501   : > { %v11751_v36 = vunpack.i.h.bf16 %v11749_v42  ;;  %v11750_v59 = vunpack.i.l.bf16 %v11749_v42  ;;  %10761 = vmatpush3.bf16.msra.mxu1 %v10760_v20  ;;  %10264 = vmatprep.mubr.msk.f32.mxu1 %vm12441_vm1, %v12440_v18 }
 0x502   : > { %9720 = vmatmul.mubr.msk.f32.vlgmr.msra.gmra.mrb[4].mxu0 %vm3784_vm4, %v9719_v31  ;;  %10762 = vmatprep.subr.bf16.mxu1 %v12438_v15  ;;  %v5068_v50 = vsel %vm1671_vm9, %v11745_v62, %v11740_v63 }
 0x503   : > { %v10763_v1 = vpack.c.bf16 %v11751_v36, %v11706_v47  ;;  %v4877_v58 = vsel %vm1499_vm8, %v11711_v53, %v11750_v59  ;;  %v11759_v17 = vpop.permute.xlu0 %11758  ;;  %10754 = vmatpush1.bf16.msra.mxu0 %v10753_v28  ;;  %v4878_v55 = vsel %vm1499_vm8, %v11750_v59, %v11751_v36  ;;  %4958 = vmatprep.mubr.f32.mxu0 %v12440_v18  ;;  %v11746_v47 = vunpack.i.h.bf16 %v13469_v34  ;;  %v9725_v53 = vld [vmem:[%s12561_s12 + $0x38] sm:$0xff] }
 0x504   : > { %v11754_v11 = vpop.permute.xlu1 %11753  ;;  %v10755_v43 = vpack.c.bf16 %v4878_v55, %v4876_v61  ;;  %v10757_v37 = vpack.c.bf16 %v4877_v58, %v4875_v48  ;;  %v11761_v6 = vunpack.i.h.bf16 %v11759_v17  ;;  %v11760_v8 = vunpack.i.l.bf16 %v11759_v17 }
 0x505   : > { %10764 = vmatpush3.bf16.msra.mxu1 %v10763_v1  ;;  %v11756_v49 = vunpack.i.h.bf16 %v11754_v11  ;;  %v11755_v0 = vunpack.i.l.bf16 %v11754_v11 }
 0x506   : > { %10756 = vmatprep.subr.bf16.mxu0 %v10755_v43  ;;  %10773 = vmatprep.subr.bf16.mxu1 %v12438_v15  ;;  %v5260_v60 = vsel %vm1843_vm10, %v11760_v8, %v11761_v6 }
 0x507   : > { %v11774_v2 = vpop.permute.xlu0 %11773  ;;  %10758 = vmatpush1.bf16.msra.mxu0 %v10757_v37  ;;  %v5258_v30 = vsel %vm1843_vm10, %v11755_v0, %v11756_v49  ;;  %v10788_v57 = vpack.c.bf16 %v11761_v6, %v11756_v49 }
 0x508   : > { %v11764_v10 = vpop.permute.xlu1 %11763  ;;  %10265 = vmatmul.mubr.msk.f32.vlgmr.msra.gmra.mrb[48].mxu1 %vm3784_vm4, %v9722_v16  ;;  %10766 = vmatprep.subr.bf16.mxu0 %v10765_v5  ;;  %v11776_v42 = vunpack.i.h.bf16 %v11774_v2  ;;  %v11775_v28 = vunpack.i.l.bf16 %v11774_v2  ;;  %v10779_v44 = vpack.c.bf16 %v5260_v60, %v5258_v30 }
 0x509   : > { %v11766_v13 = vunpack.i.h.bf16 %v11764_v10  ;;  %v11765_v9 = vunpack.i.l.bf16 %v11764_v10  ;;  %10775 = vmatpush3.bf16.msra.mxu1 %v10774_v56  ;;  %10275 = vmatprep.mubr.msk.f32.mxu1 %vm12441_vm1, %v12440_v18 }
 0x50a   : > { %9723 = vmatmul.mubr.msk.f32.vlgmr.msra.gmra.mrb[4].mxu0 %vm3784_vm4, %v9722_v16  ;;  %10776 = vmatprep.subr.bf16.mxu1 %v12438_v15  ;;  %v5262_v55 = vsel %vm1843_vm10, %v11775_v28, %v11776_v42 }
 0x50b   : > { %v10777_v51 = vpack.c.bf16 %v11766_v13, %v11741_v3  ;;  %v5070_v31 = vsel %vm1671_vm9, %v11746_v47, %v11765_v9  ;;  %v11784_v32 = vpop.permute.xlu0 %11783  ;;  %10768 = vmatpush1.bf16.msra.mxu0 %v10767_v23  ;;  %v5071_v46 = vsel %vm1671_vm9, %v11765_v9, %v11766_v13  ;;  %5151 = vmatprep.mubr.f32.mxu0 %v12440_v18 }
 0x50c   : > { %v11769_v26 = vpop.permute.xlu1 %11768  ;;  %v10769_v35 = vpack.c.bf16 %v5071_v46, %v5069_v7  ;;  %v10771_v40 = vpack.c.bf16 %v5070_v31, %v5068_v50  ;;  %v11785_v61 = vunpack.i.l.bf16 %v11784_v32  ;;  %v11786_v54 = vunpack.i.h.bf16 %v11784_v32 }
 0x50d   : > { %v11771_v20 = vunpack.i.h.bf16 %v11769_v26  ;;  %v11770_v34 = vunpack.i.l.bf16 %v11769_v26  ;;  %10778 = vmatpush3.bf16.msra.mxu1 %v10777_v51 }
 0x50e   : > { %10770 = vmatprep.subr.bf16.mxu0 %v10769_v35  ;;  %10787 = vmatprep.subr.bf16.mxu1 %v12438_v15  ;;  %v5261_v17 = vsel %vm1843_vm10, %v11785_v61, %v11775_v28 }
 0x50f   : > { %v5259_v36 = vsel %vm1843_vm10, %v11771_v20, %v11760_v8  ;;  %v5257_v59 = vsel %vm1843_vm10, %v11770_v34, %v11755_v0  ;;  %10772 = vmatpush1.bf16.msra.mxu0 %v10771_v40 }
 0x510   : > { %v11779_v48 = vpop.permute.xlu1 %11778  ;;  %10276 = vmatmul.mubr.msk.f32.vlgmr.msra.gmra.mrb[50].mxu1 %vm3784_vm4, %v9725_v53  ;;  %10780 = vmatprep.subr.bf16.mxu0 %v10779_v44  ;;  %v10781_v41 = vpack.c.bf16 %v5259_v36, %v5257_v59 }
 0x511   : > { %v11781_v1 = vunpack.i.h.bf16 %v11779_v48  ;;  %v11780_v58 = vunpack.i.l.bf16 %v11779_v48  ;;  %10789 = vmatpush3.bf16.msra.mxu1 %v10788_v57  ;;  %10286 = vmatprep.mubr.msk.f32.mxu1 %vm12441_vm1, %v12440_v18 }
 0x512   : > { %9726 = vmatmul.mubr.msk.f32.vlgmr.msra.gmra.mrb[4].mxu0 %vm3784_vm4, %v9725_v53  ;;  %10790 = vmatprep.subr.bf16.mxu1 %v12438_v15 }
 0x513   : > { %v10791_v3 = vpack.c.bf16 %v11781_v1, %v11776_v42  ;;  %v5263_v63 = vsel %vm1843_vm10, %v11786_v54, %v11780_v58  ;;  %10782 = vmatpush1.bf16.msra.mxu0 %v10781_v41  ;;  %v5264_v11 = vsel %vm1843_vm10, %v11780_v58, %v11781_v1  ;;  %5344 = vmatprep.mubr.f32.mxu0 %v12440_v18  ;;  %v13526_v54 = vld [vmem:[#allocation2 + $0x8] sm:$0xff]  ;;  %v13528_v1 = vld [vmem:[#allocation2 + $0x10] sm:$0xff] }
 0x514   : > { %v10783_v43 = vpack.c.bf16 %v5264_v11, %v5262_v55  ;;  %v10785_v37 = vpack.c.bf16 %v5263_v63, %v5261_v17  ;;  %v13535_v55 = vpack.i.bf16 %v13528_v1, %v13526_v54  ;;  %v13539_v63 = vld [vmem:[#allocation2 + $0x28] sm:$0xff] }
 0x515   : > { %10792 = vmatpush3.bf16.msra.mxu1 %v10791_v3  ;;  %v13537_v3 = vld [vmem:[#allocation2 + $0x20] sm:$0xff] }
 0x516   : > { %10784 = vmatprep.subr.bf16.mxu0 %v10783_v43  ;;  %10801 = vmatprep.subr.bf16.mxu1 %v12438_v15  ;;  %v13542_v43 = vld [vmem:[#allocation2] sm:$0xff] }
 0x517   : > { %10786 = vmatpush1.bf16.msra.mxu0 %v10785_v37  ;;  %v13544_v37 = vld [vmem:[#allocation2 + $0x18] sm:$0xff] }
 0x518   : > { %10287 = vmatmul.mubr.msk.f32.vlgmr.msra.gmra.mrb[52].mxu1 %vm3784_vm4, %v9728_v38 }
 0x519   : > { %10299 = vmatprep.mubr.msk.f32.mxu1 %vm12441_vm1, %v12440_v18 }
 0x51a   : > { %9729 = vmatmul.mubr.msk.f32.vlgmr.msra.gmra.mrb[4].mxu0 %vm3784_vm4, %v9728_v38  ;;  %v13549_v38 = vpack.i.bf16 %v13539_v63, %v13537_v3  ;;  %vm5550_vm4 = vcmask 326656  }
 0x51b   : > { %5618 = vmatprep.mubr.f32.mxu0 %v12440_v18 }
 0x521   : > { %v5428_v20 = vpop.permute.xlu1 %5427 }
 0x5ab   : > { %v3925_v4 = vpop.f32.mrb[36].mxu1 }
 0x5ac   : > { %v10200_v62 = vpop.f32.mrb[37].mxu1 }
 0x5ad   : > { %v13557_v62 = vld [vmem:[#allocation2 + $0x38] sm:$0xff] }
 0x5b3   : > { %v4069_v16 = vpop.f32.mrb[38].mxu1 }
 0x5b4   : > { %v4070_v5 = vadd.f32 %v4069_v16, %v3925_v4  ;;  %v10211_v6 = vpop.f32.mrb[39].mxu1  ;;  %v13555_v4 = vpack.i.bf16 %v13544_v37, %v13542_v43  ;;  %v13559_v16 = vld [vmem:[#allocation2 + $0x40] sm:$0xff] }
 0x5b5   : > { %v13569_v6 = vld [vmem:[#allocation2 + $0x50] sm:$0xff] }
 0x5bb   : > { %v4259_v8 = vpop.f32.mrb[40].mxu1 }
 0x5bc   : > { %v4265_v49 = vadd.f32 %v4259_v8, %v4070_v5  ;;  %v10222_v0 = vpop.f32.mrb[41].mxu1  ;;  %v13567_v5 = vpack.i.bf16 %v13559_v16, %v13557_v62  ;;  %v13573_v8 = vpack.i.bf16 %v13190_v12, %v13569_v6  ;;  %v12390_v12 = vld [vmem:[#allocation2 + $0x48] sm:$0xff] }
 0x5c3   : > { %v4452_v56 = vpop.f32.mrb[42].mxu1 }
 0x5c4   : > { %v4458_v2 = vadd.f32 %v4452_v56, %v4265_v49  ;;  %v10233_v10 = vpop.f32.mrb[43].mxu1  ;;  %v12391_v49 = vld [vmem:[#allocation2 + $0x30] sm:$0xff] }
 0x5c5   : > { %v11872_v0 = vpack.i.bf16 %v12390_v12, %v12391_v49 }
 0x5cb   : > { %v4645_v7 = vpop.f32.mrb[44].mxu1 }
 0x5cc   : > { %v4651_v47 = vadd.f32 %v4645_v7, %v4458_v2  ;;  %v10244_v13 = vpop.f32.mrb[45].mxu1 }
 0x5d3   : > { %v4838_v9 = vpop.f32.mrb[46].mxu1 }
 0x5d4   : > { %v4844_v23 = vadd.f32 %v4838_v9, %v4651_v47  ;;  %v10255_v50 = vpop.f32.mrb[47].mxu1 }
 0x5db   : > { %v5031_v30 = vpop.f32.mrb[48].mxu1 }
 0x5dc   : > { %v5037_v60 = vadd.f32 %v5031_v30, %v4844_v23  ;;  %v10266_v51 = vpop.f32.mrb[49].mxu1 }
 0x5e3   : > { %v5224_v31 = vpop.f32.mrb[50].mxu1 }
 0x5e4   : > { %v5230_v32 = vadd.f32 %v5224_v31, %v5037_v60  ;;  %v10277_v46 = vpop.f32.mrb[51].mxu1 }
 0x5eb   : > { %v5417_v26 = vpop.f32.mrb[52].mxu1 }
 0x5ec   : > { %v5423_v35 = vadd.f32 %v5417_v26, %v5230_v32  ;;  %v10288_v40 = vpop.f32.mrb[53].mxu1 }
 0x5ed   : > { %v5346_v34 = vpop.f32.mrb[4].mxu0 }
 0x5ee   : > { %v5432_v53 = vadd.f32 %v5428_v20, %v5423_v35  ;;  %v5430_v42 = vadd.f32 %v5428_v20, %v5346_v34  ;;  %v5348_v28 = vpop.f32.mrb[5].mxu0 }
 0x5ef   : > { %v5431_v61 = vadd.f32 %v5428_v20, %v5348_v28 }
 0x5f0   : > { %v5438_v44 = vmul.f32 0.2, %v5432_v53  ;;  %vm5433_vm11 = vcmp.ge.f32.partialorder %v5430_v42, 0.0  ;;  %v5436_v57 = vmul.f32 0.2, %v5430_v42  ;;  %vm5435_vm12 = vcmp.ge.f32.partialorder %v5432_v53, 0.0 }
 0x5f1   : > { %vm5434_vm13 = vcmp.ge.f32.partialorder %v5431_v61, 0.0  ;;  %v5437_v36 = vmul.f32 0.2, %v5431_v61 }
 0x5f2   : > { %v5439_v59 = vsel %vm5433_vm11, %v5430_v42, %v5436_v57  ;;  %v5441_v58 = vsel %vm5435_vm12, %v5432_v53, %v5438_v44 }
 0x5f3   : > { %v5442_v48 = vmul.f32 %v5439_v59, %v12815_v33  ;;  %v5440_v41 = vsel %vm5434_vm13, %v5431_v61, %v5437_v36  ;;  %v5444_v11 = vmul.f32 %v5441_v58, %v12804_v24  ;;  %vm7412_vm13 = vcmask 392192  }
 0x5f4   : > { %v5443_v17 = vmul.f32 %v5440_v41, %v12819_v39 }
 0x5f5   : > { %5448 = vrot.lane.b32.xlu0 %v5442_v48, %s12450_s25 }
 0x5f6   : > { %5450 = vrot.lane.b32.xlu1 %v5443_v17, %s12450_s25 }
 0x5f9   : > { %5452 = vrot.lane.b32.xlu0 %v5444_v11, %s12450_s25 }
 0x5fa   : > { %11788 = vrot.lane.b32.xlu1 %v13535_v55, %s12439_s1 }
 0x5fd   : > { %11793 = vrot.lane.b32.xlu0 %v13549_v38, %s12439_s1 }
 0x5fe   : > { %11798 = vrot.lane.b32.xlu1 %v13555_v4, %s12439_s1 }
 0x601   : > { %11803 = vrot.lane.b32.xlu0 %v13567_v5, %s12439_s1 }
 0x602   : > { %11808 = vrot.lane.b32.xlu1 %v13573_v8, %s12439_s1 }
 0x605   : > { %11813 = vrot.lane.b32.xlu0 %v13203_v19, %s12439_s1 }
 0x606   : > { %11823 = vrot.lane.b32.xlu1 %v13549_v38, %s12442_s2 }
 0x609   : > { %11818 = vrot.lane.b32.xlu0 %v13535_v55, %s12442_s2 }
 0x60a   : > { %11833 = vrot.lane.b32.xlu1 %v13567_v5, %s12442_s2 }
 0x60d   : > { %11828 = vrot.lane.b32.xlu0 %v13555_v4, %s12442_s2 }
 0x60e   : > { %11843 = vrot.lane.b32.xlu1 %v13203_v19, %s12442_s2 }
 0x611   : > { %11838 = vrot.lane.b32.xlu0 %v13573_v8, %s12442_s2 }
 0x612   : > { %11853 = vrot.lane.b32.xlu1 %v13549_v38, %s12443_s3 }
 0x615   : > { %11848 = vrot.lane.b32.xlu0 %v13535_v55, %s12443_s3 }
 0x616   : > { %11858 = vrot.lane.b32.xlu1 %v13555_v4, %s12443_s3 }
 0x619   : > { %11863 = vrot.lane.b32.xlu0 %v13567_v5, %s12443_s3 }
 0x61a   : > { %11868 = vrot.lane.b32.xlu1 %v13573_v8, %s12443_s3 }
 0x61d   : > { %11873 = vrot.lane.b32.xlu0 %v11872_v0, %s12443_s3 }
 0x61e   : > { %11878 = vrot.lane.b32.xlu1 %v13535_v55, %s12444_s8 }
 0x621   : > { %11883 = vrot.lane.b32.xlu0 %v13549_v38, %s12444_s8 }
 0x622   : > { %11893 = vrot.lane.b32.xlu1 %v13567_v5, %s12444_s8 }
 0x625   : > { %11888 = vrot.lane.b32.xlu0 %v13555_v4, %s12444_s8 }
 0x626   : > { %11903 = vrot.lane.b32.xlu1 %v11872_v0, %s12444_s8 }
 0x629   : > { %11898 = vrot.lane.b32.xlu0 %v13573_v8, %s12444_s8 }
 0x62a   : > { %11913 = vrot.lane.b32.xlu1 %v13549_v38, %s12445_s16 }
 0x62d   : > { %11908 = vrot.lane.b32.xlu0 %v13535_v55, %s12445_s16 }
 0x667   : > { %v5449_v56 = vpop.permute.xlu0 %5448 }
 0x668   : > { %5459 = vst.msk [vmem:[#allocation2 + $0x60] sm:$0xff] %vm2053_vm14, %v5449_v56  ;;  %v5451_v2 = vpop.permute.xlu1 %5450 }
 0x669   : > { %v13621_v10 = vsel %vm2047_vm15, %v5449_v56, %v5451_v2 }
 0x66a   : > { %5460 = vst [vmem:[#allocation2 + $0x68] sm:$0xff] %v13621_v10 }
 0x66b   : > { %v5453_v7 = vpop.permute.xlu0 %5452 }
 0x66c   : > { %v5455_v47 = vsel %vm2047_vm15, %v5451_v2, %v5453_v7  ;;  %v11789_v13 = vpop.permute.xlu1 %11788 }
 0x66d   : > { %5461 = vst.msk [vmem:[#allocation2 + $0x70] sm:$0xff] %vm2056_vm0, %v5455_v47  ;;  %v11790_v9 = vunpack.i.l.bf16 %v11789_v13  ;;  %v11791_v23 = vunpack.i.h.bf16 %v11789_v13 }
 0x66f   : > { %v11794_v50 = vpop.permute.xlu0 %11793  ;;  %v13626_v30 = vld [vmem:[#allocation2 + $0x60] sm:$0xff]  ;;  %v5526_v32 = vsel %vm497_vm2, %v11790_v9, %v11791_v23 }
 0x670   : > { %v11796_v60 = vunpack.i.h.bf16 %v11794_v50  ;;  %v11795_v51 = vunpack.i.l.bf16 %v11794_v50  ;;  %5865 = vrot.lane.b32.xlu0 %v13626_v30, %s12442_s2  ;;  %5519 = vrot.lane.b32.xlu1 %v13626_v30, %s12439_s1  ;;  %v11799_v31 = vpop.permute.xlu1 %11798 }
 0x671   : > { %v11801_v46 = vunpack.i.h.bf16 %v11799_v31  ;;  %v11800_v26 = vunpack.i.l.bf16 %v11799_v31 }
 0x672   : > { %v10802_v35 = vpack.c.bf16 %v11796_v60, %v11791_v23  ;;  %v5528_v40 = vsel %vm497_vm2, %v11795_v51, %v11796_v60 }
 0x673   : > { %v5527_v20 = vsel %vm497_vm2, %v11801_v46, %v11795_v51  ;;  %v5525_v34 = vsel %vm497_vm2, %v11800_v26, %v11790_v9  ;;  %v11804_v53 = vpop.permute.xlu0 %11803  ;;  %v10793_v42 = vpack.c.bf16 %v5528_v40, %v5526_v32 }
 0x674   : > { %v11806_v28 = vunpack.i.h.bf16 %v11804_v53  ;;  %v11805_v61 = vunpack.i.l.bf16 %v11804_v53  ;;  %6069 = vrot.lane.b32.xlu1 %v13626_v30, %s12443_s3  ;;  %v11809_v44 = vpop.permute.xlu1 %11808  ;;  %v13638_v57 = vld [vmem:[#allocation2 + $0x70] sm:$0xff]  ;;  %10803 = vmatpush3.bf16.msra.mxu1 %v10802_v35  ;;  %v10795_v36 = vpack.c.bf16 %v5527_v20, %v5525_v34 }
 0x675   : > { %v11811_v59 = vunpack.i.h.bf16 %v11809_v44  ;;  %v11810_v48 = vunpack.i.l.bf16 %v11809_v44  ;;  %5523 = vrot.lane.b32.xlu0 %v13638_v57, %s12439_s1  ;;  %10794 = vmatprep.subr.bf16.mxu0 %v10793_v42  ;;  %v10816_v44 = vpack.c.bf16 %v13539_v63, %v13528_v1  ;;  %v12392_v63 = vld [vmem:[#allocation2 + $0x58] sm:$0xff] }
 0x676   : > { %10804 = vmatprep.subr.bf16.mxu1 %v12438_v15  ;;  %10796 = vmatpush1.bf16.msra.mxu0 %v10795_v36  ;;  %v5530_v41 = vsel %vm497_vm2, %v11805_v61, %v11806_v28 }
 0x677   : > { %v10805_v58 = vpack.c.bf16 %v11811_v59, %v11806_v28  ;;  %v11814_v17 = vpop.permute.xlu0 %11813  ;;  %v5532_v11 = vsel %vm497_vm2, %v11810_v48, %v11811_v59 }
 0x678   : > { %v11816_v12 = vunpack.i.h.bf16 %v11814_v17  ;;  %v11815_v49 = vunpack.i.l.bf16 %v11814_v17  ;;  %5521 = vrot.lane.b32.xlu1 %v13621_v10, %s12439_s1  ;;  %v10797_v0 = vpack.c.bf16 %v5532_v11, %v5530_v41  ;;  %v13696_v47 = vpop.permute.xlu1 %11823  ;;  %v10819_v17 = vpack.c.bf16 %v12392_v63, %v13559_v16  ;;  %v5477_v16 = vld [vmem:[%s12566_s23] sm:$0xff] }
 0x679   : > { %6273 = vrot.lane.b32.xlu0 %v13626_v30, %s12444_s8  ;;  %10806 = vmatpush3.bf16.msra.mxu1 %v10805_v58  ;;  %v10809_v11 = vpack.c.bf16 %v13544_v37, %v13542_v43  ;;  %v11825_v43 = vunpack.i.l.bf16 %v13696_v47 }
 0x67a   : > { %v5529_v56 = vsel %vm497_vm2, %v11815_v49, %v11805_v61  ;;  %v5531_v2 = vsel %vm497_vm2, %v11816_v12, %v11810_v48  ;;  %10798 = vmatprep.subr.bf16.mxu0 %v10797_v0  ;;  %10297 = vmatprep.subr.mxu1 %v12440_v18  ;;  %v9731_v61 = vld [vmem:[%s12566_s23 + $0x8] sm:$0xff]  ;;  %v10807_v48 = vpack.c.bf16 %v13537_v3, %v13526_v54  ;;  %v11826_v54 = vunpack.i.h.bf16 %v13696_v47 }
 0x67b   : > { %v10799_v7 = vpack.c.bf16 %v5531_v2, %v5529_v56  ;;  %v13698_v13 = vpop.permute.xlu0 %11818  ;;  %v10811_v0 = vpack.c.bf16 %v13569_v6, %v13557_v62 }
 0x67c   : > { %11918 = vrot.lane.b32.xlu1 %v13555_v4, %s12445_s16  ;;  %v13708_v9 = vpop.permute.xlu1 %11833  ;;  %v11821_v3 = vunpack.i.h.bf16 %v13698_v13  ;;  %v11820_v37 = vunpack.i.l.bf16 %v13698_v13 }
 0x67d   : > { %11923 = vrot.lane.b32.xlu0 %v13567_v5, %s12445_s16  ;;  %10800 = vmatpush1.bf16.msra.mxu0 %v10799_v7  ;;  %v11836_v13 = vunpack.i.h.bf16 %v13708_v9 }
 0x67e   : > { %v10830_v7 = vpack.c.bf16 %v11826_v54, %v11821_v3 }
 0x67f   : > { %v13710_v23 = vpop.permute.xlu0 %11828 }
 0x680   : > { %11928 = vrot.lane.b32.xlu1 %v13573_v8, %s12445_s16  ;;  %v13716_v50 = vpop.permute.xlu1 %11843  ;;  %v11831_v56 = vunpack.i.h.bf16 %v13710_v23  ;;  %v11830_v2 = vunpack.i.l.bf16 %v13710_v23  ;;  %v11835_v23 = vunpack.i.l.bf16 %v13708_v9 }
 0x681   : > { %11933 = vrot.lane.b32.xlu0 %v13203_v19, %s12445_s16  ;;  %v11846_v52 = vunpack.i.h.bf16 %v13716_v50  ;;  %v11845_v14 = vunpack.i.l.bf16 %v13716_v50 }
 0x683   : > { %v13718_v60 = vpop.permute.xlu0 %11838 }
 0x684   : > { %11938 = vrot.lane.b32.xlu1 %v13535_v55, %s12446_s19  ;;  %v11840_v62 = vunpack.i.l.bf16 %v13718_v60 }
 0x685   : > { %11943 = vrot.lane.b32.xlu0 %v13549_v38, %s12446_s19 }
 0x686   : > { %v5877_v63 = vsel %vm811_vm3, %v11846_v52, %v11840_v62 }
 0x687   : > { %v13730_v51 = vpop.permute.xlu0 %11848 }
 0x688   : > { %6477 = vrot.lane.b32.xlu1 %v13626_v30, %s12445_s16 }
 0x689   : > { %5867 = vrot.lane.b32.xlu0 %v13621_v10, %s12442_s2 }
 0x68c   : > { %5869 = vrot.lane.b32.xlu1 %v13638_v57, %s12442_s2 }
 0x68d   : > { %11948 = vrot.lane.b32.xlu0 %v13555_v4, %s12446_s19 }
 0x690   : > { %11953 = vrot.lane.b32.xlu1 %v13567_v5, %s12446_s19 }
 0x691   : > { %11958 = vrot.lane.b32.xlu0 %v13573_v8, %s12446_s19 }
 0x694   : > { %6071 = vrot.lane.b32.xlu1 %v13621_v10, %s12443_s3 }
 0x695   : > { %6073 = vrot.lane.b32.xlu0 %v13638_v57, %s12443_s3 }
 0x698   : > { %11963 = vrot.lane.b32.xlu1 %v13203_v19, %s12446_s19 }
 0x699   : > { %11968 = vrot.lane.b32.xlu0 %v13535_v55, %s12447_s20 }
 0x69c   : > { %11973 = vrot.lane.b32.xlu1 %v13549_v38, %s12447_s20 }
 0x69d   : > { %6275 = vrot.lane.b32.xlu0 %v13621_v10, %s12444_s8 }
 0x6a0   : > { %6277 = vrot.lane.b32.xlu1 %v13638_v57, %s12444_s8 }
 0x6a1   : > { %6681 = vrot.lane.b32.xlu0 %v13626_v30, %s12446_s19 }
 0x6a4   : > { %11978 = vrot.lane.b32.xlu1 %v13555_v4, %s12447_s20 }
 0x6a5   : > { %11983 = vrot.lane.b32.xlu0 %v13567_v5, %s12447_s20 }
 0x6a8   : > { %6479 = vrot.lane.b32.xlu1 %v13621_v10, %s12445_s16 }
 0x6a9   : > { %6481 = vrot.lane.b32.xlu0 %v13638_v57, %s12445_s16 }
 0x6ac   : > { %11988 = vrot.lane.b32.xlu1 %v13573_v8, %s12447_s20 }
 0x6ad   : > { %11993 = vrot.lane.b32.xlu0 %v13203_v19, %s12447_s20 }
 0x6b0   : > { %11998 = vrot.lane.b32.xlu1 %v13535_v55, %s12448_s21  ;;  %v13728_v55 = vpop.permute.xlu1 %11853 }
 0x6b1   : > { %6683 = vrot.lane.b32.xlu0 %v13621_v10, %s12446_s19 }
 0x6b4   : > { %6685 = vrot.lane.b32.xlu1 %v13638_v57, %s12446_s19  ;;  %v13736_v31 = vpop.permute.xlu1 %11858 }
 0x6b5   : > { %12003 = vrot.lane.b32.xlu0 %v13549_v38, %s12448_s21  ;;  %v13738_v38 = vpop.permute.xlu0 %11863 }
 0x6b8   : > { %6885 = vrot.lane.b32.xlu1 %v13626_v30, %s12447_s20 }
 0x6b9   : > { %12008 = vrot.lane.b32.xlu0 %v13555_v4, %s12448_s21  ;;  %v13748_v4 = vpop.permute.xlu1 %11868  ;;  %v13750_v32 = vpop.permute.xlu0 %11873 }
 0x6bc   : > { %6887 = vrot.lane.b32.xlu1 %v13621_v10, %s12447_s20 }
 0x6bd   : > { %6889 = vrot.lane.b32.xlu0 %v13638_v57, %s12447_s20  ;;  %v13757_v46 = vpop.permute.xlu1 %11878 }
 0x6c0   : > { %12013 = vrot.lane.b32.xlu1 %v13567_v5, %s12448_s21  ;;  %v7267_v5 = vld [vmem:[%s12581_s18 + $0x30] sm:$0xff] }
 0x6c1   : > { %12018 = vrot.lane.b32.xlu0 %v13573_v8, %s12448_s21  ;;  %v13759_v8 = vpop.permute.xlu0 %11883 }
 0x6c4   : > { %12023 = vrot.lane.b32.xlu1 %v13203_v19, %s12448_s21  ;;  %v13761_v19 = vpop.permute.xlu1 %11893 }
 0x6c5   : > { %7091 = vrot.lane.b32.xlu0 %v13621_v10, %s12448_s21  ;;  %v13763_v26 = vpop.permute.xlu0 %11888 }
 0x6c8   : > { %7093 = vrot.lane.b32.xlu1 %v13638_v57, %s12448_s21  ;;  %v13765_v35 = vpop.permute.xlu1 %11903 }
 0x6c9   : > { %7089 = vrot.lane.b32.xlu0 %v13626_v30, %s12448_s21  ;;  %v13767_v40 = vpop.permute.xlu0 %11898 }
 0x6cc   : > { %7270 = vperm.xlu1 %11546, %v7267_v5   ;;  %v13771_v34 = vpop.permute.xlu1 %11913  ;;  %v11841_v5 = vunpack.i.h.bf16 %v13718_v60  ;;  %v5872_v60 = vsel %vm811_vm3, %v11820_v37, %v11821_v3  ;;  %v11865_v3 = vunpack.i.l.bf16 %v13738_v38 }
 0x6cd   : > { %v13769_v20 = vpop.permute.xlu0 %11908 }
 0x6ce   : > { %v5878_v9 = vsel %vm811_vm3, %v11840_v62, %v11841_v5 }
 0x6e2   : > { %v13773_v53 = vpop.permute.xlu0 %5865  ;;  %v5520_v42 = vpop.permute.xlu1 %5519 }
 0x6e6   : > { %v13775_v28 = vpop.permute.xlu1 %6069 }
 0x6e7   : > { %v5524_v36 = vpop.permute.xlu0 %5523 }
 0x6e8   : > { %10298 = vmatpush3.msra.mxu1 %v5524_v36 }
 0x6e9   : > { %10815 = vmatprep.subr.bf16.mxu1 %v12438_v15  ;;  %10300 = vmatmul.mubr.msk.f32.vlgmr.msra.gmra.mrb[54].mxu1 %vm5550_vm4, %v9731_v61 }
 0x6ea   : > { %v5522_v59 = vpop.permute.xlu1 %5521  ;;  %10817 = vmatpush3.bf16.msra.mxu1 %v10816_v44  ;;  %10312 = vmatprep.mubr.msk.f32.mxu1 %vm12441_vm1, %v12440_v18  ;;  %v10833_v44 = vpack.c.bf16 %v11841_v5, %v11836_v13 }
 0x6eb   : > { %v13786_v41 = vpop.permute.xlu0 %6273  ;;  %v5534_v58 = vsel %vm497_vm2, %v5522_v59, %v5524_v36  ;;  %v5533_v1 = vsel %vm497_vm2, %v5520_v42, %v5522_v59  ;;  %10818 = vmatprep.subr.bf16.mxu1 %v12438_v15  ;;  %v5874_v42 = vsel %vm811_vm3, %v11825_v43, %v11826_v54  ;;  %v11861_v54 = vunpack.i.h.bf16 %v13736_v31 }
 0x6ec   : > { %5562 = vmatprep.subr.mxu0 %v5534_v58  ;;  %v10821_v59 = vpack.c.bf16 %v5874_v42, %v5872_v60 }
 0x6ed   : > { %5563 = vmatpush1.msra.mxu0 %v5533_v1  ;;  %v5876_v1 = vsel %vm811_vm3, %v11835_v23, %v11836_v13 }
 0x6ee   : > { %v13796_v12 = vpop.permute.xlu1 %11918  ;;  %10808 = vmatprep.subr.bf16.mxu0 %v10807_v48  ;;  %10820 = vmatpush3.bf16.msra.mxu1 %v10819_v17  ;;  %v11856_v48 = vunpack.i.h.bf16 %v13728_v55  ;;  %v11851_v17 = vunpack.i.h.bf16 %v13730_v51  ;;  %v10825_v50 = vpack.c.bf16 %v5878_v9, %v5876_v1 }
 0x6ef   : > { %v13798_v49 = vpop.permute.xlu0 %11923  ;;  %9732 = vmatmul.mubr.msk.f32.vlgmr.msra.gmra.mrb[6].mxu0 %vm5550_vm4, %v9731_v61  ;;  %10310 = vmatprep.subr.mxu1 %v12440_v18  ;;  %v5873_v61 = vsel %vm811_vm3, %v11831_v56, %v11825_v43  ;;  %v11871_v43 = vunpack.i.h.bf16 %v13748_v4  ;;  %v9736_v56 = vld [vmem:[%s12566_s23 + $0x10] sm:$0xff] }
 0x6f0   : > { %10810 = vmatpush1.bf16.msra.mxu0 %v10809_v11  ;;  %5762 = vmatprep.mubr.f32.mxu0 %v12440_v18  ;;  %v11850_v11 = vunpack.i.l.bf16 %v13730_v51  ;;  %v5875_v51 = vsel %vm811_vm3, %v11845_v14, %v11835_v23  ;;  %v11875_v23 = vunpack.i.l.bf16 %v13750_v32 }
 0x6f1   : > { %10812 = vmatprep.subr.bf16.mxu0 %v10811_v0 }
 0x6f2   : > { %v13812_v6 = vpop.permute.xlu1 %11928  ;;  %10311 = vmatpush3.msra.mxu1 %v13638_v57  ;;  %v5871_v57 = vsel %vm811_vm3, %v11830_v2, %v11820_v37  ;;  %v11870_v37 = vunpack.i.l.bf16 %v13748_v4  ;;  %v6076_v62 = vsel %vm983_vm5, %v11850_v11, %v11851_v17  ;;  %v11876_v4 = vunpack.i.h.bf16 %v13750_v32 }
 0x6f3   : > { %v13815_v47 = vpop.permute.xlu0 %11933  ;;  %10829 = vmatprep.subr.bf16.mxu1 %v12438_v15  ;;  %10313 = vmatmul.mubr.msk.f32.vlgmr.msra.gmra.mrb[56].mxu1 %vm5550_vm4, %v5477_v16  ;;  %v10823_v58 = vpack.c.bf16 %v5873_v61, %v5871_v57  ;;  %v10844_v61 = vpack.c.bf16 %v11856_v48, %v11851_v17  ;;  %v11885_v17 = vunpack.i.l.bf16 %v13759_v8 }
 0x6f4   : > { %10814 = vmatpush1.bf16.msra.mxu0 %v10813_v22  ;;  %10831 = vmatpush3.bf16.msra.mxu1 %v10830_v7  ;;  %v6082_v57 = vsel %vm983_vm5, %v11870_v37, %v11871_v43 }
 0x6f5   : > { %5706 = vmatprep.subr.mxu0 %v13621_v10  ;;  %10832 = vmatprep.subr.bf16.mxu1 %v12438_v15  ;;  %v11855_v10 = vunpack.i.l.bf16 %v13728_v55  ;;  %v11860_v55 = vunpack.i.l.bf16 %v13736_v31  ;;  %v10827_v31 = vpack.c.bf16 %v5877_v63, %v5875_v51  ;;  %v11886_v63 = vunpack.i.h.bf16 %v13759_v8 }
 0x6f6   : > { %v13830_v36 = vpop.permute.xlu1 %11938  ;;  %10325 = vmatprep.mubr.msk.f32.mxu1 %vm12441_vm1, %v12440_v18  ;;  %v11896_v51 = vunpack.i.h.bf16 %v13761_v19 }
 0x6f7   : > { %v13837_v22 = vpop.permute.xlu0 %11943  ;;  %v6078_v2 = vsel %vm983_vm5, %v11855_v10, %v11856_v48  ;;  %v6077_v7 = vsel %vm983_vm5, %v11861_v54, %v11855_v10  ;;  %v6081_v48 = vsel %vm983_vm5, %v11876_v4, %v11870_v37  ;;  %v11881_v10 = vunpack.i.h.bf16 %v13757_v46  ;;  %v9739_v37 = vld [vmem:[%s12566_s23 + $0x18] sm:$0xff] }
 0x6f8   : > { %5707 = vmatpush1.msra.mxu0 %v13626_v30  ;;  %10834 = vmatpush3.bf16.msra.mxu1 %v10833_v44  ;;  %v11866_v30 = vunpack.i.h.bf16 %v13738_v38  ;;  %v6075_v38 = vsel %vm983_vm5, %v11860_v55, %v11850_v11  ;;  %v10835_v9 = vpack.c.bf16 %v6078_v2, %v6076_v62  ;;  %v11891_v11 = vunpack.i.h.bf16 %v13763_v26 }
 0x6f9   : > { %10822 = vmatprep.subr.bf16.mxu0 %v10821_v59  ;;  %9734 = vmatmul.mubr.msk.f32.vlgmr.msra.gmra.mrb[6].mxu0 %vm5550_vm4, %v5477_v16  ;;  %v10837_v52 = vpack.c.bf16 %v6077_v7, %v6075_v38  ;;  %v6079_v59 = vsel %vm983_vm5, %v11875_v23, %v11865_v3  ;;  %v11900_v54 = vunpack.i.l.bf16 %v13767_v40  ;;  %v11906_v7 = vunpack.i.h.bf16 %v13765_v35 }
 0x6fa   : > { %10824 = vmatpush1.bf16.msra.mxu0 %v10823_v58  ;;  %v13851_v0 = vpop.permute.xlu1 %6477  ;;  %10323 = vmatprep.subr.mxu1 %v12440_v18  ;;  %v6080_v13 = vsel %vm983_vm5, %v11865_v3, %v11866_v30  ;;  %v11880_v58 = vunpack.i.l.bf16 %v13757_v46  ;;  %v10847_v1 = vpack.c.bf16 %v11871_v43, %v11866_v30  ;;  %v11901_v46 = vunpack.i.h.bf16 %v13767_v40 }
 0x6fb   : > { %10826 = vmatprep.subr.bf16.mxu0 %v10825_v50  ;;  %v5868_v16 = vpop.permute.xlu0 %5867  ;;  %5963 = vmatprep.mubr.f32.mxu0 %v12440_v18  ;;  %v10839_v14 = vpack.c.bf16 %v6082_v57, %v6080_v13  ;;  %v11890_v50 = vunpack.i.l.bf16 %v13763_v26  ;;  %v10841_v30 = vpack.c.bf16 %v6081_v48, %v6079_v59  ;;  %v11895_v43 = vunpack.i.l.bf16 %v13761_v19 }
 0x6fc   : > { %v5879_v44 = vsel %vm811_vm3, %v13773_v53, %v5868_v16  ;;  %v6280_v8 = vsel %vm1155_vm6, %v11880_v58, %v11881_v10  ;;  %v6286_v38 = vsel %vm1155_vm6, %v11900_v54, %v11901_v46  ;;  %v11905_v19 = vunpack.i.l.bf16 %v13765_v35 }
 0x6fd   : > { %v6279_v40 = vsel %vm1155_vm6, %v11890_v50, %v11880_v58  ;;  %v11916_v4 = vunpack.i.h.bf16 %v13771_v34  ;;  %v11915_v23 = vunpack.i.l.bf16 %v13771_v34  ;;  %v6284_v57 = vsel %vm1155_vm6, %v11895_v43, %v11896_v51 }
 0x6fe   : > { %10828 = vmatpush1.bf16.msra.mxu0 %v10827_v31  ;;  %v5870_v5 = vpop.permute.xlu1 %5869  ;;  %v6281_v31 = vsel %vm1155_vm6, %v11891_v11, %v11885_v17  ;;  %v6285_v35 = vsel %vm1155_vm6, %v11906_v7, %v11900_v54  ;;  %v11920_v34 = vunpack.i.l.bf16 %v13796_v12  ;;  %v6283_v59 = vsel %vm1155_vm6, %v11905_v19, %v11895_v43  ;;  %v9742_v54 = vld [vmem:[%s12566_s23 + $0x20] sm:$0xff] }
 0x6ff   : > { %v13866_v60 = vpop.permute.xlu0 %11948  ;;  %10324 = vmatpush3.msra.mxu1 %v5870_v5  ;;  %v5880_v42 = vsel %vm811_vm3, %v5868_v16, %v5870_v5  ;;  %v6282_v16 = vsel %vm1155_vm6, %v11885_v17, %v11886_v63  ;;  %v10855_v58 = vpack.c.bf16 %v6285_v35, %v6283_v59  ;;  %v11925_v50 = vunpack.i.l.bf16 %v13798_v49 }
 0x700   : > { %5907 = vmatprep.subr.mxu0 %v5880_v42  ;;  %10326 = vmatmul.mubr.msk.f32.vlgmr.msra.gmra.mrb[58].mxu1 %vm5550_vm4, %v9736_v56  ;;  %v10849_v13 = vpack.c.bf16 %v6282_v16, %v6280_v8  ;;  %v10851_v42 = vpack.c.bf16 %v6281_v31, %v6279_v40  ;;  %v11946_v19 = vunpack.i.h.bf16 %v13837_v22 }
 0x701   : > { %10843 = vmatprep.subr.bf16.mxu1 %v12438_v15  ;;  %10338 = vmatprep.mubr.msk.f32.mxu1 %vm12441_vm1, %v12440_v18 }
 0x702   : > { %5908 = vmatpush1.msra.mxu0 %v5879_v44  ;;  %10845 = vmatpush3.bf16.msra.mxu1 %v10844_v61  ;;  %v13876_v32 = vpop.permute.xlu1 %11953  ;;  %v11911_v61 = vunpack.i.h.bf16 %v13769_v20  ;;  %v11910_v44 = vunpack.i.l.bf16 %v13769_v20  ;;  %v11931_v20 = vunpack.i.h.bf16 %v13812_v6 }
 0x703   : > { %10836 = vmatprep.subr.bf16.mxu0 %v10835_v9  ;;  %v13882_v53 = vpop.permute.xlu0 %11958  ;;  %9737 = vmatmul.mubr.msk.f32.vlgmr.msra.gmra.mrb[6].mxu0 %vm5550_vm4, %v9736_v56  ;;  %v10858_v56 = vpack.c.bf16 %v11886_v63, %v11881_v10  ;;  %v10861_v9 = vpack.c.bf16 %v11901_v46, %v11896_v51  ;;  %v11930_v10 = vunpack.i.l.bf16 %v13812_v6  ;;  %v6486_v63 = vsel %vm1327_vm7, %v11915_v23, %v11916_v4 }
 0x704   : > { %10838 = vmatpush1.bf16.msra.mxu0 %v10837_v52  ;;  %10846 = vmatprep.subr.bf16.mxu1 %v12438_v15  ;;  %v11921_v52 = vunpack.i.h.bf16 %v13796_v12  ;;  %v11926_v12 = vunpack.i.h.bf16 %v13798_v49  ;;  %v6483_v17 = vsel %vm1327_vm7, %v11920_v34, %v11910_v44  ;;  %v11935_v6 = vunpack.i.l.bf16 %v13815_v47 }
 0x705   : > { %10840 = vmatprep.subr.bf16.mxu0 %v10839_v14  ;;  %6167 = vmatprep.mubr.f32.mxu0 %v12440_v18  ;;  %v10872_v8 = vpack.c.bf16 %v11916_v4, %v11911_v61  ;;  %v6490_v51 = vsel %vm1327_vm7, %v11930_v10, %v11931_v20  ;;  %v11950_v4 = vunpack.i.l.bf16 %v13866_v60 }
 0x706   : > { %10848 = vmatpush3.bf16.msra.mxu1 %v10847_v1  ;;  %v6072_v55 = vpop.permute.xlu1 %6071  ;;  %v6484_v1 = vsel %vm1327_vm7, %v11910_v44, %v11911_v61  ;;  %v6485_v11 = vsel %vm1327_vm7, %v11921_v52, %v11915_v23  ;;  %v6488_v40 = vsel %vm1327_vm7, %v11925_v50, %v11926_v12  ;;  %v11956_v23 = vunpack.i.h.bf16 %v13876_v32 }
 0x707   : > { %v6074_v3 = vpop.permute.xlu0 %6073  ;;  %10336 = vmatprep.subr.mxu1 %v12440_v18  ;;  %v6083_v62 = vsel %vm983_vm5, %v13775_v28, %v6072_v55  ;;  %v10853_v28 = vpack.c.bf16 %v6286_v38, %v6284_v57  ;;  %v10863_v43 = vpack.c.bf16 %v6486_v63, %v6484_v1  ;;  %v11940_v38 = vunpack.i.l.bf16 %v13830_v36 }
 0x708   : > { %10842 = vmatpush1.bf16.msra.mxu0 %v10841_v30  ;;  %v6084_v26 = vsel %vm983_vm5, %v6072_v55, %v6074_v3  ;;  %v11936_v55 = vunpack.i.h.bf16 %v13815_v47  ;;  %v6487_v47 = vsel %vm1327_vm7, %v11935_v6, %v11925_v50  ;;  %v11960_v57 = vunpack.i.l.bf16 %v13882_v53 }
 0x709   : > { %6111 = vmatprep.subr.mxu0 %v6084_v26  ;;  %v10865_v26 = vpack.c.bf16 %v6485_v11, %v6483_v17  ;;  %v6687_v44 = vsel %vm1499_vm8, %v11950_v4, %v11940_v38 }
 0x70a   : > { %10337 = vmatpush3.msra.mxu1 %v6074_v3  ;;  %v13902_v2 = vpop.permute.xlu1 %11963  ;;  %v6489_v31 = vsel %vm1327_vm7, %v11936_v55, %v11930_v10 }
 0x70b   : > { %10339 = vmatmul.mubr.msk.f32.vlgmr.msra.gmra.mrb[60].mxu1 %vm5550_vm4, %v9739_v37  ;;  %10857 = vmatprep.subr.bf16.mxu1 %v12438_v15  ;;  %v13909_v5 = vpop.permute.xlu0 %11968  ;;  %v10869_v35 = vpack.c.bf16 %v6489_v31, %v6487_v47  ;;  %v11966_v52 = vunpack.i.h.bf16 %v13902_v2  ;;  %v11965_v34 = vunpack.i.l.bf16 %v13902_v2 }
 0x70c   : > { %6112 = vmatpush1.msra.mxu0 %v6083_v62  ;;  %10859 = vmatpush3.bf16.msra.mxu1 %v10858_v56  ;;  %v11941_v56 = vunpack.i.h.bf16 %v13830_v36  ;;  %v11945_v62 = vunpack.i.l.bf16 %v13837_v22  ;;  %v11955_v36 = vunpack.i.l.bf16 %v13876_v32  ;;  %v11971_v50 = vunpack.i.h.bf16 %v13909_v5 }
 0x70d   : > { %10850 = vmatprep.subr.bf16.mxu0 %v10849_v13  ;;  %9740 = vmatmul.mubr.msk.f32.vlgmr.msra.gmra.mrb[6].mxu0 %vm5550_vm4, %v9739_v37  ;;  %v10875_v37 = vpack.c.bf16 %v11931_v20, %v11926_v12  ;;  %v11951_v13 = vunpack.i.h.bf16 %v13866_v60  ;;  %v6693_v17 = vsel %vm1499_vm8, %v11966_v52, %v11960_v57  ;;  %v11970_v6 = vunpack.i.l.bf16 %v13909_v5 }
 0x70e   : > { %10852 = vmatpush1.bf16.msra.mxu0 %v10851_v42  ;;  %v13922_v14 = vpop.permute.xlu1 %11973  ;;  %10860 = vmatprep.subr.bf16.mxu1 %v12438_v15  ;;  %v11961_v42 = vunpack.i.h.bf16 %v13882_v53  ;;  %v6688_v61 = vsel %vm1499_vm8, %v11940_v38, %v11941_v56  ;;  %v6692_v59 = vsel %vm1499_vm8, %v11955_v36, %v11956_v23  ;;  %v10886_v20 = vpack.c.bf16 %v11946_v19, %v11941_v56 }
 0x70f   : > { %10854 = vmatprep.subr.bf16.mxu0 %v10853_v28  ;;  %v6276_v48 = vpop.permute.xlu0 %6275  ;;  %10351 = vmatprep.mubr.msk.f32.mxu1 %vm12441_vm1, %v12440_v18  ;;  %v6689_v32 = vsel %vm1499_vm8, %v11951_v13, %v11945_v62  ;;  %v9745_v28 = vld [vmem:[%s12566_s23 + $0x28] sm:$0xff]  ;;  %v6691_v11 = vsel %vm1499_vm8, %v11965_v34, %v11955_v36 }
 0x710   : > { %10862 = vmatpush3.bf16.msra.mxu1 %v10861_v9  ;;  %6371 = vmatprep.mubr.f32.mxu0 %v12440_v18  ;;  %v6287_v49 = vsel %vm1155_vm6, %v13786_v41, %v6276_v48  ;;  %v10867_v41 = vpack.c.bf16 %v6490_v51, %v6488_v40  ;;  %v6690_v9 = vsel %vm1499_vm8, %v11945_v62, %v11946_v19  ;;  %v9748_v40 = vld [vmem:[%s12566_s23 + $0x30] sm:$0xff] }
 0x711   : > { %10349 = vmatprep.subr.mxu1 %v12440_v18  ;;  %v10877_v1 = vpack.c.bf16 %v6690_v9, %v6688_v61  ;;  %v10879_v2 = vpack.c.bf16 %v6689_v32, %v6687_v44 }
 0x712   : > { %10856 = vmatpush1.bf16.msra.mxu0 %v10855_v58  ;;  %v6278_v46 = vpop.permute.xlu1 %6277 }
 0x713   : > { %v13941_v30 = vpop.permute.xlu0 %6681  ;;  %v6288_v3 = vsel %vm1155_vm6, %v6276_v48, %v6278_v46  ;;  %v6694_v48 = vsel %vm1499_vm8, %v11960_v57, %v11961_v42 }
 0x714   : > { %10350 = vmatpush3.msra.mxu1 %v6278_v46  ;;  %6315 = vmatprep.subr.mxu0 %v6288_v3  ;;  %v10881_v63 = vpack.c.bf16 %v6694_v48, %v6692_v59  ;;  %v10889_v46 = vpack.c.bf16 %v11961_v42, %v11956_v23 }
 0x715   : > { %10352 = vmatmul.mubr.msk.f32.vlgmr.msra.gmra.mrb[62].mxu1 %vm5550_vm4, %v9742_v54  ;;  %10871 = vmatprep.subr.bf16.mxu1 %v12438_v15 }
 0x716   : > { %6316 = vmatpush1.msra.mxu0 %v6287_v49  ;;  %10873 = vmatpush3.bf16.msra.mxu1 %v10872_v8  ;;  %v13950_v16 = vpop.permute.xlu1 %11978 }
 0x717   : > { %10864 = vmatprep.subr.bf16.mxu0 %v10863_v43  ;;  %v13956_v7 = vpop.permute.xlu0 %11983  ;;  %9743 = vmatmul.mubr.msk.f32.vlgmr.msra.gmra.mrb[6].mxu0 %vm5550_vm4, %v9742_v54  ;;  %v11976_v54 = vunpack.i.h.bf16 %v13922_v14  ;;  %v11980_v55 = vunpack.i.l.bf16 %v13950_v16  ;;  %v11981_v8 = vunpack.i.h.bf16 %v13950_v16  ;;  %v6892_v43 = vsel %vm1671_vm9, %v11970_v6, %v11971_v50 }
 0x718   : > { %10866 = vmatpush1.bf16.msra.mxu0 %v10865_v26  ;;  %10874 = vmatprep.subr.bf16.mxu1 %v12438_v15  ;;  %v11985_v47 = vunpack.i.l.bf16 %v13956_v7 }
 0x719   : > { %10868 = vmatprep.subr.bf16.mxu0 %v10867_v41  ;;  %10364 = vmatprep.mubr.msk.f32.mxu1 %vm12441_vm1, %v12440_v18  ;;  %v6891_v26 = vsel %vm1671_vm9, %v11980_v55, %v11970_v6  ;;  %v10900_v13 = vpack.c.bf16 %v11976_v54, %v11971_v50 }
 0x71a   : > { %10876 = vmatpush3.bf16.msra.mxu1 %v10875_v37  ;;  %v6480_v22 = vpop.permute.xlu1 %6479  ;;  %6575 = vmatprep.mubr.f32.mxu0 %v12440_v18  ;;  %v11986_v37 = vunpack.i.h.bf16 %v13956_v7 }
 0x71b   : > { %v6482_v60 = vpop.permute.xlu0 %6481  ;;  %10362 = vmatprep.subr.mxu1 %v12440_v18  ;;  %v6491_v12 = vsel %vm1327_vm7, %v13851_v0, %v6480_v22  ;;  %v11975_v0 = vunpack.i.l.bf16 %v13922_v14  ;;  %v10883_v14 = vpack.c.bf16 %v6693_v17, %v6691_v11 }
 0x71c   : > { %10870 = vmatpush1.bf16.msra.mxu0 %v10869_v35  ;;  %v6492_v53 = vsel %vm1327_vm7, %v6480_v22, %v6482_v60  ;;  %v6896_v57 = vsel %vm1671_vm9, %v11985_v47, %v11986_v37 }
 0x71d   : > { %6519 = vmatprep.subr.mxu0 %v6492_v53  ;;  %v6894_v31 = vsel %vm1671_vm9, %v11975_v0, %v11976_v54  ;;  %v6893_v56 = vsel %vm1671_vm9, %v11981_v8, %v11975_v0 }
 0x71e   : > { %10363 = vmatpush3.msra.mxu1 %v6482_v60  ;;  %v13982_v10 = vpop.permute.xlu1 %11988  ;;  %v10891_v23 = vpack.c.bf16 %v6894_v31, %v6892_v43  ;;  %v10893_v42 = vpack.c.bf16 %v6893_v56, %v6891_v26  ;;  %v9754_v31 = vld [vmem:[%s12566_s23 + $0x40] sm:$0xff] }
 0x71f   : > { %10365 = vmatmul.mubr.msk.f32.vlgmr.msra.gmra.mrb[64].mxu1 %vm5550_vm4, %v9745_v28  ;;  %10885 = vmatprep.subr.bf16.mxu1 %v12438_v15  ;;  %v11994_v58 = vpop.permute.xlu0 %11993  ;;  %v11991_v51 = vunpack.i.h.bf16 %v13982_v10  ;;  %v11990_v49 = vunpack.i.l.bf16 %v13982_v10  ;;  %v9751_v10 = vld [vmem:[%s12566_s23 + $0x38] sm:$0xff] }
 0x720   : > { %6520 = vmatpush1.msra.mxu0 %v6491_v12  ;;  %10887 = vmatpush3.bf16.msra.mxu1 %v10886_v20  ;;  %v11996_v38 = vunpack.i.h.bf16 %v11994_v58  ;;  %v11995_v41 = vunpack.i.l.bf16 %v11994_v58 }
 0x721   : > { %10878 = vmatprep.subr.bf16.mxu0 %v10877_v1  ;;  %9746 = vmatmul.mubr.msk.f32.vlgmr.msra.gmra.mrb[6].mxu0 %vm5550_vm4, %v9745_v28  ;;  %v6898_v4 = vsel %vm1671_vm9, %v11990_v49, %v11991_v51  ;;  %v10903_v32 = vpack.c.bf16 %v11991_v51, %v11986_v37 }
 0x722   : > { %10880 = vmatpush1.bf16.msra.mxu0 %v10879_v2  ;;  %v13996_v3 = vpop.permute.xlu1 %11998  ;;  %10888 = vmatprep.subr.bf16.mxu1 %v12438_v15  ;;  %v6895_v22 = vsel %vm1671_vm9, %v11995_v41, %v11985_v47  ;;  %v6897_v35 = vsel %vm1671_vm9, %v11996_v38, %v11990_v49  ;;  %v10895_v61 = vpack.c.bf16 %v6898_v4, %v6896_v57 }
 0x723   : > { %10882 = vmatprep.subr.bf16.mxu0 %v10881_v63  ;;  %v6684_v5 = vpop.permute.xlu0 %6683  ;;  %10377 = vmatprep.mubr.msk.f32.mxu1 %vm12441_vm1, %v12440_v18  ;;  %v12001_v9 = vunpack.i.h.bf16 %v13996_v3  ;;  %v12000_v52 = vunpack.i.l.bf16 %v13996_v3  ;;  %v10897_v59 = vpack.c.bf16 %v6897_v35, %v6895_v22 }
 0x724   : > { %10890 = vmatpush3.bf16.msra.mxu1 %v10889_v46  ;;  %6779 = vmatprep.mubr.f32.mxu0 %v12440_v18  ;;  %v6695_v7 = vsel %vm1499_vm8, %v13941_v30, %v6684_v5 }
 0x725   : > { %10375 = vmatprep.subr.mxu1 %v12440_v18  ;;  %v7096_v17 = vsel %vm1843_vm10, %v12000_v52, %v12001_v9 }
 0x726   : > { %10884 = vmatpush1.bf16.msra.mxu0 %v10883_v14  ;;  %v6686_v16 = vpop.permute.xlu1 %6685 }
 0x727   : > { %v12004_v19 = vpop.permute.xlu0 %12003  ;;  %v6696_v62 = vsel %vm1499_vm8, %v6684_v5, %v6686_v16 }
 0x728   : > { %10376 = vmatpush3.msra.mxu1 %v6686_v16  ;;  %6723 = vmatprep.subr.mxu0 %v6696_v62  ;;  %v12006_v44 = vunpack.i.h.bf16 %v12004_v19  ;;  %v12005_v53 = vunpack.i.l.bf16 %v12004_v19 }
 0x729   : > { %10378 = vmatmul.mubr.msk.f32.vlgmr.msra.gmra.mrb[66].mxu1 %vm5550_vm4, %v9748_v40  ;;  %10899 = vmatprep.subr.bf16.mxu1 %v12438_v15 }
 0x72a   : > { %6724 = vmatpush1.msra.mxu0 %v6695_v7  ;;  %10901 = vmatpush3.bf16.msra.mxu1 %v10900_v13  ;;  %v6886_v36 = vpop.permute.xlu1 %6885  ;;  %v7098_v58 = vsel %vm1843_vm10, %v12005_v53, %v12006_v44  ;;  %v10914_v2 = vpack.c.bf16 %v12006_v44, %v12001_v9 }
 0x72b   : > { %10892 = vmatprep.subr.bf16.mxu0 %v10891_v23  ;;  %v12009_v60 = vpop.permute.xlu0 %12008  ;;  %9749 = vmatmul.mubr.msk.f32.vlgmr.msra.gmra.mrb[6].mxu0 %vm5550_vm4, %v9748_v40  ;;  %v10905_v54 = vpack.c.bf16 %v7098_v58, %v7096_v17 }
 0x72c   : > { %10894 = vmatpush1.bf16.msra.mxu0 %v10893_v42  ;;  %10902 = vmatprep.subr.bf16.mxu1 %v12438_v15  ;;  %v12011_v30 = vunpack.i.h.bf16 %v12009_v60  ;;  %v12010_v28 = vunpack.i.l.bf16 %v12009_v60 }
 0x72d   : > { %10896 = vmatprep.subr.bf16.mxu0 %v10895_v61  ;;  %10390 = vmatprep.mubr.msk.f32.mxu1 %vm12441_vm1, %v12440_v18 }
 0x72e   : > { %10904 = vmatpush3.bf16.msra.mxu1 %v10903_v32  ;;  %v6888_v34 = vpop.permute.xlu1 %6887  ;;  %6983 = vmatprep.mubr.f32.mxu0 %v12440_v18  ;;  %v7095_v12 = vsel %vm1843_vm10, %v12010_v28, %v12000_v52  ;;  %v7097_v1 = vsel %vm1843_vm10, %v12011_v30, %v12005_v53 }
 0x72f   : > { %v6890_v48 = vpop.permute.xlu0 %6889  ;;  %10388 = vmatprep.subr.mxu1 %v12440_v18  ;;  %v6899_v11 = vsel %vm1671_vm9, %v6886_v36, %v6888_v34  ;;  %v10907_v3 = vpack.c.bf16 %v7097_v1, %v7095_v12 }
 0x730   : > { %10898 = vmatpush1.bf16.msra.mxu0 %v10897_v59  ;;  %v6900_v20 = vsel %vm1671_vm9, %v6888_v34, %v6890_v48 }
 0x731   : > { %6927 = vmatprep.subr.mxu0 %v6900_v20 }
 0x732   : > { %10389 = vmatpush3.msra.mxu1 %v6890_v48  ;;  %v12014_v63 = vpop.permute.xlu1 %12013 }
 0x733   : > { %v12016_v50 = vunpack.i.h.bf16 %v12014_v63  ;;  %v12015_v6 = vunpack.i.l.bf16 %v12014_v63  ;;  %10391 = vmatmul.mubr.msk.f32.vlgmr.msra.gmra.mrb[68].mxu1 %vm5550_vm4, %v9751_v10  ;;  %10913 = vmatprep.subr.bf16.mxu1 %v12438_v15  ;;  %v12019_v46 = vpop.permute.xlu0 %12018 }
 0x734   : > { %v12021_v0 = vunpack.i.h.bf16 %v12019_v46  ;;  %v12020_v55 = vunpack.i.l.bf16 %v12019_v46  ;;  %6928 = vmatpush1.msra.mxu0 %v6899_v11  ;;  %10915 = vmatpush3.bf16.msra.mxu1 %v10914_v2 }
 0x735   : > { %10906 = vmatprep.subr.bf16.mxu0 %v10905_v54  ;;  %9752 = vmatmul.mubr.msk.f32.vlgmr.msra.gmra.mrb[6].mxu0 %vm5550_vm4, %v9751_v10  ;;  %v7100_v8 = vsel %vm1843_vm10, %v12015_v6, %v12016_v50 }
 0x736   : > { %v10917_v5 = vpack.c.bf16 %v12021_v0, %v12016_v50  ;;  %10908 = vmatpush1.bf16.msra.mxu0 %v10907_v3  ;;  %v12024_v51 = vpop.permute.xlu1 %12023  ;;  %10916 = vmatprep.subr.bf16.mxu1 %v12438_v15  ;;  %v7102_v49 = vsel %vm1843_vm10, %v12020_v55, %v12021_v0  ;;  %v14056_v3 = vld [vmem:[#allocation2 + $0x8] sm:$0xff] }
 0x737   : > { %v12026_v14 = vunpack.i.h.bf16 %v12024_v51  ;;  %v12025_v43 = vunpack.i.l.bf16 %v12024_v51  ;;  %v7092_v26 = vpop.permute.xlu0 %7091  ;;  %v10909_v37 = vpack.c.bf16 %v7102_v49, %v7100_v8  ;;  %10403 = vmatprep.mubr.msk.f32.mxu1 %vm12441_vm1, %v12440_v18  ;;  %7187 = vmatprep.mubr.f32.mxu0 %v12440_v18  ;;  %v14058_v8 = vld [vmem:[#allocation2 + $0x10] sm:$0xff] }
 0x738   : > { %10918 = vmatpush3.bf16.msra.mxu1 %v10917_v5  ;;  %v14065_v49 = vpack.i.bf16 %v14058_v8, %v14056_v3 }
 0x739   : > { %v7101_v47 = vsel %vm1843_vm10, %v12026_v14, %v12020_v55  ;;  %v7099_v16 = vsel %vm1843_vm10, %v12025_v43, %v12015_v6  ;;  %10910 = vmatprep.subr.bf16.mxu0 %v10909_v37  ;;  %10401 = vmatprep.subr.mxu1 %v12440_v18  ;;  %v14067_v14 = vld [vmem:[#allocation2 + $0x20] sm:$0xff]  ;;  %v14069_v43 = vld [vmem:[#allocation2 + $0x28] sm:$0xff] }
 0x73a   : > { %v10911_v15 = vpack.c.bf16 %v7101_v47, %v7099_v16  ;;  %v7094_v40 = vpop.permute.xlu1 %7093  ;;  %v14072_v37 = vld [vmem:[#allocation2] sm:$0xff]  ;;  %v14074_v47 = vld [vmem:[#allocation2 + $0x18] sm:$0xff]  ;;  %v14079_v16 = vpack.i.bf16 %v14069_v43, %v14067_v14 }
 0x73b   : > { %v7104_v56 = vsel %vm1843_vm10, %v7092_v26, %v7094_v40  ;;  %v7090_v38 = vpop.permute.xlu0 %7089 }
 0x73c   : > { %10912 = vmatpush1.bf16.msra.mxu0 %v10911_v15  ;;  %10402 = vmatpush3.msra.mxu1 %v7094_v40  ;;  %v7103_v41 = vsel %vm1843_vm10, %v7090_v38, %v7092_v26  ;;  %v14085_v15 = vpack.i.bf16 %v14074_v47, %v14072_v37  ;;  %v14087_v40 = vld [vmem:[#allocation2 + $0x38] sm:$0xff] }
 0x73d   : > { %7131 = vmatprep.subr.mxu0 %v7104_v56  ;;  %10404 = vmatmul.mubr.msk.f32.vlgmr.msra.gmra.mrb[70].mxu1 %vm5550_vm4, %v9754_v31  ;;  %v14099_v38 = vld [vmem:[#allocation2 + $0x58] sm:$0xff] }
 0x740   : > { %7132 = vmatpush1.msra.mxu0 %v7103_v41  ;;  %v14101_v41 = vld [vmem:[#allocation2 + $0x50] sm:$0xff] }
 0x741   : > { %9755 = vmatmul.mubr.msk.f32.vlgmr.msra.gmra.mrb[6].mxu0 %vm5550_vm4, %v9754_v31  ;;  %v14089_v31 = vld [vmem:[#allocation2 + $0x40] sm:$0xff] }
 0x742   : > { %7483 = vmatprep.mubr.f32.mxu0 %v12440_v18  ;;  %v14097_v56 = vpack.i.bf16 %v14089_v31, %v14087_v40 }
 0x74b   : > { %v7271_v12 = vpop.permute.xlu1 %7270 }
 0x7bc   : > { %v5691_v19 = vpop.f32.mrb[54].mxu1 }
 0x7bd   : > { %v10301_v62 = vpop.f32.mrb[55].mxu1 }
 0x7be   : > { %v14107_v62 = vld [vmem:[#allocation2 + $0x70] sm:$0xff] }
 0x7c6   : > { %v5835_v13 = vpop.f32.mrb[56].mxu1 }
 0x7c7   : > { %v5836_v4 = vadd.f32 %v5835_v13, %v5691_v19  ;;  %v10314_v7 = vpop.f32.mrb[57].mxu1  ;;  %v12047_v19 = vpack.i.bf16 %v14099_v38, %v14101_v41  ;;  %v12395_v13 = vld [vmem:[#allocation2 + $0x48] sm:$0xff] }
 0x7d3   : > { %v6036_v23 = vpop.f32.mrb[58].mxu1 }
 0x7d4   : > { %v6042_v36 = vadd.f32 %v6036_v23, %v5836_v4  ;;  %v10327_v42 = vpop.f32.mrb[59].mxu1  ;;  %v12396_v4 = vld [vmem:[#allocation2 + $0x30] sm:$0xff]  ;;  %v14110_v23 = vld [vmem:[#allocation2 + $0x68] sm:$0xff] }
 0x7d5   : > { %v12052_v7 = vpack.i.bf16 %v12395_v13, %v12396_v4 }
 0x7de   : > { %v6240_v57 = vpop.f32.mrb[60].mxu1 }
 0x7df   : > { %v6246_v22 = vadd.f32 %v6240_v57, %v6042_v36  ;;  %v10340_v35 = vpop.f32.mrb[61].mxu1  ;;  %v14114_v36 = vpack.i.bf16 %v14107_v62, %v14110_v23 }
 0x7e8   : > { %v6444_v60 = vpop.f32.mrb[62].mxu1 }
 0x7e9   : > { %v6450_v61 = vadd.f32 %v6444_v60, %v6246_v22  ;;  %v10353_v32 = vpop.f32.mrb[63].mxu1 }
 0x7f2   : > { %v6648_v44 = vpop.f32.mrb[64].mxu1 }
 0x7f3   : > { %v6654_v53 = vadd.f32 %v6648_v44, %v6450_v61  ;;  %v10366_v30 = vpop.f32.mrb[65].mxu1 }
 0x7f4   : > { %v14146_v30 = vld [vmem:[#allocation2 + $0x60] sm:$0xff] }
 0x7fc   : > { %v6852_v28 = vpop.f32.mrb[66].mxu1 }
 0x7fd   : > { %v6858_v9 = vadd.f32 %v6852_v28, %v6654_v53  ;;  %v10379_v52 = vpop.f32.mrb[67].mxu1 }
 0x806   : > { %v7056_v34 = vpop.f32.mrb[68].mxu1 }
 0x807   : > { %v7062_v59 = vadd.f32 %v7056_v34, %v6858_v9  ;;  %v10392_v48 = vpop.f32.mrb[69].mxu1 }
 0x810   : > { %v7260_v20 = vpop.f32.mrb[70].mxu1 }
 0x811   : > { %v7266_v10 = vadd.f32 %v7260_v20, %v7062_v59  ;;  %v10405_v58 = vpop.f32.mrb[71].mxu1 }
 0x813   : > { %v7275_v1 = vadd.f32 %v7271_v12, %v7266_v10 }
 0x814   : > { %v7189_v2 = vpop.f32.mrb[6].mxu0 }
 0x815   : > { %v7273_v63 = vadd.f32 %v7271_v12, %v7189_v2  ;;  %v7191_v17 = vpop.f32.mrb[7].mxu0  ;;  %v7281_v50 = vmul.f32 0.2, %v7275_v1  ;;  %vm7278_vm11 = vcmp.ge.f32.partialorder %v7275_v1, 0.0 }
 0x816   : > { %v7274_v11 = vadd.f32 %v7271_v12, %v7191_v17 }
 0x817   : > { %vm7276_vm1 = vcmp.ge.f32.partialorder %v7273_v63, 0.0  ;;  %v7279_v6 = vmul.f32 0.2, %v7273_v63  ;;  %v7284_v5 = vsel %vm7278_vm11, %v7275_v1, %v7281_v50 }
 0x818   : > { %vm7277_vm12 = vcmp.ge.f32.partialorder %v7274_v11, 0.0  ;;  %v7280_v46 = vmul.f32 0.2, %v7274_v11  ;;  %v7287_v26 = vmul.f32 %v7284_v5, %v12804_v24 }
 0x819   : > { %v7282_v54 = vsel %vm7276_vm1, %v7273_v63, %v7279_v6 }
 0x81a   : > { %v7285_v0 = vmul.f32 %v7282_v54, %v12815_v33  ;;  %v7283_v55 = vsel %vm7277_vm12, %v7274_v11, %v7280_v46 }
 0x81b   : > { %v7286_v51 = vmul.f32 %v7283_v55, %v12819_v39 }
 0x81c   : > { %7291 = vrot.lane.b32.xlu0 %v7285_v0, %s12450_s25  ;;  %v14165_v0 = vld [vmem:[%s12571_s26 + $0x10] sm:$0xff] }
 0x81d   : > { %7293 = vrot.lane.b32.xlu1 %v7286_v51, %s12450_s25  ;;  %10418 = vmatprep.mubr.msk.f32.mxu1 %vm7412_vm13, %v14165_v0 }
 0x820   : > { %7295 = vrot.lane.b32.xlu0 %v7287_v26, %s12450_s25 }
 0x821   : > { %12028 = vrot.lane.b32.xlu1 %v14065_v49, %s12439_s1 }
 0x824   : > { %12033 = vrot.lane.b32.xlu0 %v14079_v16, %s12439_s1 }
 0x825   : > { %12038 = vrot.lane.b32.xlu1 %v14085_v15, %s12439_s1 }
 0x828   : > { %12043 = vrot.lane.b32.xlu0 %v14097_v56, %s12439_s1 }
 0x829   : > { %12048 = vrot.lane.b32.xlu1 %v12047_v19, %s12439_s1 }
 0x82c   : > { %12053 = vrot.lane.b32.xlu0 %v12052_v7, %s12439_s1 }
 0x82d   : > { %12058 = vrot.lane.b32.xlu1 %v14114_v36, %s12439_s1 }
 0x830   : > { %12063 = vrot.lane.b32.xlu0 %v14065_v49, %s12442_s2 }
 0x831   : > { %12068 = vrot.lane.b32.xlu1 %v14079_v16, %s12442_s2 }
 0x834   : > { %12073 = vrot.lane.b32.xlu0 %v14085_v15, %s12442_s2 }
 0x835   : > { %12078 = vrot.lane.b32.xlu1 %v14097_v56, %s12442_s2 }
 0x838   : > { %12083 = vrot.lane.b32.xlu0 %v12047_v19, %s12442_s2 }
 0x839   : > { %12088 = vrot.lane.b32.xlu1 %v12052_v7, %s12442_s2 }
 0x83c   : > { %12093 = vrot.lane.b32.xlu0 %v14114_v36, %s12442_s2 }
 0x83d   : > { %12098 = vrot.lane.b32.xlu1 %v14065_v49, %s12443_s3 }
 0x840   : > { %12103 = vrot.lane.b32.xlu0 %v14079_v16, %s12443_s3 }
 0x841   : > { %12108 = vrot.lane.b32.xlu1 %v14085_v15, %s12443_s3 }
 0x844   : > { %12113 = vrot.lane.b32.xlu0 %v14097_v56, %s12443_s3 }
 0x845   : > { %12118 = vrot.lane.b32.xlu1 %v12047_v19, %s12443_s3 }
 0x88e   : > { %v7292_v42 = vpop.permute.xlu0 %7291 }
 0x88f   : > { %7302 = vst.msk [vmem:[#allocation2 + $0x78] sm:$0xff] %vm2053_vm14, %v7292_v42  ;;  %v7294_v57 = vpop.permute.xlu1 %7293 }
 0x890   : > { %v14142_v22 = vsel %vm2047_vm15, %v7292_v42, %v7294_v57 }
 0x892   : > { %v7296_v35 = vpop.permute.xlu0 %7295 }
 0x893   : > { %v7298_v60 = vsel %vm2047_vm15, %v7294_v57, %v7296_v35  ;;  %v12029_v61 = vpop.permute.xlu1 %12028 }
 0x894   : > { %7304 = vst.msk [vmem:[#allocation2 + $0x88] sm:$0xff] %vm2056_vm0, %v7298_v60  ;;  %v12031_v32 = vunpack.i.h.bf16 %v12029_v61  ;;  %v12030_v44 = vunpack.i.l.bf16 %v12029_v61 }
 0x896   : > { %v12034_v53 = vpop.permute.xlu0 %12033  ;;  %v14148_v28 = vld [vmem:[#allocation2 + $0x78] sm:$0xff]  ;;  %v7383_v9 = vsel %vm497_vm2, %v12030_v44, %v12031_v32 }
 0x897   : > { %v12036_v52 = vunpack.i.h.bf16 %v12034_v53  ;;  %v12035_v34 = vunpack.i.l.bf16 %v12034_v53  ;;  %v12039_v59 = vpop.permute.xlu1 %12038  ;;  %v14153_v48 = vpack.i.bf16 %v14148_v28, %v14146_v30  ;;  %v10953_v35 = vpack.c.bf16 %v14148_v28, %v14146_v30 }
 0x898   : > { %v12041_v20 = vunpack.i.h.bf16 %v12039_v59  ;;  %v12040_v10 = vunpack.i.l.bf16 %v12039_v59 }
 0x899   : > { %v10931_v58 = vpack.c.bf16 %v12036_v52, %v12031_v32  ;;  %12128 = vrot.lane.b32.xlu0 %v14153_v48, %s12442_s2  ;;  %12123 = vrot.lane.b32.xlu1 %v14153_v48, %s12439_s1  ;;  %v7385_v12 = vsel %vm497_vm2, %v12035_v34, %v12036_v52 }
 0x89a   : > { %v7384_v1 = vsel %vm497_vm2, %v12041_v20, %v12035_v34  ;;  %v7382_v2 = vsel %vm497_vm2, %v12040_v10, %v12030_v44  ;;  %v12044_v63 = vpop.permute.xlu0 %12043  ;;  %v10919_v17 = vpack.c.bf16 %v7385_v12, %v7383_v9 }
 0x89b   : > { %v10921_v11 = vpack.c.bf16 %v7384_v1, %v7382_v2  ;;  %v12046_v50 = vunpack.i.h.bf16 %v12044_v63  ;;  %v12045_v6 = vunpack.i.l.bf16 %v12044_v63  ;;  %v12049_v46 = vpop.permute.xlu1 %12048  ;;  %10932 = vmatprep.subr.bf16.mxu1 %v10931_v58  ;;  %v14162_v54 = vld [vmem:[#allocation2 + $0x88] sm:$0xff] }
 0x89c   : > { %v12051_v55 = vunpack.i.h.bf16 %v12049_v46  ;;  %v12050_v5 = vunpack.i.l.bf16 %v12049_v46  ;;  %10934 = vmatpush3.bf16.msra.mxu1 %v10931_v58  ;;  %v14169_v51 = vpack.i.bf16 %v14162_v54, %v14142_v22  ;;  %10920 = vmatprep.subr.bf16.mxu0 %v10919_v17  ;;  %v9385_v1 = vld [vmem:[#allocation2 + $0x8] sm:$0xff]  ;;  %v9387_v17 = vld [vmem:[#allocation2 + $0x18] sm:$0xff] }
 0x89d   : > { %12143 = vrot.lane.b32.xlu1 %v14114_v36, %s12443_s3  ;;  %10922 = vmatpush1.bf16.msra.mxu0 %v10921_v11  ;;  %v7387_v26 = vsel %vm497_vm2, %v12045_v6, %v12046_v50 }
 0x89e   : > { %v10935_v19 = vpack.c.bf16 %v12051_v55, %v12046_v50  ;;  %v12054_v13 = vpop.permute.xlu0 %12053  ;;  %12133 = vrot.lane.b32.xlu0 %v14169_v51, %s12439_s1  ;;  %v7389_v4 = vsel %vm497_vm2, %v12050_v5, %v12051_v55  ;;  %v9389_v55 = vld [vmem:[#allocation2 + $0x28] sm:$0xff] }
 0x89f   : > { %v12056_v7 = vunpack.i.h.bf16 %v12054_v13  ;;  %v12055_v42 = vunpack.i.l.bf16 %v12054_v13  ;;  %v10923_v57 = vpack.c.bf16 %v7389_v4, %v7387_v26  ;;  %v12059_v44 = vpop.permute.xlu1 %12058  ;;  %v10955_v4 = vpack.c.bf16 %v14069_v43, %v14058_v8  ;;  %v9758_v8 = vld [vmem:[%s12571_s26 + $0x18] sm:$0xff] }
 0x8a0   : > { %10936 = vmatprep.subr.bf16.mxu1 %v10935_v19  ;;  %v12061_v11 = vunpack.i.h.bf16 %v12059_v44  ;;  %v12060_v50 = vunpack.i.l.bf16 %v12059_v44 }
 0x8a1   : > { %v7386_v60 = vsel %vm497_vm2, %v12055_v42, %v12045_v6  ;;  %v7388_v61 = vsel %vm497_vm2, %v12056_v7, %v12050_v5  ;;  %12148 = vrot.lane.b32.xlu1 %v14153_v48, %s12443_s3  ;;  %10924 = vmatprep.subr.bf16.mxu0 %v10923_v57 }
 0x8a2   : > { %v10925_v32 = vpack.c.bf16 %v7388_v61, %v7386_v60  ;;  %10938 = vmatpush3.bf16.msra.mxu1 %v10935_v19  ;;  %12138 = vrot.lane.b32.xlu0 %v13218_v27, %s12443_s3  ;;  %v14255_v53 = vpop.permute.xlu0 %12063  ;;  %v7391_v13 = vsel %vm497_vm2, %v12060_v50, %v12061_v11 }
 0x8a3   : > { %v14257_v9 = vpop.permute.xlu1 %12068 }
 0x8a4   : > { %10926 = vmatpush1.bf16.msra.mxu0 %v10925_v32 }
 0x8a5   : > { %12158 = vrot.lane.b32.xlu1 %v14079_v16, %s12444_s8 }
 0x8a6   : > { %12153 = vrot.lane.b32.xlu0 %v14065_v49, %s12444_s8  ;;  %v14267_v52 = vpop.permute.xlu0 %12073 }
 0x8a7   : > { %v14269_v34 = vpop.permute.xlu1 %12078 }
 0x8a9   : > { %12168 = vrot.lane.b32.xlu1 %v14097_v56, %s12444_s8 }
 0x8aa   : > { %12163 = vrot.lane.b32.xlu0 %v14085_v15, %s12444_s8  ;;  %v14275_v59 = vpop.permute.xlu0 %12083 }
 0x8ab   : > { %v14277_v20 = vpop.permute.xlu1 %12088 }
 0x8ad   : > { %12178 = vrot.lane.b32.xlu1 %v13218_v27, %s12444_s8 }
 0x8ae   : > { %12173 = vrot.lane.b32.xlu0 %v13220_v45, %s12444_s8 }
 0x8b1   : > { %12193 = vrot.lane.b32.xlu1 %v14065_v49, %s12445_s16 }
 0x8b2   : > { %12183 = vrot.lane.b32.xlu0 %v14114_v36, %s12444_s8 }
 0x8b5   : > { %12203 = vrot.lane.b32.xlu1 %v14169_v51, %s12442_s2 }
 0x8b6   : > { %12188 = vrot.lane.b32.xlu0 %v14153_v48, %s12444_s8 }
 0x8b9   : > { %12208 = vrot.lane.b32.xlu1 %v14085_v15, %s12445_s16 }
 0x8ba   : > { %12198 = vrot.lane.b32.xlu0 %v14079_v16, %s12445_s16 }
 0x8bd   : > { %12218 = vrot.lane.b32.xlu1 %v13220_v45, %s12445_s16 }
 0x8be   : > { %12213 = vrot.lane.b32.xlu0 %v14097_v56, %s12445_s16 }
 0x8c1   : > { %12233 = vrot.lane.b32.xlu1 %v14114_v36, %s12445_s16 }
 0x8c2   : > { %12223 = vrot.lane.b32.xlu0 %v14169_v51, %s12443_s3 }
 0x8c5   : > { %12238 = vrot.lane.b32.xlu1 %v14153_v48, %s12445_s16 }
 0x8c6   : > { %12228 = vrot.lane.b32.xlu0 %v13218_v27, %s12445_s16 }
 0x8c9   : > { %12248 = vrot.lane.b32.xlu1 %v14079_v16, %s12446_s19 }
 0x8ca   : > { %12243 = vrot.lane.b32.xlu0 %v14065_v49, %s12446_s19 }
 0x8cd   : > { %12258 = vrot.lane.b32.xlu1 %v14169_v51, %s12444_s8 }
 0x8ce   : > { %12253 = vrot.lane.b32.xlu0 %v14085_v15, %s12446_s19 }
 0x8d1   : > { %12263 = vrot.lane.b32.xlu1 %v14097_v56, %s12446_s19 }
 0x8d2   : > { %12268 = vrot.lane.b32.xlu0 %v13220_v45, %s12446_s19 }
 0x8d5   : > { %12273 = vrot.lane.b32.xlu1 %v13218_v27, %s12446_s19 }
 0x8d6   : > { %12278 = vrot.lane.b32.xlu0 %v14114_v36, %s12446_s19 }
 0x8d9   : > { %12293 = vrot.lane.b32.xlu1 %v14065_v49, %s12447_s20 }
 0x8da   : > { %12283 = vrot.lane.b32.xlu0 %v14169_v51, %s12445_s16 }
 0x8dd   : > { %12303 = vrot.lane.b32.xlu1 %v14085_v15, %s12447_s20 }
 0x8de   : > { %12288 = vrot.lane.b32.xlu0 %v14153_v48, %s12446_s19 }
 0x8e1   : > { %12313 = vrot.lane.b32.xlu1 %v13220_v45, %s12447_s20 }
 0x8e2   : > { %12298 = vrot.lane.b32.xlu0 %v14079_v16, %s12447_s20 }
 0x8e5   : > { %12323 = vrot.lane.b32.xlu1 %v14169_v51, %s12446_s19 }
 0x8e6   : > { %12308 = vrot.lane.b32.xlu0 %v14097_v56, %s12447_s20 }
 0x8e9   : > { %12328 = vrot.lane.b32.xlu1 %v14114_v36, %s12447_s20 }
 0x8ea   : > { %12318 = vrot.lane.b32.xlu0 %v13218_v27, %s12447_s20 }
 0x8ed   : > { %12333 = vrot.lane.b32.xlu1 %v14153_v48, %s12447_s20 }
 0x8ee   : > { %12338 = vrot.lane.b32.xlu0 %v14065_v49, %s12448_s21  ;;  %v14287_v49 = vpop.permute.xlu0 %12093 }
 0x8ef   : > { %v12096_v21 = vunpack.i.h.bf16 %v14287_v49 }
 0x8f1   : > { %12343 = vrot.lane.b32.xlu1 %v14079_v16, %s12448_s21  ;;  %v14289_v16 = vpop.permute.xlu1 %12098 }
 0x8f2   : > { %12348 = vrot.lane.b32.xlu0 %v14169_v51, %s12447_s20  ;;  %v14296_v10 = vpop.permute.xlu0 %12103 }
 0x8f3   : > { %v12106_v30 = vunpack.i.h.bf16 %v14296_v10  ;;  %v12105_v28 = vunpack.i.l.bf16 %v14296_v10 }
 0x8f5   : > { %12358 = vrot.lane.b32.xlu1 %v14097_v56, %s12448_s21  ;;  %v9360_v56 = vld [vmem:[%s12581_s18 + $0x40] sm:$0xff] }
 0x8f6   : > { %12353 = vrot.lane.b32.xlu0 %v14085_v15, %s12448_s21  ;;  %v14298_v15 = vpop.permute.xlu1 %12108  ;;  %v14304_v58 = vpop.permute.xlu0 %12113 }
 0x8f9   : > { %12368 = vrot.lane.b32.xlu1 %v13218_v27, %s12448_s21  ;;  %v9361_v27 = vld [vmem:[%s12581_s18 + $0x48] sm:$0xff] }
 0x8fa   : > { %12363 = vrot.lane.b32.xlu0 %v13220_v45, %s12448_s21  ;;  %v9384_v45 = vld [vmem:[#allocation2] sm:$0xff]  ;;  %v14306_v12 = vpop.permute.xlu1 %12118 }
 0x8fd   : > { %12378 = vrot.lane.b32.xlu1 %v14169_v51, %s12448_s21 }
 0x8fe   : > { %12373 = vrot.lane.b32.xlu0 %v14114_v36, %s12448_s21  ;;  %v9386_v36 = vld [vmem:[#allocation2 + $0x10] sm:$0xff] }
 0x901   : > { %9364 = vperm.xlu1 %11546, %v9360_v56  }
 0x902   : > { %12383 = vrot.lane.b32.xlu0 %v14153_v48, %s12448_s21  ;;  %v9388_v48 = vld [vmem:[#allocation2 + $0x20] sm:$0xff] }
 0x905   : > { %9396 = vrot.lane.b32.xlu1 %v9384_v45, %s12444_s8  ;;  %v10945_v45 = vpack.c.bf16 %v14074_v47, %v14072_v37  ;;  %v7323_v37 = vld [vmem:[%s12571_s26] sm:$0xff] }
 0x906   : > { %9369 = vperm.xlu0 %11425, %v9361_v27   ;;  %v10943_v27 = vpack.c.bf16 %v14067_v14, %v14056_v3  ;;  %v10959_v3 = vpack.c.bf16 %v14099_v38, %v14089_v31  ;;  %v10947_v14 = vpack.c.bf16 %v14101_v41, %v14087_v40  ;;  %v12076_v31 = vunpack.i.h.bf16 %v14267_v52 }
 0x907   : > { %v12075_v40 = vunpack.i.l.bf16 %v14267_v52  ;;  %v10963_v41 = vpack.c.bf16 %v14162_v54, %v14107_v62  ;;  %v12081_v52 = vunpack.i.h.bf16 %v14269_v34  ;;  %v12085_v62 = vunpack.i.l.bf16 %v14275_v59 }
 0x909   : > { %9400 = vrot.lane.b32.xlu1 %v9386_v36, %s12444_s8  ;;  %v12066_v36 = vunpack.i.h.bf16 %v14255_v53 }
 0x90a   : > { %9398 = vrot.lane.b32.xlu0 %v9385_v1, %s12444_s8 }
 0x90b   : > { %v14310_v2 = vpop.permute.xlu0 %12128  ;;  %v12124_v63 = vpop.permute.xlu1 %12123 }
 0x90c   : > { %v12125_v6 = vunpack.i.l.bf16 %v12124_v63  ;;  %v12126_v51 = vunpack.i.h.bf16 %v12124_v63  ;;  %v12065_v63 = vunpack.i.l.bf16 %v14255_v53 }
 0x90d   : > { %9404 = vrot.lane.b32.xlu1 %v9388_v48, %s12444_s8  ;;  %v12070_v48 = vunpack.i.l.bf16 %v14257_v9 }
 0x90e   : > { %9402 = vrot.lane.b32.xlu0 %v9387_v17, %s12444_s8  ;;  %v7390_v7 = vsel %vm497_vm2, %v12125_v6, %v12060_v50  ;;  %v12071_v17 = vunpack.i.h.bf16 %v14257_v9  ;;  %v7769_v53 = vsel %vm811_vm3, %v12065_v63, %v12066_v36  ;;  %v12086_v50 = vunpack.i.h.bf16 %v14275_v59 }
 0x90f   : > { %v14314_v46 = vpop.permute.xlu1 %12143  ;;  %v12091_v6 = vunpack.i.h.bf16 %v14277_v20 }
 0x910   : > { %v12134_v5 = vpop.permute.xlu0 %12133  ;;  %v7771_v9 = vsel %vm811_vm3, %v12070_v48, %v12071_v17  ;;  %v10979_v59 = vpack.c.bf16 %v12071_v17, %v12066_v36  ;;  %v12110_v36 = vunpack.i.l.bf16 %v14298_v15  ;;  %v8004_v17 = vsel %vm983_vm5, %v12105_v28, %v12106_v30 }
 0x911   : > { %v12136_v26 = vunpack.i.h.bf16 %v12134_v5  ;;  %v12135_v19 = vunpack.i.l.bf16 %v12134_v5  ;;  %v10967_v5 = vpack.c.bf16 %v7771_v9, %v7769_v53 }
 0x912   : > { %9406 = vrot.lane.b32.xlu0 %v9389_v55, %s12444_s8 }
 0x913   : > { %v7392_v42 = vsel %vm497_vm2, %v12126_v51, %v12135_v19  ;;  %v10939_v57 = vpack.c.bf16 %v12136_v26, %v12061_v11  ;;  %v14322_v60 = vpop.permute.xlu1 %12148  ;;  %v7393_v61 = vsel %vm497_vm2, %v12135_v19, %v12136_v26  ;;  %v12080_v11 = vunpack.i.l.bf16 %v14269_v34  ;;  %v7324_v51 = vld [vmem:[%s12571_s26 + $0x8] sm:$0xff] }
 0x914   : > { %v10929_v32 = vpack.c.bf16 %v7392_v42, %v7390_v7  ;;  %v14325_v44 = vpop.permute.xlu0 %12138  ;;  %v10927_v56 = vpack.c.bf16 %v7393_v61, %v7391_v13  ;;  %v12090_v34 = vunpack.i.l.bf16 %v14277_v20  ;;  %v7775_v20 = vsel %vm811_vm3, %v12085_v62, %v12086_v50  ;;  %v14400_v61 = vld [vmem:[%s12571_s26 + $0x20] sm:$0xff] }
 0x915   : > { %10940 = vmatprep.subr.bf16.mxu1 %v10939_v57  ;;  %v10983_v19 = vpack.c.bf16 %v12086_v50, %v12081_v52  ;;  %v7774_v13 = vsel %vm811_vm3, %v12091_v6, %v12085_v62  ;;  %v12101_v42 = vunpack.i.h.bf16 %v14289_v16  ;;  %v12141_v50 = vunpack.i.h.bf16 %v14325_v44  ;;  %v9768_v6 = vld [vmem:[%s12571_s26 + $0x28] sm:$0xff] }
 0x916   : > { %10928 = vmatprep.subr.bf16.mxu0 %v10927_v56  ;;  %10942 = vmatpush3.bf16.msra.mxu1 %v10939_v57  ;;  %v12100_v57 = vunpack.i.l.bf16 %v14289_v16  ;;  %v12131_v16 = vunpack.i.h.bf16 %v14310_v2  ;;  %vm9496_vm2 = vcmask (!%p9809_p8), 556032  }
 0x917   : > { %v14330_v43 = vpop.permute.xlu1 %12158  ;;  %10930 = vmatpush1.bf16.msra.mxu0 %v10929_v32  ;;  %10956 = vmatprep.subr.bf16.mxu1 %v10955_v4 }
 0x918   : > { %v14334_v1 = vpop.permute.xlu0 %12153  ;;  %10944 = vmatprep.subr.bf16.mxu0 %v10943_v27 }
 0x919   : > { %10419 = vmatmul.mubr.msk.f32.vlgmr.msra.gmra.mrb[72].mxu1 %vm7412_vm13, %v9758_v8 }
 0x91a   : > { %10958 = vmatpush3.bf16.msra.mxu1 %v10955_v4  ;;  %9759 = vmatmul.mubr.msk.f32.vlgmr.msra.gmra.mrb[8].mxu0 %vm7412_vm13, %v14165_v0  ;;  %v10951_v0 = vpack.c.bf16 %v14142_v22, %v14110_v23  ;;  %v7768_v23 = vsel %vm811_vm3, %v12075_v40, %v12065_v63  ;;  %v7770_v22 = vsel %vm811_vm3, %v12076_v31, %v12070_v48  ;;  %v12115_v40 = vunpack.i.l.bf16 %v14304_v58 }
 0x91b   : > { %v14348_v47 = vpop.permute.xlu1 %12168  ;;  %10946 = vmatpush1.bf16.msra.mxu0 %v10945_v45  ;;  %10960 = vmatprep.subr.bf16.mxu1 %v10959_v3  ;;  %v10969_v25 = vpack.c.bf16 %v7770_v22, %v7768_v23  ;;  %v7772_v4 = vsel %vm811_vm3, %v12090_v34, %v12080_v11  ;;  %v8002_v63 = vsel %vm983_vm5, %v12100_v57, %v12101_v42  ;;  %v12146_v34 = vunpack.i.h.bf16 %v14314_v46 }
 0x91c   : > { %v14352_v38 = vpop.permute.xlu0 %12163  ;;  %10948 = vmatprep.subr.bf16.mxu0 %v10947_v14  ;;  %7489 = vmatprep.mubr.f32.mxu0 %v12440_v18  ;;  %v10973_v32 = vpack.c.bf16 %v7774_v13, %v7772_v4  ;;  %v12111_v14 = vunpack.i.h.bf16 %v14298_v15  ;;  %v12121_v15 = vunpack.i.h.bf16 %v14306_v12  ;;  %v8001_v23 = vsel %vm983_vm5, %v12110_v36, %v12100_v57  ;;  %v9773_v57 = vld [vmem:[%s12571_s26 + $0x30] sm:$0xff] }
 0x91d   : > { %10433 = vmatprep.mubr.msk.f32.mxu1 %vm7412_vm13, %v7323_v37  ;;  %v10991_v22 = vpack.c.bf16 %v8004_v17, %v8002_v63 }
 0x91e   : > { %10962 = vmatpush3.bf16.msra.mxu1 %v10959_v3  ;;  %9760 = vmatmul.mubr.msk.f32.gmra.mrb[10].mxu0 %vm7412_vm13, %v9758_v8  ;;  %v12130_v8 = vunpack.i.l.bf16 %v14310_v2  ;;  %v12116_v2 = vunpack.i.h.bf16 %v14304_v58  ;;  %v12140_v58 = vunpack.i.l.bf16 %v14325_v44 }
 0x91f   : > { %v14367_v54 = vpop.permute.xlu1 %12178  ;;  %10950 = vmatpush1.bf16.msra.mxu0 %v10949_v29  ;;  %10964 = vmatprep.subr.bf16.mxu1 %v10963_v41  ;;  %v12095_v29 = vunpack.i.l.bf16 %v14287_v49  ;;  %v7773_v49 = vsel %vm811_vm3, %v12080_v11, %v12081_v52  ;;  %v11003_v11 = vpack.c.bf16 %v12106_v30, %v12101_v42  ;;  %v12155_v42 = vunpack.i.l.bf16 %v14334_v1 }
 0x920   : > { %v14376_v55 = vpop.permute.xlu0 %12173  ;;  %10952 = vmatprep.subr.bf16.mxu0 %v10951_v0  ;;  %7641 = vmatprep.mubr.f32.mxu0 %v12440_v18  ;;  %v8005_v13 = vsel %vm983_vm5, %v12140_v58, %v12115_v40 }
 0x921   : > { %v7777_v27 = vsel %vm811_vm3, %v12095_v29, %v12096_v21  ;;  %v7776_v9 = vsel %vm811_vm3, %v12130_v8, %v12095_v29  ;;  %v12160_v29 = vunpack.i.l.bf16 %v14330_v43  ;;  %v12175_v63 = vunpack.i.l.bf16 %v14376_v55 }
 0x922   : > { %10966 = vmatpush3.bf16.msra.mxu1 %v10963_v41  ;;  %v12120_v41 = vunpack.i.l.bf16 %v14306_v12  ;;  %v8003_v12 = vsel %vm983_vm5, %v12111_v14, %v12105_v28  ;;  %v12176_v14 = vunpack.i.h.bf16 %v14376_v55 }
 0x923   : > { %v14382_v26 = vpop.permute.xlu1 %12193  ;;  %10954 = vmatpush1.bf16.msra.mxu0 %v10953_v35  ;;  %10980 = vmatprep.subr.bf16.mxu1 %v10979_v59  ;;  %v10971_v35 = vpack.c.bf16 %v7775_v20, %v7773_v49  ;;  %v12156_v49 = vunpack.i.h.bf16 %v14334_v1 }
 0x924   : > { %v14390_v7 = vpop.permute.xlu0 %12183  ;;  %10968 = vmatprep.subr.bf16.mxu0 %v10967_v5  ;;  %v8008_v44 = vsel %vm983_vm5, %v12120_v41, %v12121_v15  ;;  %v8007_v4 = vsel %vm983_vm5, %v12141_v50, %v12120_v41  ;;  %v8241_v58 = vsel %vm1155_vm6, %v12175_v63, %v12176_v14 }
 0x925   : > { %10434 = vmatmul.mubr.msk.f32.vlgmr.msra.gmra.mrb[72].mxu1 %vm7412_vm13, %v7324_v51  ;;  %v8235_v36 = vsel %vm1155_vm6, %v12155_v42, %v12156_v49 }
 0x926   : > { %10982 = vmatpush3.bf16.msra.mxu1 %v10979_v59  ;;  %9763 = vmatmul.mubr.msk.f32.vlgmr.msra.gmra.mrb[8].mxu0 %vm7412_vm13, %v7323_v37  ;;  %v12145_v59 = vunpack.i.l.bf16 %v14314_v46  ;;  %v11007_v46 = vpack.c.bf16 %v12121_v15, %v12116_v2 }
 0x927   : > { %v12204_v56 = vpop.permute.xlu1 %12203  ;;  %10970 = vmatpush1.bf16.msra.mxu0 %v10969_v25  ;;  %10984 = vmatprep.subr.bf16.mxu1 %v10983_v19  ;;  %v12150_v25 = vunpack.i.l.bf16 %v14322_v60 }
 0x928   : > { %v12206_v45 = vunpack.i.h.bf16 %v12204_v56  ;;  %v12205_v10 = vunpack.i.l.bf16 %v12204_v56  ;;  %v14405_v3 = vpop.permute.xlu0 %12188  ;;  %10972 = vmatprep.subr.bf16.mxu0 %v10971_v35  ;;  %7647 = vmatprep.mubr.f32.mxu0 %v12440_v18  ;;  %v8010_v28 = vsel %vm983_vm5, %v12145_v59, %v12146_v34  ;;  %v12151_v35 = vunpack.i.h.bf16 %v14322_v60 }
 0x929   : > { %10448 = vmatprep.mubr.msk.f32.mxu1 %vm7412_vm13, %v14400_v61  ;;  %v10997_v56 = vpack.c.bf16 %v8007_v4, %v8005_v13  ;;  %v12170_v60 = vunpack.i.l.bf16 %v14348_v47 }
 0x92a   : > { %v10987_v48 = vpack.c.bf16 %v12206_v45, %v12096_v21  ;;  %v7778_v37 = vsel %vm811_vm3, %v12131_v16, %v12205_v10  ;;  %10986 = vmatpush3.bf16.msra.mxu1 %v10983_v19  ;;  %v7779_v31 = vsel %vm811_vm3, %v12205_v10, %v12206_v45  ;;  %9764 = vmatmul.mubr.msk.f32.gmra.mrb[10].mxu0 %vm7412_vm13, %v7324_v51  ;;  %v12161_v21 = vunpack.i.h.bf16 %v14330_v43 }
 0x92b   : > { %v14421_v0 = vpop.permute.xlu1 %12208  ;;  %10974 = vmatpush1.bf16.msra.mxu0 %v10973_v32  ;;  %v10975_v53 = vpack.c.bf16 %v7779_v31, %v7777_v27  ;;  %7868 = vmatprep.mubr.f32.mxu0 %v12440_v18  ;;  %v10977_v62 = vpack.c.bf16 %v7778_v37, %v7776_v9  ;;  %v8006_v51 = vsel %vm983_vm5, %v12115_v40, %v12116_v2  ;;  %v12165_v16 = vunpack.i.l.bf16 %v14352_v38 }
 0x92c   : > { %v14425_v52 = vpop.permute.xlu0 %12198  ;;  %10988 = vmatprep.subr.bf16.mxu1 %v10987_v48  ;;  %v10993_v19 = vpack.c.bf16 %v8003_v12, %v8001_v23  ;;  %v10995_v43 = vpack.c.bf16 %v8008_v44, %v8006_v51  ;;  %v8009_v32 = vsel %vm983_vm5, %v12150_v25, %v12145_v59  ;;  %v8237_v1 = vsel %vm1155_vm6, %v12160_v29, %v12161_v21 }
 0x92d   : > { %10976 = vmatprep.subr.bf16.mxu0 %v10975_v53  ;;  %v12171_v10 = vunpack.i.h.bf16 %v14348_v47  ;;  %v12181_v47 = vunpack.i.h.bf16 %v14367_v54  ;;  %v12180_v37 = vunpack.i.l.bf16 %v14367_v54  ;;  %v11027_v55 = vpack.c.bf16 %v12161_v21, %v12156_v49  ;;  %v14494_v21 = vld [vmem:[%s12571_s26 + $0x40] sm:$0xff] }
 0x92e   : > { %10990 = vmatpush3.bf16.msra.mxu1 %v10987_v48  ;;  %v8234_v41 = vsel %vm1155_vm6, %v12165_v16, %v12155_v42  ;;  %v11015_v9 = vpack.c.bf16 %v8237_v1, %v8235_v36  ;;  %v12185_v59 = vunpack.i.l.bf16 %v14390_v7  ;;  %v12201_v51 = vunpack.i.h.bf16 %v14425_v52 }
 0x92f   : > { %v14434_v5 = vpop.permute.xlu1 %12218  ;;  %10978 = vmatpush1.bf16.msra.mxu0 %v10977_v62  ;;  %11004 = vmatprep.subr.bf16.mxu1 %v11003_v11  ;;  %v8239_v54 = vsel %vm1155_vm6, %v12170_v60, %v12171_v10  ;;  %v8238_v12 = vsel %vm1155_vm6, %v12180_v37, %v12170_v60  ;;  %v8240_v23 = vsel %vm1155_vm6, %v12181_v47, %v12175_v63  ;;  %v12200_v44 = vunpack.i.l.bf16 %v14425_v52 }
 0x930   : > { %v14441_v20 = vpop.permute.xlu0 %12213  ;;  %10992 = vmatprep.subr.bf16.mxu0 %v10991_v22  ;;  %v11031_v22 = vpack.c.bf16 %v12176_v14, %v12171_v10  ;;  %v11019_v25 = vpack.c.bf16 %v8241_v58, %v8239_v54  ;;  %v12190_v52 = vunpack.i.l.bf16 %v14405_v3 }
 0x931   : > { %10449 = vmatmul.mubr.msk.f32.vlgmr.msra.gmra.mrb[72].mxu1 %vm7412_vm13, %v9768_v6  ;;  %v12215_v1 = vunpack.i.l.bf16 %v14441_v20 }
 0x932   : > { %11006 = vmatpush3.bf16.msra.mxu1 %v11003_v11  ;;  %9769 = vmatmul.mubr.msk.f32.vlgmr.msra.gmra.mrb[8].mxu0 %vm7412_vm13, %v14400_v61  ;;  %v12166_v61 = vunpack.i.h.bf16 %v14352_v38  ;;  %v9774_v11 = vld [vmem:[%s12571_s26 + $0x38] sm:$0xff] }
 0x933   : > { %v14451_v30 = vpop.permute.xlu1 %12233  ;;  %10994 = vmatpush1.bf16.msra.mxu0 %v10993_v19  ;;  %11008 = vmatprep.subr.bf16.mxu1 %v11007_v46  ;;  %v12196_v19 = vunpack.i.h.bf16 %v14382_v26 }
 0x934   : > { %v12224_v27 = vpop.permute.xlu0 %12223  ;;  %10996 = vmatprep.subr.bf16.mxu0 %v10995_v43  ;;  %7874 = vmatprep.mubr.f32.mxu0 %v12440_v18  ;;  %v8236_v53 = vsel %vm1155_vm6, %v12166_v61, %v12160_v29  ;;  %v11021_v29 = vpack.c.bf16 %v8240_v23, %v8238_v12  ;;  %v12211_v43 = vunpack.i.h.bf16 %v14421_v0  ;;  %v12235_v47 = vunpack.i.l.bf16 %v14451_v30  ;;  %v9785_v12 = vld [vmem:[%s12571_s26 + $0x50] sm:$0xff] }
 0x935   : > { %v12226_v8 = vunpack.i.h.bf16 %v12224_v27  ;;  %v12225_v45 = vunpack.i.l.bf16 %v12224_v27  ;;  %10463 = vmatprep.mubr.msk.f32.mxu1 %vm7412_vm13, %v9773_v57  ;;  %v11017_v62 = vpack.c.bf16 %v8236_v53, %v8234_v41  ;;  %v12220_v27 = vunpack.i.l.bf16 %v14434_v5 }
 0x936   : > { %11010 = vmatpush3.bf16.msra.mxu1 %v11007_v46  ;;  %9770 = vmatmul.mubr.msk.f32.gmra.mrb[10].mxu0 %vm7412_vm13, %v9768_v6  ;;  %v12195_v46 = vunpack.i.l.bf16 %v14382_v26  ;;  %v11051_v60 = vpack.c.bf16 %v12201_v51, %v12196_v19  ;;  %v8469_v63 = vsel %vm1327_vm7, %v12211_v43, %v12200_v44 }
 0x937   : > { %v8011_v17 = vsel %vm983_vm5, %v12151_v35, %v12225_v45  ;;  %v11011_v38 = vpack.c.bf16 %v12226_v8, %v12146_v34  ;;  %v14468_v2 = vpop.permute.xlu1 %12238  ;;  %10998 = vmatpush1.bf16.msra.mxu0 %v10997_v56  ;;  %v8012_v48 = vsel %vm983_vm5, %v12225_v45, %v12226_v8  ;;  %8101 = vmatprep.mubr.f32.mxu0 %v12440_v18  ;;  %v12186_v34 = vunpack.i.h.bf16 %v14390_v7 }
 0x938   : > { %v11001_v31 = vpack.c.bf16 %v8011_v17, %v8009_v32  ;;  %v14474_v40 = vpop.permute.xlu0 %12228  ;;  %v10999_v15 = vpack.c.bf16 %v8012_v48, %v8010_v28  ;;  %v12191_v7 = vunpack.i.h.bf16 %v14405_v3  ;;  %v8470_v28 = vsel %vm1327_vm7, %v12200_v44, %v12201_v51 }
 0x939   : > { %11012 = vmatprep.subr.bf16.mxu1 %v11011_v38  ;;  %v8243_v26 = vsel %vm1155_vm6, %v12185_v59, %v12186_v34  ;;  %v12221_v3 = vunpack.i.h.bf16 %v14434_v5  ;;  %v8242_v8 = vsel %vm1155_vm6, %v12190_v52, %v12185_v59  ;;  %v8468_v10 = vsel %vm1327_vm7, %v12195_v46, %v12196_v19 }
 0x93a   : > { %11000 = vmatprep.subr.bf16.mxu0 %v10999_v15  ;;  %11014 = vmatpush3.bf16.msra.mxu1 %v11011_v38  ;;  %v12231_v5 = vunpack.i.h.bf16 %v14474_v40  ;;  %v12230_v14 = vunpack.i.l.bf16 %v14474_v40  ;;  %v11039_v17 = vpack.c.bf16 %v8470_v28, %v8468_v10  ;;  %v9780_v38 = vld [vmem:[%s12571_s26 + $0x48] sm:$0xff]  ;;  %v12236_v48 = vunpack.i.h.bf16 %v14451_v30 }
 0x93b   : > { %v14479_v50 = vpop.permute.xlu1 %12248  ;;  %11002 = vmatpush1.bf16.msra.mxu0 %v11001_v31  ;;  %11028 = vmatprep.subr.bf16.mxu1 %v11027_v55  ;;  %v8474_v40 = vsel %vm1327_vm7, %v12220_v27, %v12221_v3  ;;  %v12240_v15 = vunpack.i.l.bf16 %v14468_v2 }
 0x93c   : > { %v14485_v6 = vpop.permute.xlu0 %12243  ;;  %11016 = vmatprep.subr.bf16.mxu0 %v11015_v9  ;;  %v12250_v41 = vunpack.i.l.bf16 %v14479_v50  ;;  %v8473_v54 = vsel %vm1327_vm7, %v12231_v5, %v12220_v27 }
 0x93d   : > { %10464 = vmatmul.mubr.msk.f32.vlgmr.msra.gmra.mrb[72].mxu1 %vm7412_vm13, %v9774_v11  ;;  %v12246_v58 = vunpack.i.h.bf16 %v14485_v6  ;;  %v8475_v59 = vsel %vm1327_vm7, %v12240_v15, %v12235_v47 }
 0x93e   : > { %11030 = vmatpush3.bf16.msra.mxu1 %v11027_v55  ;;  %9775 = vmatmul.mubr.msk.f32.vlgmr.msra.gmra.mrb[8].mxu0 %vm7412_vm13, %v9773_v57  ;;  %v12210_v57 = vunpack.i.l.bf16 %v14421_v0  ;;  %v12216_v0 = vunpack.i.h.bf16 %v14441_v20  ;;  %v12251_v55 = vunpack.i.h.bf16 %v14479_v50 }
 0x93f   : > { %v12259_v13 = vpop.permute.xlu1 %12258  ;;  %11018 = vmatpush1.bf16.msra.mxu0 %v11017_v62  ;;  %11032 = vmatprep.subr.bf16.mxu1 %v11031_v22  ;;  %v12245_v62 = vunpack.i.l.bf16 %v14485_v6 }
 0x940   : > { %v12261_v4 = vunpack.i.h.bf16 %v12259_v13  ;;  %v12260_v49 = vunpack.i.l.bf16 %v12259_v13  ;;  %v14500_v42 = vpop.permute.xlu0 %12253  ;;  %11020 = vmatprep.subr.bf16.mxu0 %v11019_v25  ;;  %8107 = vmatprep.mubr.f32.mxu0 %v12440_v18  ;;  %v8467_v36 = vsel %vm1327_vm7, %v12210_v57, %v12195_v46  ;;  %v8472_v31 = vsel %vm1327_vm7, %v12215_v1, %v12216_v0 }
 0x941   : > { %10478 = vmatprep.mubr.msk.f32.mxu1 %vm7412_vm13, %v14494_v21  ;;  %v11041_v9 = vpack.c.bf16 %v8469_v63, %v8467_v36  ;;  %v11055_v30 = vpack.c.bf16 %v12221_v3, %v12216_v0  ;;  %v11043_v50 = vpack.c.bf16 %v8474_v40, %v8472_v31  ;;  %v8703_v6 = vsel %vm1499_vm8, %v12250_v41, %v12251_v55 }
 0x942   : > { %v11035_v35 = vpack.c.bf16 %v12261_v4, %v12186_v34  ;;  %v8244_v32 = vsel %vm1155_vm6, %v12191_v7, %v12260_v49  ;;  %11034 = vmatpush3.bf16.msra.mxu1 %v11031_v22  ;;  %v8245_v56 = vsel %vm1155_vm6, %v12260_v49, %v12261_v4  ;;  %9776 = vmatmul.mubr.msk.f32.gmra.mrb[10].mxu0 %vm7412_vm13, %v9774_v11  ;;  %v12241_v34 = vunpack.i.h.bf16 %v14468_v2 }
 0x943   : > { %v14516_v61 = vpop.permute.xlu1 %12263  ;;  %11022 = vmatpush1.bf16.msra.mxu0 %v11021_v29  ;;  %v11023_v16 = vpack.c.bf16 %v8245_v56, %v8243_v26  ;;  %8334 = vmatprep.mubr.f32.mxu0 %v12440_v18  ;;  %v11025_v20 = vpack.c.bf16 %v8244_v32, %v8242_v8  ;;  %v8471_v11 = vsel %vm1327_vm7, %v12230_v14, %v12215_v1  ;;  %v12256_v25 = vunpack.i.h.bf16 %v14500_v42  ;;  %v9786_v1 = vld [vmem:[%s12571_s26 + $0x58] sm:$0xff] }
 0x944   : > { %v14519_v45 = vpop.permute.xlu0 %12268  ;;  %11036 = vmatprep.subr.bf16.mxu1 %v11035_v35  ;;  %v8476_v22 = vsel %vm1327_vm7, %v12235_v47, %v12236_v48  ;;  %v11045_v51 = vpack.c.bf16 %v8473_v54, %v8471_v11  ;;  %v12266_v46 = vunpack.i.h.bf16 %v14516_v61  ;;  %v12265_v2 = vunpack.i.l.bf16 %v14516_v61 }
 0x945   : > { %11024 = vmatprep.subr.bf16.mxu0 %v11023_v16  ;;  %v12271_v13 = vunpack.i.h.bf16 %v14519_v45  ;;  %v8701_v7 = vsel %vm1499_vm8, %v12245_v62, %v12246_v58  ;;  %v12270_v52 = vunpack.i.l.bf16 %v14519_v45  ;;  %v11075_v3 = vpack.c.bf16 %v12251_v55, %v12246_v58 }
 0x946   : > { %11038 = vmatpush3.bf16.msra.mxu1 %v11035_v35  ;;  %v8702_v32 = vsel %vm1499_vm8, %v12256_v25, %v12250_v41  ;;  %v11063_v0 = vpack.c.bf16 %v8703_v6, %v8701_v7  ;;  %v8705_v16 = vsel %vm1499_vm8, %v12265_v2, %v12266_v46 }
 0x947   : > { %v14530_v37 = vpop.permute.xlu1 %12273  ;;  %11026 = vmatpush1.bf16.msra.mxu0 %v11025_v20  ;;  %11052 = vmatprep.subr.bf16.mxu1 %v11051_v60  ;;  %v8707_v8 = vsel %vm1499_vm8, %v12270_v52, %v12271_v13  ;;  %v11079_v10 = vpack.c.bf16 %v12271_v13, %v12266_v46 }
 0x948   : > { %v14537_v53 = vpop.permute.xlu0 %12278  ;;  %11040 = vmatprep.subr.bf16.mxu0 %v11039_v17  ;;  %v12276_v56 = vunpack.i.h.bf16 %v14530_v37  ;;  %v12275_v27 = vunpack.i.l.bf16 %v14530_v37 }
 0x949   : > { %10479 = vmatmul.mubr.msk.f32.vlgmr.msra.gmra.mrb[72].mxu1 %vm7412_vm13, %v9780_v38  ;;  %v12281_v5 = vunpack.i.h.bf16 %v14537_v53  ;;  %v12280_v14 = vunpack.i.l.bf16 %v14537_v53 }
 0x94a   : > { %11054 = vmatpush3.bf16.msra.mxu1 %v11051_v60  ;;  %9781 = vmatmul.mubr.msk.f32.vlgmr.msra.gmra.mrb[8].mxu0 %vm7412_vm13, %v14494_v21  ;;  %v12255_v21 = vunpack.i.l.bf16 %v14500_v42  ;;  %v8706_v63 = vsel %vm1499_vm8, %v12276_v56, %v12270_v52  ;;  %v8704_v17 = vsel %vm1499_vm8, %v12275_v27, %v12265_v2  ;;  %v9792_v52 = vld [vmem:[%s12571_s26 + $0x68] sm:$0xff] }
 0x94b   : > { %v14547_v23 = vpop.permute.xlu1 %12293  ;;  %11042 = vmatpush1.bf16.msra.mxu0 %v11041_v9  ;;  %11056 = vmatprep.subr.bf16.mxu1 %v11055_v30  ;;  %v11069_v9 = vpack.c.bf16 %v8706_v63, %v8704_v17 }
 0x94c   : > { %v12284_v44 = vpop.permute.xlu0 %12283  ;;  %11044 = vmatprep.subr.bf16.mxu0 %v11043_v50  ;;  %8340 = vmatprep.mubr.f32.mxu0 %v12440_v18  ;;  %v8700_v35 = vsel %vm1499_vm8, %v12255_v21, %v12245_v62  ;;  %v12296_v20 = vunpack.i.h.bf16 %v14547_v23  ;;  %v12295_v36 = vunpack.i.l.bf16 %v14547_v23 }
 0x94d   : > { %v12286_v29 = vunpack.i.h.bf16 %v12284_v44  ;;  %v12285_v19 = vunpack.i.l.bf16 %v12284_v44  ;;  %10493 = vmatprep.mubr.msk.f32.mxu1 %vm7412_vm13, %v9785_v12  ;;  %v11065_v45 = vpack.c.bf16 %v8702_v32, %v8700_v35 }
 0x94e   : > { %11058 = vmatpush3.bf16.msra.mxu1 %v11055_v30  ;;  %9782 = vmatmul.mubr.msk.f32.gmra.mrb[10].mxu0 %vm7412_vm13, %v9780_v38  ;;  %v11067_v38 = vpack.c.bf16 %v8707_v8, %v8705_v16  ;;  %v8709_v30 = vsel %vm1499_vm8, %v12280_v14, %v12281_v5  ;;  %v8934_v11 = vsel %vm1671_vm9, %v12295_v36, %v12296_v20 }
 0x94f   : > { %v8477_v4 = vsel %vm1327_vm7, %v12241_v34, %v12285_v19  ;;  %v11059_v49 = vpack.c.bf16 %v12286_v29, %v12236_v48  ;;  %v14564_v42 = vpop.permute.xlu1 %12303  ;;  %11046 = vmatpush1.bf16.msra.mxu0 %v11045_v51  ;;  %v8478_v43 = vsel %vm1327_vm7, %v12285_v19, %v12286_v29  ;;  %8567 = vmatprep.mubr.f32.mxu0 %v12440_v18  ;;  %v9791_v48 = vld [vmem:[%s12571_s26 + $0x60] sm:$0xff] }
 0x950   : > { %v11049_v57 = vpack.c.bf16 %v8477_v4, %v8475_v59  ;;  %v14568_v26 = vpop.permute.xlu0 %12288  ;;  %v11047_v28 = vpack.c.bf16 %v8478_v43, %v8476_v22  ;;  %v12306_v54 = vunpack.i.h.bf16 %v14564_v42  ;;  %v12305_v51 = vunpack.i.l.bf16 %v14564_v42 }
 0x951   : > { %11060 = vmatprep.subr.bf16.mxu1 %v11059_v49  ;;  %v12291_v40 = vunpack.i.h.bf16 %v14568_v26  ;;  %v12290_v15 = vunpack.i.l.bf16 %v14568_v26 }
 0x952   : > { %11048 = vmatprep.subr.bf16.mxu0 %v11047_v28  ;;  %11062 = vmatpush3.bf16.msra.mxu1 %v11059_v49  ;;  %v8933_v42 = vsel %vm1671_vm9, %v12305_v51, %v12295_v36 }
 0x953   : > { %v14575_v61 = vpop.permute.xlu1 %12313  ;;  %11050 = vmatpush1.bf16.msra.mxu0 %v11049_v57  ;;  %11076 = vmatprep.subr.bf16.mxu1 %v11075_v3  ;;  %v8708_v44 = vsel %vm1499_vm8, %v12290_v15, %v12280_v14 }
 0x954   : > { %v12299_v60 = vpop.permute.xlu0 %12298  ;;  %11064 = vmatprep.subr.bf16.mxu0 %v11063_v0  ;;  %v12316_v6 = vunpack.i.h.bf16 %v14575_v61  ;;  %v12315_v25 = vunpack.i.l.bf16 %v14575_v61 }
 0x955   : > { %10494 = vmatmul.mubr.msk.f32.vlgmr.msra.gmra.mrb[72].mxu1 %vm7412_vm13, %v9786_v1  ;;  %v12301_v47 = vunpack.i.h.bf16 %v12299_v60  ;;  %v12300_v37 = vunpack.i.l.bf16 %v12299_v60 }
 0x956   : > { %11078 = vmatpush3.bf16.msra.mxu1 %v11075_v3  ;;  %9787 = vmatmul.mubr.msk.f32.vlgmr.msra.gmra.mrb[8].mxu0 %vm7412_vm13, %v9785_v12  ;;  %v8940_v57 = vsel %vm1671_vm9, %v12315_v25, %v12316_v6 }
 0x957   : > { %v12324_v31 = vpop.permute.xlu1 %12323  ;;  %11066 = vmatpush1.bf16.msra.mxu0 %v11065_v45  ;;  %11080 = vmatprep.subr.bf16.mxu1 %v11079_v10  ;;  %v8936_v59 = vsel %vm1671_vm9, %v12300_v37, %v12301_v47  ;;  %v11099_v29 = vpack.c.bf16 %v12301_v47, %v12296_v20  ;;  %v8935_v13 = vsel %vm1671_vm9, %v12306_v54, %v12300_v37 }
 0x958   : > { %v12326_v55 = vunpack.i.h.bf16 %v12324_v31  ;;  %v12325_v41 = vunpack.i.l.bf16 %v12324_v31  ;;  %v12309_v53 = vpop.permute.xlu0 %12308  ;;  %11068 = vmatprep.subr.bf16.mxu0 %v11067_v38  ;;  %8573 = vmatprep.mubr.f32.mxu0 %v12440_v18  ;;  %v11087_v7 = vpack.c.bf16 %v8936_v59, %v8934_v11  ;;  %v11089_v26 = vpack.c.bf16 %v8935_v13, %v8933_v42 }
 0x959   : > { %10508 = vmatprep.mubr.msk.f32.mxu1 %vm7412_vm13, %v9791_v48  ;;  %v12311_v12 = vunpack.i.h.bf16 %v12309_v53  ;;  %v12310_v23 = vunpack.i.l.bf16 %v12309_v53 }
 0x95a   : > { %v11083_v58 = vpack.c.bf16 %v12326_v55, %v12281_v5  ;;  %v8710_v62 = vsel %vm1499_vm8, %v12291_v40, %v12325_v41  ;;  %11082 = vmatpush3.bf16.msra.mxu1 %v11079_v10  ;;  %v8711_v50 = vsel %vm1499_vm8, %v12325_v41, %v12326_v55  ;;  %9788 = vmatmul.mubr.msk.f32.gmra.mrb[10].mxu0 %vm7412_vm13, %v9786_v1  ;;  %v9797_v1 = vld [vmem:[%s12571_s26 + $0x70] sm:$0xff] }
 0x95b   : > { %v12329_v22 = vpop.permute.xlu1 %12328  ;;  %11070 = vmatpush1.bf16.msra.mxu0 %v11069_v9  ;;  %v11071_v34 = vpack.c.bf16 %v8711_v50, %v8709_v30  ;;  %8800 = vmatprep.mubr.f32.mxu0 %v12440_v18  ;;  %v11073_v19 = vpack.c.bf16 %v8710_v62, %v8708_v44  ;;  %v8938_v49 = vsel %vm1671_vm9, %v12310_v23, %v12311_v12  ;;  %v9798_v62 = vld [vmem:[%s12571_s26 + $0x78] sm:$0xff] }
 0x95c   : > { %v12319_v21 = vpop.permute.xlu0 %12318  ;;  %11084 = vmatprep.subr.bf16.mxu1 %v11083_v58  ;;  %v11103_v28 = vpack.c.bf16 %v12316_v6, %v12311_v12  ;;  %v12331_v32 = vunpack.i.h.bf16 %v12329_v22  ;;  %v12330_v56 = vunpack.i.l.bf16 %v12329_v22  ;;  %v11091_v0 = vpack.c.bf16 %v8940_v57, %v8938_v49 }
 0x95d   : > { %v12321_v46 = vunpack.i.h.bf16 %v12319_v21  ;;  %v12320_v2 = vunpack.i.l.bf16 %v12319_v21  ;;  %11072 = vmatprep.subr.bf16.mxu0 %v11071_v34 }
 0x95e   : > { %11086 = vmatpush3.bf16.msra.mxu1 %v11083_v58  ;;  %v8942_v17 = vsel %vm1671_vm9, %v12330_v56, %v12331_v32 }
 0x95f   : > { %v12334_v4 = vpop.permute.xlu1 %12333  ;;  %11074 = vmatpush1.bf16.msra.mxu0 %v11073_v19  ;;  %11100 = vmatprep.subr.bf16.mxu1 %v11099_v29  ;;  %v8937_v3 = vsel %vm1671_vm9, %v12320_v2, %v12310_v23  ;;  %v8939_v35 = vsel %vm1671_vm9, %v12321_v46, %v12315_v25  ;;  %v9803_v25 = vld [vmem:[%s12571_s26 + $0x80] sm:$0xff] }
 0x960   : > { %v12339_v43 = vpop.permute.xlu0 %12338  ;;  %11088 = vmatprep.subr.bf16.mxu0 %v11087_v7  ;;  %v12335_v27 = vunpack.i.l.bf16 %v12334_v4  ;;  %v11093_v16 = vpack.c.bf16 %v8939_v35, %v8937_v3  ;;  %v12336_v8 = vunpack.i.h.bf16 %v12334_v4 }
 0x961   : > { %10509 = vmatmul.mubr.msk.f32.vlgmr.msra.gmra.mrb[72].mxu1 %vm7412_vm13, %v9792_v52  ;;  %v12341_v5 = vunpack.i.h.bf16 %v12339_v43  ;;  %v12340_v14 = vunpack.i.l.bf16 %v12339_v43 }
 0x962   : > { %11102 = vmatpush3.bf16.msra.mxu1 %v11099_v29  ;;  %9793 = vmatmul.mubr.msk.f32.vlgmr.msra.gmra.mrb[8].mxu0 %vm7412_vm13, %v9791_v48  ;;  %v8941_v63 = vsel %vm1671_vm9, %v12335_v27, %v12330_v56 }
 0x963   : > { %v12344_v61 = vpop.permute.xlu1 %12343  ;;  %11090 = vmatpush1.bf16.msra.mxu0 %v11089_v26  ;;  %11104 = vmatprep.subr.bf16.mxu1 %v11103_v28  ;;  %v9167_v30 = vsel %vm1843_vm10, %v12340_v14, %v12341_v5 }
 0x964   : > { %v12346_v45 = vunpack.i.h.bf16 %v12344_v61  ;;  %v12345_v10 = vunpack.i.l.bf16 %v12344_v61  ;;  %v12349_v60 = vpop.permute.xlu0 %12348  ;;  %11092 = vmatprep.subr.bf16.mxu0 %v11091_v0  ;;  %8806 = vmatprep.mubr.f32.mxu0 %v12440_v18  ;;  %v9804_v0 = vld [vmem:[%s12571_s26 + $0x88] sm:$0xff] }
 0x965   : > { %v12351_v20 = vunpack.i.h.bf16 %v12349_v60  ;;  %v12350_v36 = vunpack.i.l.bf16 %v12349_v60  ;;  %10523 = vmatprep.mubr.msk.f32.mxu1 %vm7412_vm13, %v9797_v1 }
 0x966   : > { %11106 = vmatpush3.bf16.msra.mxu1 %v11103_v28  ;;  %9794 = vmatmul.mubr.msk.f32.gmra.mrb[10].mxu0 %vm7412_vm13, %v9792_v52  ;;  %v9169_v31 = vsel %vm1843_vm10, %v12345_v10, %v12346_v45  ;;  %v11123_v41 = vpack.c.bf16 %v12346_v45, %v12341_v5 }
 0x967   : > { %v8943_v38 = vsel %vm1671_vm9, %v12336_v8, %v12350_v36  ;;  %v11107_v48 = vpack.c.bf16 %v12351_v20, %v12331_v32  ;;  %v12359_v47 = vpop.permute.xlu1 %12358  ;;  %11094 = vmatpush1.bf16.msra.mxu0 %v11093_v16  ;;  %v8944_v37 = vsel %vm1671_vm9, %v12350_v36, %v12351_v20  ;;  %9033 = vmatprep.mubr.f32.mxu0 %v12440_v18 }
 0x968   : > { %v11097_v40 = vpack.c.bf16 %v8943_v38, %v8941_v63  ;;  %v12354_v15 = vpop.permute.xlu0 %12353  ;;  %v11095_v55 = vpack.c.bf16 %v8944_v37, %v8942_v17  ;;  %v12361_v11 = vunpack.i.h.bf16 %v12359_v47  ;;  %v12360_v54 = vunpack.i.l.bf16 %v12359_v47 }
 0x969   : > { %v12356_v53 = vunpack.i.h.bf16 %v12354_v15  ;;  %v12355_v9 = vunpack.i.l.bf16 %v12354_v15  ;;  %11108 = vmatprep.subr.bf16.mxu1 %v11107_v48  ;;  %v11111_v58 = vpack.c.bf16 %v9169_v31, %v9167_v30 }
 0x96a   : > { %11096 = vmatprep.subr.bf16.mxu0 %v11095_v55  ;;  %11110 = vmatpush3.bf16.msra.mxu1 %v11107_v48  ;;  %v9171_v29 = vsel %vm1843_vm10, %v12360_v54, %v12361_v11 }
 0x96b   : > { %v9166_v50 = vsel %vm1843_vm10, %v12355_v9, %v12340_v14  ;;  %v9168_v12 = vsel %vm1843_vm10, %v12356_v53, %v12345_v10  ;;  %v12369_v23 = vpop.permute.xlu1 %12368  ;;  %11098 = vmatpush1.bf16.msra.mxu0 %v11097_v40  ;;  %11124 = vmatprep.subr.bf16.mxu1 %v11123_v41 }
 0x96c   : > { %v11113_v22 = vpack.c.bf16 %v9168_v12, %v9166_v50  ;;  %v12371_v34 = vunpack.i.h.bf16 %v12369_v23  ;;  %v12370_v59 = vunpack.i.l.bf16 %v12369_v23  ;;  %v12364_v51 = vpop.permute.xlu0 %12363  ;;  %11112 = vmatprep.subr.bf16.mxu0 %v11111_v58 }
 0x96d   : > { %v12366_v44 = vunpack.i.h.bf16 %v12364_v51  ;;  %v12365_v6 = vunpack.i.l.bf16 %v12364_v51  ;;  %10524 = vmatmul.mubr.msk.f32.vlgmr.msra.gmra.mrb[72].mxu1 %vm7412_vm13, %v9798_v62 }
 0x96e   : > { %v9170_v21 = vsel %vm1843_vm10, %v12370_v59, %v12360_v54  ;;  %11126 = vmatpush3.bf16.msra.mxu1 %v11123_v41  ;;  %9799 = vmatmul.mubr.msk.f32.vlgmr.msra.gmra.mrb[8].mxu0 %vm7412_vm13, %v9797_v1 }
 0x96f   : > { %v9172_v19 = vsel %vm1843_vm10, %v12371_v34, %v12365_v6  ;;  %v11127_v46 = vpack.c.bf16 %v12366_v44, %v12361_v11  ;;  %v12379_v2 = vpop.permute.xlu1 %12378  ;;  %11114 = vmatpush1.bf16.msra.mxu0 %v11113_v22  ;;  %v9173_v13 = vsel %vm1843_vm10, %v12365_v6, %v12366_v44  ;;  %9039 = vmatprep.mubr.f32.mxu0 %v12440_v18 }
 0x970   : > { %v11117_v7 = vpack.c.bf16 %v9172_v19, %v9170_v21  ;;  %v12381_v52 = vunpack.i.h.bf16 %v12379_v2  ;;  %v12380_v4 = vunpack.i.l.bf16 %v12379_v2  ;;  %v12374_v49 = vpop.permute.xlu0 %12373  ;;  %v11115_v42 = vpack.c.bf16 %v9173_v13, %v9171_v29  ;;  %10538 = vmatprep.mubr.msk.f32.mxu1 %vm7412_vm13, %v9803_v25 }
 0x971   : > { %v12376_v43 = vunpack.i.h.bf16 %v12374_v49  ;;  %v12375_v57 = vunpack.i.l.bf16 %v12374_v49  ;;  %11128 = vmatprep.subr.bf16.mxu1 %v11127_v46 }
 0x972   : > { %11116 = vmatprep.subr.bf16.mxu0 %v11115_v42  ;;  %11130 = vmatpush3.bf16.msra.mxu1 %v11127_v46  ;;  %v9177_v26 = vsel %vm1843_vm10, %v12380_v4, %v12381_v52 }
 0x973   : > { %v11131_v28 = vpack.c.bf16 %v12381_v52, %v12376_v43  ;;  %11118 = vmatpush1.bf16.msra.mxu0 %v11117_v7  ;;  %v9175_v3 = vsel %vm1843_vm10, %v12375_v57, %v12376_v43 }
 0x974   : > { %v12384_v35 = vpop.permute.xlu0 %12383  ;;  %v11119_v32 = vpack.c.bf16 %v9177_v26, %v9175_v3  ;;  %9800 = vmatmul.mubr.msk.f32.gmra.mrb[10].mxu0 %vm7412_vm13, %v9798_v62 }
 0x975   : > { %v12386_v56 = vunpack.i.h.bf16 %v12384_v35  ;;  %v12385_v27 = vunpack.i.l.bf16 %v12384_v35  ;;  %11132 = vmatprep.subr.bf16.mxu1 %v11131_v28  ;;  %9266 = vmatprep.mubr.f32.mxu0 %v12440_v18  ;;  %v9482_v35 = vld [vmem:[%s12546_s24] sm:$0xff] (!%p9809_p8) }
 0x976   : > { %11120 = vmatprep.subr.bf16.mxu0 %v11119_v32  ;;  %11134 = vmatpush3.bf16.msra.mxu1 %v11131_v28 }
 0x977   : > { %v9174_v1 = vsel %vm1843_vm10, %v12385_v27, %v12375_v57  ;;  %v9176_v61 = vsel %vm1843_vm10, %v12386_v56, %v12380_v4  ;;  %v9475_v27 = vstv (!%p9809_p8), %s9468_s28 }
 0x978   : > { %v11121_v16 = vpack.c.bf16 %v9176_v61, %v9174_v1  ;;  %v9484_v1 = vld [vmem:[%s12546_s24 + $0x10] sm:$0xff] (!%p9809_p8)  ;;  %v9485_v61 = vld [vmem:[%s12546_s24 + $0x18] sm:$0xff] (!%p9809_p8) }
 0x979   : > { %10539 = vmatmul.mubr.msk.f32.vlgmr.msra.gmra.mrb[72].mxu1 %vm7412_vm13, %v9804_v0 }
 0x97a   : > { %11122 = vmatpush1.bf16.msra.mxu0 %v11121_v16 }
 0x97d   : > { %9805 = vmatmul.mubr.msk.f32.vlgmr.msra.gmra.mrb[8].mxu0 %vm7412_vm13, %v9803_v25 }
 0x97e   : > { %9272 = vmatprep.mubr.f32.mxu0 %v12440_v18 }
 0x980   : > { %v9365_v8 = vpop.permute.xlu1 %9364 }
 0x981   : > { %9806 = vmatmul.mubr.msk.f32.gmra.mrb[10].mxu0 %vm7412_vm13, %v9804_v0  ;;  %v9483_v0 = vld [vmem:[%s12546_s24 + $0x8] sm:$0xff] (!%p9809_p8) }
 0x984   : > { %v9397_v10 = vpop.permute.xlu1 %9396 }
 0x985   : > { %v9370_v45 = vpop.permute.xlu0 %9369 }
 0x988   : > { %v9401_v36 = vpop.permute.xlu1 %9400 }
 0x989   : > { %v9399_v60 = vpop.permute.xlu0 %9398 }
 0x98a   : > { %v9409_v40 = vsel %vm1155_vm6, %v9399_v60, %v9401_v36  ;;  %v9408_v55 = vsel %vm1155_vm6, %v9397_v10, %v9399_v60  ;;  %v9486_v60 = vld [vmem:[%s12546_s24 + $0x20] sm:$0xff] (!%p9809_p8) }
 0x98c   : > { %v9405_v18 = vpop.permute.xlu1 %9404 }
 0x98d   : > { %v9403_v17 = vpop.permute.xlu0 %9402 }
 0x98e   : > { %v9410_v62 = vsel %vm1155_vm6, %v9403_v17, %v9405_v18 }
 0x991   : > { %v9407_v50 = vpop.permute.xlu0 %9406 }
 0x992   : > { %v9411_v44 = vsel %vm1155_vm6, %v9405_v18, %v9407_v50 }
 0xa4c   : > { %v10540_v5 = vpop.f32.mrb[72].mxu1 }
 0xa4d   : > { %v9345_v14 = vpop.f32.mrb[73].mxu1  ;;  %v9377_v15 = vadd.f32 %v10540_v5, %v9370_v45  ;;  %v9487_v5 = vld [vmem:[%s12546_s24 + $0x28] sm:$0xff] (!%p9809_p8) }
 0xa4e   : > { %v9374_v20 = vadd.f32 %v9365_v8, %v9345_v14 }
 0xa4f   : > { %v9383_v34 = vmul.f32 0.2, %v9377_v15 }
 0xa50   : > { %v9268_v63 = vpop.f32.mrb[8].mxu0  ;;  %v9380_v37 = vmul.f32 0.2, %v9374_v20 }
 0xa51   : > { %v9372_v38 = vadd.f32 %v9365_v8, %v9268_v63  ;;  %v9270_v48 = vpop.f32.mrb[9].mxu0  ;;  %v9423_v19 = vadd.f32 %v9407_v50, %v9383_v34 }
 0xa52   : > { %v9373_v47 = vadd.f32 %v9365_v8, %v9270_v48  ;;  %v9420_v23 = vadd.f32 %v9401_v36, %v9380_v37 }
 0xa53   : > { %v9378_v31 = vmul.f32 0.2, %v9372_v38  ;;  %v9429_v2 = vmul.f32 %v9423_v19, %v12804_v24 }
 0xa54   : > { %v9379_v41 = vmul.f32 0.2, %v9373_v47  ;;  %v9274_v53 = vpop.f32.mrb[10].mxu0  ;;  %v9426_v25 = vmul.f32 %v9420_v23, %v12804_v24 }
 0xa55   : > { %v9418_v9 = vadd.f32 %v9408_v55, %v9378_v31  ;;  %v9375_v30 = vadd.f32 %v9370_v45, %v9274_v53  ;;  %v9276_v11 = vpop.f32.mrb[11].mxu0 }
 0xa56   : > { %v9419_v54 = vadd.f32 %v9409_v40, %v9379_v41  ;;  %v9376_v58 = vadd.f32 %v9370_v45, %v9276_v11 }
 0xa57   : > { %v9424_v12 = vmul.f32 %v9418_v9, %v12815_v33  ;;  %v9381_v22 = vmul.f32 0.2, %v9375_v30 }
 0xa58   : > { %v9425_v59 = vmul.f32 %v9419_v54, %v12819_v39  ;;  %v9382_v51 = vmul.f32 0.2, %v9376_v58 }
 0xa59   : > { %v9421_v6 = vadd.f32 %v9410_v62, %v9381_v22  ;;  %9436 = vrot.lane.b32.xlu1 %v9424_v12, %s12450_s25 }
 0xa5a   : > { %9438 = vrot.lane.b32.xlu0 %v9425_v59, %s12450_s25  ;;  %v9422_v21 = vadd.f32 %v9411_v44, %v9382_v51 }
 0xa5b   : > { %v9427_v29 = vmul.f32 %v9421_v6, %v12815_v33 }
 0xa5c   : > { %v9428_v46 = vmul.f32 %v9422_v21, %v12819_v39 }
 0xa5d   : > { %9440 = vrot.lane.b32.xlu1 %v9426_v25, %s12450_s25 }
 0xa5e   : > { %9442 = vrot.lane.b32.xlu0 %v9427_v29, %s12450_s25 }
 0xa61   : > { %9444 = vrot.lane.b32.xlu1 %v9428_v46, %s12450_s25 }
 0xa62   : > { %9446 = vrot.lane.b32.xlu0 %v9429_v2, %s12450_s25 }
 0xacb   : > { %v9437_v13 = vpop.permute.xlu1 %9436 }
 0xacc   : > { %9458 = vst.msk [vmem:[#allocation2] sm:$0xff] %vm2053_vm14, %v9437_v13  ;;  %v9439_v7 = vpop.permute.xlu0 %9438 }
 0xacd   : > { %v9448_v52 = vsel %vm2047_vm15, %v9437_v13, %v9439_v7 }
 0xace   : > { %9459 = vst [vmem:[#allocation2 + $0x8] sm:$0xff] %v9448_v52 }
 0xacf   : > { %v9441_v33 = vpop.permute.xlu1 %9440 }
 0xad0   : > { %v9449_v4 = vsel %vm2047_vm15, %v9439_v7, %v9441_v33  ;;  %v9443_v49 = vpop.permute.xlu0 %9442  ;;  %9467 = sbr.rel (%p9809_p8) target bundleno = 2787 (0xae3), region = 60 }
 0xad1   : > { %9460 = vst.msk [vmem:[#allocation2 + $0x10] sm:$0xff] %vm2056_vm0, %v9449_v4 }
 0xad2   : > { %9461 = vst.msk [vmem:[#allocation2 + $0x18] sm:$0xff] %vm2053_vm14, %v9443_v49 }
 0xad3   : > { %v9445_v24 = vpop.permute.xlu1 %9444  ;;  %v9469_v57 = vld [vmem:[#allocation2] sm:$0xff] (!%p9809_p8) }
 0xad4   : > { %v9450_v39 = vsel %vm2047_vm15, %v9443_v49, %v9445_v24  ;;  %v9447_v42 = vpop.permute.xlu0 %9446  ;;  %v9476_v16 = vmul.f32 (!%p9809_p8), %v9475_v27, %v9469_v57 }
 0xad5   : > { %9462 = vst [vmem:[#allocation2 + $0x20] sm:$0xff] %v9450_v39  ;;  %v9451_v43 = vsel %vm2047_vm15, %v9445_v24, %v9447_v42  ;;  %v9470_v26 = vld [vmem:[#allocation2 + $0x8] sm:$0xff] (!%p9809_p8) }
 0xad6   : > { %9463 = vst.msk [vmem:[#allocation2 + $0x28] sm:$0xff] %vm2056_vm0, %v9451_v43  ;;  %v9477_v8 = vmul.f32 (!%p9809_p8), %v9475_v27, %v9470_v26  ;;  %v9488_v36 = vadd.f32 (!%p9809_p8), %v9482_v35, %v9476_v16 }
 0xad8   : > { %v9471_v28 = vld [vmem:[#allocation2 + $0x10] sm:$0xff]  ;;  %v9489_v63 = vadd.f32 %v9483_v0, %v9477_v8  ;;  %9494 = vst [vmem:[%s12576_s30] sm:$0xff] %v9488_v36 }
 0xad9   : > { %v9472_v3 = vld [vmem:[#allocation2 + $0x18] sm:$0xff]  ;;  %v9478_v45 = vmul.f32 %v9475_v27, %v9471_v28 }
 0xada   : > { %v9479_v10 = vmul.f32 %v9475_v27, %v9472_v3  ;;  %9495 = vst [vmem:[%s12576_s30 + $0x8] sm:$0xff] %v9489_v63 }
 0xadb   : > { %v9490_v17 = vadd.f32 %v9484_v1, %v9478_v45 }
 0xadc   : > { %v9473_v32 = vld [vmem:[#allocation2 + $0x20] sm:$0xff]  ;;  %v9491_v38 = vadd.f32 %v9485_v61, %v9479_v10 }
 0xadd   : > { %v9474_v56 = vld [vmem:[#allocation2 + $0x28] sm:$0xff]  ;;  %v9480_v14 = vmul.f32 %v9475_v27, %v9473_v32  ;;  %9497 = vst.msk [vmem:[%s12576_s30 + $0x10] sm:$0xff] %vm9496_vm2, %v9490_v17 }
 0xade   : > { %v9481_v20 = vmul.f32 %v9475_v27, %v9474_v56  ;;  %9498 = vst [vmem:[%s12576_s30 + $0x18] sm:$0xff] %v9491_v38 }
 0xadf   : > { %v9492_v48 = vadd.f32 %v9486_v60, %v9480_v14 }
 0xae0   : > { %v9493_v47 = vadd.f32 %v9487_v5, %v9481_v20 }
 0xae1   : > { %9499 = vst [vmem:[%s12576_s30 + $0x20] sm:$0xff] %v9492_v48 }
 0xae2   : > { %9500 = vst.msk [vmem:[%s12576_s30 + $0x28] sm:$0xff] %vm9496_vm2, %v9493_v47 }
 0xae3 PF: > { %s20_s15 = sadd.s32 1, %s12435_s15   ;;  %s14718_s24 = sld [smem:[#allocation5_spill]] }
 0xae4   : > { %p17_p9 = scmp.ge.s32.totalorder %s20_s15, 8   ;;  %s14719_s11 = smov %s12427_s13 }
 0xae5   : > { %s14720_s12 = smov %s12431_s14  ;;  %s14721_s13 = smov %s14724_s0 }
 0xae6   :  { %19 = sbr.rel (!%p17_p9) target bundleno = 6 (0x6), region = 148 }
 0xae9   : > { %s14722_s14 = smov %s14718_s24 }

</bundles_post_ra>
